<compile_context>
chip_gen: v6e
topology: v6e:2x2x1
jax: 0.10.0
libtpu: 0.0.40
codegen_flags: <defaults>
</compile_context>

<pallas_src>
import functools

import jax
import jax.numpy as jnp
from jax.experimental import pallas as pl
from jax.experimental.pallas import tpu as pltpu

NUM_HEADS = 4
LN_EPS = 1e-5  # torch.nn.LayerNorm default

PARAM_ORDER = ("wq", "bq", "wk", "bk", "wv", "bv", "wo", "bo",
               "w1", "b1", "w2", "b2", "g1", "be1", "g2", "be2")


def _attention_block_kernel(num_heads, seq_len,
                            q_ref, k_ref, v_ref,
                            wq_ref, bq_ref, wk_ref, bk_ref, wv_ref, bv_ref,
                            wo_ref, bo_ref,
                            w1_ref, b1_ref, w2_ref, b2_ref,
                            g1_ref, be1_ref, g2_ref, be2_ref,
                            o_ref):
    # Activations arrive flattened: (M, D) with M = batch_tile * seq_len.
    M, D = q_ref.shape
    S = seq_len
    BT = M // S
    H = num_heads
    hd = D // H
    f32 = jnp.float32
    bf16 = jnp.bfloat16

    residual = q_ref[...]                                   # (M, D) f32

    # ---- QKV projections on the full flattened slab (bf16 MXU inputs, f32 acc).
    # The 1/sqrt(head_dim) attention scale is folded into wq/bq (pack_params).
    Q = jnp.dot(residual.astype(bf16), wq_ref[...], preferred_element_type=f32) + bq_ref[...]
    K = jnp.dot(k_ref[...].astype(bf16), wk_ref[...], preferred_element_type=f32) + bk_ref[...]
    V = jnp.dot(v_ref[...].astype(bf16), wv_ref[...], preferred_element_type=f32) + bv_ref[...]

    # ---- Multi-head attention: batched over the batch dim, heads unrolled.
    Q3 = Q.reshape(BT, S, D).astype(bf16)
    K3 = K.reshape(BT, S, D).astype(bf16)
    V3 = V.reshape(BT, S, D).astype(bf16)

    head_outs = []
    for h in range(H):
        lo = h * hd
        qh = Q3[:, :, lo:lo + hd]                            # (BT, S, hd)
        kh = K3[:, :, lo:lo + hd]
        vh = V3[:, :, lo:lo + hd]
        # Scores: contract over head_dim (no explicit K transpose), batch over BT.
        s = jnp.einsum('bqd,bkd->bqk', qh, kh,
                       preferred_element_type=f32)           # (BT, S, S)
        s = s - jnp.max(s, axis=-1, keepdims=True)
        p = jnp.exp(s)
        p = p * pl.reciprocal(jnp.sum(p, axis=-1, keepdims=True), approx=True)
        oh = jnp.einsum('bqk,bkd->bqd', p.astype(bf16), vh,
                        preferred_element_type=f32)          # (BT, S, hd)
        head_outs.append(oh.astype(bf16))

    # One full-D output projection (contraction dim = D keeps the MXU contraction
    # full) instead of H skinny (contraction = hd) matmuls accumulated per head.
    heads = jnp.concatenate(head_outs, axis=-1).reshape(M, D)   # (M, D) bf16
    attn = jnp.dot(heads, wo_ref[...], preferred_element_type=f32)

    # ---- out_proj bias + dropout1 (identity) + residual + LN1 (f32 statistics).
    x = residual + attn + bo_ref[...]
    mu = jnp.mean(x, axis=-1, keepdims=True)
    var = jnp.mean((x - mu) ** 2, axis=-1, keepdims=True)
    x1 = (x - mu) * jax.lax.rsqrt(var + LN_EPS) * g1_ref[...] + be1_ref[...]

    # ---- Feed-forward (D -> 4D -> D) + ReLU + dropout2 (identity) + residual + LN2.
    h1 = jnp.dot(x1.astype(bf16), w1_ref[...], preferred_element_type=f32) + b1_ref[...]
    h1 = jnp.maximum(h1, 0.0).astype(bf16)   # bf16 hidden: halves the (M, 4D) intermediate
    ff = jnp.dot(h1, w2_ref[...], preferred_element_type=f32) + b2_ref[...]
    y = x1 + ff
    mu2 = jnp.mean(y, axis=-1, keepdims=True)
    var2 = jnp.mean((y - mu2) ** 2, axis=-1, keepdims=True)
    o_ref[...] = ((y - mu2) * jax.lax.rsqrt(var2 + LN_EPS) * g2_ref[...]
                  + be2_ref[...]).astype(o_ref.dtype)


def pack_params(params, num_heads=NUM_HEADS):
    """One-time host-side parameter prep (not per-call work):
       * fold the 1/sqrt(head_dim) attention scale into wq / bq,
       * cast matmul weights to bf16 (MXU-native; halves weight VMEM/DMA bytes),
       * keep biases and LayerNorm params in f32 (VPU/EUP-side math stays f32)."""
    D = params["wq"].shape[0]
    hd = D // num_heads
    scale = jnp.float32(1.0 / (hd ** 0.5))
    p = dict(params)
    p["wq"] = params["wq"] * scale
    p["bq"] = params["bq"] * scale
    for name in ("wq", "wk", "wv", "wo", "w1", "w2"):
        p[name] = p[name].astype(jnp.bfloat16)
    return p


def _choose_batch_tile(B, S):
    """Prefer >= 4 grid steps (pipelining + v7x megacore), subject to
    B % steps == 0 and the sublane rule (BT*S % 8 == 0 when BT < B)."""
    for steps in (4, 8, 2):
        if B % steps == 0:
            bt = B // steps
            if (bt * S) % 8 == 0:
                return bt
    return B


def _vmem_limit_bytes():
    """Generation-aware VMEM limit: leave ~16 MiB headroom below physical per-core
    VMEM (v7x: 64 MiB -> ~48 MiB; v5e/v6e: 128 MiB -> capped at 100 MiB)."""
    try:
        cap = int(getattr(pltpu.get_tpu_info(), "vmem_capacity_bytes"))
    except Exception:
        cap = 64 * 1024 * 1024
    return int(max(32 * 1024 * 1024,
                   min(cap - 16 * 1024 * 1024, 100 * 1024 * 1024)))


def attention_layer_forward(q, k, v, packed_params, num_heads=NUM_HEADS,
                            batch_tile=None, single_buffer_weights=True):
    B, S, D = q.shape
    assert D % num_heads == 0
    BT = _choose_batch_tile(B, S) if batch_tile is None else batch_tile
    assert B % BT == 0, "batch must divide evenly into batch tiles"
    assert BT == B or (BT * S) % 8 == 0, \
        "batch_tile*seq must be a multiple of 8 (sublane rule) when tiling the batch"
    weight_args = [packed_params[n] for n in PARAM_ORDER]

    # Flatten batch*seq so the projection / FFN matmuls see a (BT*S, D) slab.
    q2 = q.reshape(B * S, D)
    k2 = k.reshape(B * S, D)
    v2 = v.reshape(B * S, D)

    act_spec = pl.BlockSpec((BT * S, D), lambda b: (b, 0))
    out_spec = pl.BlockSpec((BT * S, D), lambda b: (b, 0))

    def const_spec(arr, single_buffer):
        zeros = (0,) * arr.ndim
        if single_buffer:
            # Constant index_map across the grid: single-buffer the weights so
            # they are not pointlessly double-buffered (halves weight footprint).
            return pl.BlockSpec(arr.shape, lambda b, z=zeros: z,
                                pipeline_mode=pl.Buffered(1))
        return pl.BlockSpec(arr.shape, lambda b, z=zeros: z)

    kernel = functools.partial(_attention_block_kernel, num_heads, S)

    def build(single_buffer):
        return pl.pallas_call(
            kernel,
            out_shape=jax.ShapeDtypeStruct((B * S, D), jnp.float32),
            grid_spec=pltpu.PrefetchScalarGridSpec(
                num_scalar_prefetch=0,
                grid=(B // BT,),
                in_specs=[act_spec, act_spec, act_spec]
                         + [const_spec(a, single_buffer) for a in weight_args],
                out_specs=out_spec,
            ),
            compiler_params=pltpu.CompilerParams(
                dimension_semantics=("parallel",),
                vmem_limit_bytes=_vmem_limit_bytes(),
            ),
        )

    try:
        out = build(single_buffer_weights)(q2, k2, v2, *weight_args)
    except Exception:
        if not single_buffer_weights:
            raise
        # Fallback if this JAX/Mosaic version rejects single-buffered specs.
        out = build(False)(q2, k2, v2, *weight_args)
    return out.reshape(B, S, D)


def init_params(key, input_dim, num_heads=NUM_HEADS):
    ff_dim = input_dim * 4
    ks = jax.random.split(key, 8)
    s = 1.0 / (input_dim ** 0.5)
    sf = 1.0 / (ff_dim ** 0.5)
    p = {
        "wq": jax.random.normal(ks[0], (input_dim, input_dim), jnp.float32) * s,
        "bq": jax.random.normal(ks[1], (1, input_dim), jnp.float32) * 0.01,
        "wk": jax.random.normal(ks[2], (input_dim, input_dim), jnp.float32) * s,
        "bk": jax.random.normal(ks[3], (1, input_dim), jnp.float32) * 0.01,
        "wv": jax.random.normal(ks[4], (input_dim, input_dim), jnp.float32) * s,
        "bv": jax.random.normal(ks[5], (1, input_dim), jnp.float32) * 0.01,
        "wo": jax.random.normal(ks[6], (input_dim, input_dim), jnp.float32) * s,
        "bo": jnp.zeros((1, input_dim), jnp.float32),
        "w1": jax.random.normal(ks[7], (input_dim, ff_dim), jnp.float32) * s,
        "b1": jnp.zeros((1, ff_dim), jnp.float32),
        "w2": jax.random.normal(jax.random.fold_in(key, 99), (ff_dim, input_dim),
                                jnp.float32) * sf,
        "b2": jnp.zeros((1, input_dim), jnp.float32),
        "g1": jnp.ones((1, input_dim), jnp.float32),
        "be1": jnp.zeros((1, input_dim), jnp.float32),
        "g2": jnp.ones((1, input_dim), jnp.float32),
        "be2": jnp.zeros((1, input_dim), jnp.float32),
    }
    return p


def reference_forward(q, k, v, p, num_heads=NUM_HEADS):
    """Pure-JAX f32 reference mirroring the PyTorch forward (dropout = identity)."""
    B, S, D = q.shape
    hd = D // num_heads
    residual = q
    Q = q @ p["wq"] + p["bq"]
    K = k @ p["wk"] + p["bk"]
    V = v @ p["wv"] + p["bv"]

    def heads(x):  # (B,S,D) -> stacked like torch.cat(split(head_dim,-1), dim=0)
        return jnp.concatenate(jnp.split(x, num_heads, axis=-1), axis=0)

    Qh, Kh, Vh = heads(Q), heads(K), heads(V)
    s = Qh @ jnp.swapaxes(Kh, -1, -2) / (hd ** 0.5)
    pmat = jax.nn.softmax(s, axis=-1)
    out = pmat @ Vh
    out = jnp.concatenate(jnp.split(out, num_heads, axis=0), axis=-1)
    out = out @ p["wo"] + p["bo"]

    def ln(x, g, b):
        mu = jnp.mean(x, axis=-1, keepdims=True)
        var = jnp.mean((x - mu) ** 2, axis=-1, keepdims=True)
        return (x - mu) * jax.lax.rsqrt(var + LN_EPS) * g + b

    x1 = ln(residual + out, p["g1"], p["be1"])
    ff = jnp.maximum(x1 @ p["w1"] + p["b1"], 0.0) @ p["w2"] + p["b2"]
    return ln(x1 + ff, p["g2"], p["be2"])


if __name__ == "__main__":
    # D = 128 -> lane-dense blocks (unmasked stores, full VPU/MXU lanes);
    # B = 8 with the default batch tile of 2 -> grid of 4 pipelined steps.
    B, S, D = 8, 8, 128
    key = jax.random.PRNGKey(0)
    kq, kk, kv, kp = jax.random.split(key, 4)
    q = jax.random.normal(kq, (B, S, D), jnp.float32)
    k = jax.random.normal(kk, (B, S, D), jnp.float32)
    v = jax.random.normal(kv, (B, S, D), jnp.float32)
    params = init_params(kp, D)
    packed = pack_params(params)   # one-time host-side prep (scale fold + bf16 cast)

    out = attention_layer_forward(q, k, v, packed)
    out = jax.block_until_ready(out)

    ref = reference_forward(q, k, v, params)
    assert out.shape == (B, S, D)
    err = float(jnp.max(jnp.abs(out - ref)))
    # bf16 MXU inputs / bf16 FFN hidden with f32 accumulation + approx softmax
    # reciprocal vs. a full-f32 reference.
    assert err < 2e-1, err
    print("KERNEL_OK")
</pallas_src>

<mosaic_0001>
module attributes {stable_mosaic.version = 11 : i64} {
  func.func @_attention_block_kernel(%arg0: i32, %arg1: memref<16x128xf32, #tpu.memory_space<vmem>>, %arg2: memref<16x128xf32, #tpu.memory_space<vmem>>, %arg3: memref<16x128xf32, #tpu.memory_space<vmem>>, %arg4: memref<128x128xbf16, #tpu.memory_space<vmem>>, %arg5: memref<1x128xf32, #tpu.memory_space<vmem>>, %arg6: memref<128x128xbf16, #tpu.memory_space<vmem>>, %arg7: memref<1x128xf32, #tpu.memory_space<vmem>>, %arg8: memref<128x128xbf16, #tpu.memory_space<vmem>>, %arg9: memref<1x128xf32, #tpu.memory_space<vmem>>, %arg10: memref<128x128xbf16, #tpu.memory_space<vmem>>, %arg11: memref<1x128xf32, #tpu.memory_space<vmem>>, %arg12: memref<128x512xbf16, #tpu.memory_space<vmem>>, %arg13: memref<1x512xf32, #tpu.memory_space<vmem>>, %arg14: memref<512x128xbf16, #tpu.memory_space<vmem>>, %arg15: memref<1x128xf32, #tpu.memory_space<vmem>>, %arg16: memref<1x128xf32, #tpu.memory_space<vmem>>, %arg17: memref<1x128xf32, #tpu.memory_space<vmem>>, %arg18: memref<1x128xf32, #tpu.memory_space<vmem>>, %arg19: memref<1x128xf32, #tpu.memory_space<vmem>>, %arg20: memref<16x128xf32, #tpu.memory_space<vmem>>) attributes {dimension_semantics = [#tpu.dimension_semantics<parallel>], iteration_bounds = array<i64: 4>, scalar_prefetch = 0 : i64, scratch_operands = 0 : i64, tpu.core_type = #tpu.core_type<tc>, window_params = [{transform_indices = @transform_0, window_bounds = array<i64: 16, 128>}, {transform_indices = @transform_1, window_bounds = array<i64: 16, 128>}, {transform_indices = @transform_2, window_bounds = array<i64: 16, 128>}, {pipeline_mode = #tpu.pipeline_mode<synchronous>, transform_indices = @transform_3, window_bounds = array<i64: 128, 128>}, {pipeline_mode = #tpu.pipeline_mode<synchronous>, transform_indices = @transform_4, window_bounds = array<i64: 1, 128>}, {pipeline_mode = #tpu.pipeline_mode<synchronous>, transform_indices = @transform_5, window_bounds = array<i64: 128, 128>}, {pipeline_mode = #tpu.pipeline_mode<synchronous>, transform_indices = @transform_6, window_bounds = array<i64: 1, 128>}, {pipeline_mode = #tpu.pipeline_mode<synchronous>, transform_indices = @transform_7, window_bounds = array<i64: 128, 128>}, {pipeline_mode = #tpu.pipeline_mode<synchronous>, transform_indices = @transform_8, window_bounds = array<i64: 1, 128>}, {pipeline_mode = #tpu.pipeline_mode<synchronous>, transform_indices = @transform_9, window_bounds = array<i64: 128, 128>}, {pipeline_mode = #tpu.pipeline_mode<synchronous>, transform_indices = @transform_10, window_bounds = array<i64: 1, 128>}, {pipeline_mode = #tpu.pipeline_mode<synchronous>, transform_indices = @transform_11, window_bounds = array<i64: 128, 512>}, {pipeline_mode = #tpu.pipeline_mode<synchronous>, transform_indices = @transform_12, window_bounds = array<i64: 1, 512>}, {pipeline_mode = #tpu.pipeline_mode<synchronous>, transform_indices = @transform_13, window_bounds = array<i64: 512, 128>}, {pipeline_mode = #tpu.pipeline_mode<synchronous>, transform_indices = @transform_14, window_bounds = array<i64: 1, 128>}, {pipeline_mode = #tpu.pipeline_mode<synchronous>, transform_indices = @transform_15, window_bounds = array<i64: 1, 128>}, {pipeline_mode = #tpu.pipeline_mode<synchronous>, transform_indices = @transform_16, window_bounds = array<i64: 1, 128>}, {pipeline_mode = #tpu.pipeline_mode<synchronous>, transform_indices = @transform_17, window_bounds = array<i64: 1, 128>}, {pipeline_mode = #tpu.pipeline_mode<synchronous>, transform_indices = @transform_18, window_bounds = array<i64: 1, 128>}, {transform_indices = @transform_19, window_bounds = array<i64: 16, 128>}]} {
    %c0 = arith.constant 0 : index
    %c0_0 = arith.constant 0 : index
    %0 = vector.load %arg1[%c0, %c0_0] : memref<16x128xf32, #tpu.memory_space<vmem>>, vector<16x128xf32>
    %1 = arith.truncf %0 : vector<16x128xf32> to vector<16x128xbf16>
    %c0_1 = arith.constant 0 : index
    %c0_2 = arith.constant 0 : index
    %2 = vector.load %arg4[%c0_1, %c0_2] : memref<128x128xbf16, #tpu.memory_space<vmem>>, vector<128x128xbf16>
    %cst = arith.constant dense<0.000000e+00> : vector<16x128xf32>
    %3 = tpu.matmul %1, %2, %cst {dimension_numbers = #tpu.dot_dimension_numbers<[1], [0], [0], [1], [0, 0, 1, 1], [], []>} : vector<16x128xbf16>, vector<128x128xbf16>, vector<16x128xf32> -> vector<16x128xf32>
    %c0_3 = arith.constant 0 : index
    %c0_4 = arith.constant 0 : index
    %4 = vector.load %arg5[%c0_3, %c0_4] : memref<1x128xf32, #tpu.memory_space<vmem>>, vector<1x128xf32>
    %5 = vector.broadcast %4 : vector<1x128xf32> to vector<16x128xf32>
    %6 = arith.addf %3, %5 : vector<16x128xf32>
    %c0_5 = arith.constant 0 : index
    %c0_6 = arith.constant 0 : index
    %7 = vector.load %arg2[%c0_5, %c0_6] : memref<16x128xf32, #tpu.memory_space<vmem>>, vector<16x128xf32>
    %8 = arith.truncf %7 : vector<16x128xf32> to vector<16x128xbf16>
    %c0_7 = arith.constant 0 : index
    %c0_8 = arith.constant 0 : index
    %9 = vector.load %arg6[%c0_7, %c0_8] : memref<128x128xbf16, #tpu.memory_space<vmem>>, vector<128x128xbf16>
    %cst_9 = arith.constant dense<0.000000e+00> : vector<16x128xf32>
    %10 = tpu.matmul %8, %9, %cst_9 {dimension_numbers = #tpu.dot_dimension_numbers<[1], [0], [0], [1], [0, 0, 1, 1], [], []>} : vector<16x128xbf16>, vector<128x128xbf16>, vector<16x128xf32> -> vector<16x128xf32>
    %c0_10 = arith.constant 0 : index
    %c0_11 = arith.constant 0 : index
    %11 = vector.load %arg7[%c0_10, %c0_11] : memref<1x128xf32, #tpu.memory_space<vmem>>, vector<1x128xf32>
    %12 = vector.broadcast %11 : vector<1x128xf32> to vector<16x128xf32>
    %13 = arith.addf %10, %12 : vector<16x128xf32>
    %c0_12 = arith.constant 0 : index
    %c0_13 = arith.constant 0 : index
    %14 = vector.load %arg3[%c0_12, %c0_13] : memref<16x128xf32, #tpu.memory_space<vmem>>, vector<16x128xf32>
    %15 = arith.truncf %14 : vector<16x128xf32> to vector<16x128xbf16>
    %c0_14 = arith.constant 0 : index
    %c0_15 = arith.constant 0 : index
    %16 = vector.load %arg8[%c0_14, %c0_15] : memref<128x128xbf16, #tpu.memory_space<vmem>>, vector<128x128xbf16>
    %cst_16 = arith.constant dense<0.000000e+00> : vector<16x128xf32>
    %17 = tpu.matmul %15, %16, %cst_16 {dimension_numbers = #tpu.dot_dimension_numbers<[1], [0], [0], [1], [0, 0, 1, 1], [], []>} : vector<16x128xbf16>, vector<128x128xbf16>, vector<16x128xf32> -> vector<16x128xf32>
    %c0_17 = arith.constant 0 : index
    %c0_18 = arith.constant 0 : index
    %18 = vector.load %arg9[%c0_17, %c0_18] : memref<1x128xf32, #tpu.memory_space<vmem>>, vector<1x128xf32>
    %19 = vector.broadcast %18 : vector<1x128xf32> to vector<16x128xf32>
    %20 = arith.addf %17, %19 : vector<16x128xf32>
    %21 = vector.shape_cast %6 : vector<16x128xf32> to vector<2x8x128xf32>
    %22 = arith.truncf %21 : vector<2x8x128xf32> to vector<2x8x128xbf16>
    %23 = vector.shape_cast %13 : vector<16x128xf32> to vector<2x8x128xf32>
    %24 = arith.truncf %23 : vector<2x8x128xf32> to vector<2x8x128xbf16>
    %25 = vector.shape_cast %20 : vector<16x128xf32> to vector<2x8x128xf32>
    %26 = arith.truncf %25 : vector<2x8x128xf32> to vector<2x8x128xbf16>
    %27 = vector.extract_strided_slice %22 {offsets = [0, 0, 0], sizes = [2, 8, 32], strides = [1, 1, 1]} : vector<2x8x128xbf16> to vector<2x8x32xbf16>
    %28 = vector.extract_strided_slice %24 {offsets = [0, 0, 0], sizes = [2, 8, 32], strides = [1, 1, 1]} : vector<2x8x128xbf16> to vector<2x8x32xbf16>
    %29 = vector.extract_strided_slice %26 {offsets = [0, 0, 0], sizes = [2, 8, 32], strides = [1, 1, 1]} : vector<2x8x128xbf16> to vector<2x8x32xbf16>
    "tpu.trace_start"() <{level = 10 : i32, message = "bqd,bkd->bqk"}> : () -> ()
    %cst_19 = arith.constant dense<0.000000e+00> : vector<2x8x8xf32>
    %30 = tpu.matmul %27, %28, %cst_19 {dimension_numbers = #tpu.dot_dimension_numbers<[2], [2], [1], [1], [0, 0, 0, 1, 1, 1], [0], [0]>} : vector<2x8x32xbf16>, vector<2x8x32xbf16>, vector<2x8x8xf32> -> vector<2x8x8xf32>
    "tpu.trace_stop"() : () -> ()
    %cst_20 = arith.constant dense<0xFF800000> : vector<2x8xf32>
    %31 = vector.multi_reduction <maximumf>, %30, %cst_20 [2] : vector<2x8x8xf32> to vector<2x8xf32>
    %32 = vector.shape_cast %31 : vector<2x8xf32> to vector<2x8x1xf32>
    %33 = vector.broadcast %32 : vector<2x8x1xf32> to vector<2x8x8xf32>
    %34 = arith.subf %30, %33 : vector<2x8x8xf32>
    %35 = math.exp %34 : vector<2x8x8xf32>
    %cst_21 = arith.constant dense<0.000000e+00> : vector<2x8xf32>
    %36 = vector.multi_reduction <add>, %35, %cst_21 [2] : vector<2x8x8xf32> to vector<2x8xf32>
    %37 = vector.shape_cast %36 : vector<2x8xf32> to vector<2x8x1xf32>
    %38 = tpu.reciprocal %37 {approx = true} : vector<2x8x1xf32> -> vector<2x8x1xf32>
    %39 = vector.broadcast %38 : vector<2x8x1xf32> to vector<2x8x8xf32>
    %40 = arith.mulf %35, %39 : vector<2x8x8xf32>
    %41 = arith.truncf %40 : vector<2x8x8xf32> to vector<2x8x8xbf16>
    "tpu.trace_start"() <{level = 10 : i32, message = "bqk,bkd->bqd"}> : () -> ()
    %cst_22 = arith.constant dense<0.000000e+00> : vector<2x8x32xf32>
    %42 = tpu.matmul %41, %29, %cst_22 {dimension_numbers = #tpu.dot_dimension_numbers<[2], [1], [1], [2], [0, 0, 0, 1, 1, 2], [0], [0]>} : vector<2x8x8xbf16>, vector<2x8x32xbf16>, vector<2x8x32xf32> -> vector<2x8x32xf32>
    "tpu.trace_stop"() : () -> ()
    %43 = arith.truncf %42 : vector<2x8x32xf32> to vector<2x8x32xbf16>
    %44 = vector.extract_strided_slice %22 {offsets = [0, 0, 32], sizes = [2, 8, 32], strides = [1, 1, 1]} : vector<2x8x128xbf16> to vector<2x8x32xbf16>
    %45 = vector.extract_strided_slice %24 {offsets = [0, 0, 32], sizes = [2, 8, 32], strides = [1, 1, 1]} : vector<2x8x128xbf16> to vector<2x8x32xbf16>
    %46 = vector.extract_strided_slice %26 {offsets = [0, 0, 32], sizes = [2, 8, 32], strides = [1, 1, 1]} : vector<2x8x128xbf16> to vector<2x8x32xbf16>
    "tpu.trace_start"() <{level = 10 : i32, message = "bqd,bkd->bqk"}> : () -> ()
    %cst_23 = arith.constant dense<0.000000e+00> : vector<2x8x8xf32>
    %47 = tpu.matmul %44, %45, %cst_23 {dimension_numbers = #tpu.dot_dimension_numbers<[2], [2], [1], [1], [0, 0, 0, 1, 1, 1], [0], [0]>} : vector<2x8x32xbf16>, vector<2x8x32xbf16>, vector<2x8x8xf32> -> vector<2x8x8xf32>
    "tpu.trace_stop"() : () -> ()
    %cst_24 = arith.constant dense<0xFF800000> : vector<2x8xf32>
    %48 = vector.multi_reduction <maximumf>, %47, %cst_24 [2] : vector<2x8x8xf32> to vector<2x8xf32>
    %49 = vector.shape_cast %48 : vector<2x8xf32> to vector<2x8x1xf32>
    %50 = vector.broadcast %49 : vector<2x8x1xf32> to vector<2x8x8xf32>
    %51 = arith.subf %47, %50 : vector<2x8x8xf32>
    %52 = math.exp %51 : vector<2x8x8xf32>
    %cst_25 = arith.constant dense<0.000000e+00> : vector<2x8xf32>
    %53 = vector.multi_reduction <add>, %52, %cst_25 [2] : vector<2x8x8xf32> to vector<2x8xf32>
    %54 = vector.shape_cast %53 : vector<2x8xf32> to vector<2x8x1xf32>
    %55 = tpu.reciprocal %54 {approx = true} : vector<2x8x1xf32> -> vector<2x8x1xf32>
    %56 = vector.broadcast %55 : vector<2x8x1xf32> to vector<2x8x8xf32>
    %57 = arith.mulf %52, %56 : vector<2x8x8xf32>
    %58 = arith.truncf %57 : vector<2x8x8xf32> to vector<2x8x8xbf16>
    "tpu.trace_start"() <{level = 10 : i32, message = "bqk,bkd->bqd"}> : () -> ()
    %cst_26 = arith.constant dense<0.000000e+00> : vector<2x8x32xf32>
    %59 = tpu.matmul %58, %46, %cst_26 {dimension_numbers = #tpu.dot_dimension_numbers<[2], [1], [1], [2], [0, 0, 0, 1, 1, 2], [0], [0]>} : vector<2x8x8xbf16>, vector<2x8x32xbf16>, vector<2x8x32xf32> -> vector<2x8x32xf32>
    "tpu.trace_stop"() : () -> ()
    %60 = arith.truncf %59 : vector<2x8x32xf32> to vector<2x8x32xbf16>
    %61 = vector.extract_strided_slice %22 {offsets = [0, 0, 64], sizes = [2, 8, 32], strides = [1, 1, 1]} : vector<2x8x128xbf16> to vector<2x8x32xbf16>
    %62 = vector.extract_strided_slice %24 {offsets = [0, 0, 64], sizes = [2, 8, 32], strides = [1, 1, 1]} : vector<2x8x128xbf16> to vector<2x8x32xbf16>
    %63 = vector.extract_strided_slice %26 {offsets = [0, 0, 64], sizes = [2, 8, 32], strides = [1, 1, 1]} : vector<2x8x128xbf16> to vector<2x8x32xbf16>
    "tpu.trace_start"() <{level = 10 : i32, message = "bqd,bkd->bqk"}> : () -> ()
    %cst_27 = arith.constant dense<0.000000e+00> : vector<2x8x8xf32>
    %64 = tpu.matmul %61, %62, %cst_27 {dimension_numbers = #tpu.dot_dimension_numbers<[2], [2], [1], [1], [0, 0, 0, 1, 1, 1], [0], [0]>} : vector<2x8x32xbf16>, vector<2x8x32xbf16>, vector<2x8x8xf32> -> vector<2x8x8xf32>
    "tpu.trace_stop"() : () -> ()
    %cst_28 = arith.constant dense<0xFF800000> : vector<2x8xf32>
    %65 = vector.multi_reduction <maximumf>, %64, %cst_28 [2] : vector<2x8x8xf32> to vector<2x8xf32>
    %66 = vector.shape_cast %65 : vector<2x8xf32> to vector<2x8x1xf32>
    %67 = vector.broadcast %66 : vector<2x8x1xf32> to vector<2x8x8xf32>
    %68 = arith.subf %64, %67 : vector<2x8x8xf32>
    %69 = math.exp %68 : vector<2x8x8xf32>
    %cst_29 = arith.constant dense<0.000000e+00> : vector<2x8xf32>
    %70 = vector.multi_reduction <add>, %69, %cst_29 [2] : vector<2x8x8xf32> to vector<2x8xf32>
    %71 = vector.shape_cast %70 : vector<2x8xf32> to vector<2x8x1xf32>
    %72 = tpu.reciprocal %71 {approx = true} : vector<2x8x1xf32> -> vector<2x8x1xf32>
    %73 = vector.broadcast %72 : vector<2x8x1xf32> to vector<2x8x8xf32>
    %74 = arith.mulf %69, %73 : vector<2x8x8xf32>
    %75 = arith.truncf %74 : vector<2x8x8xf32> to vector<2x8x8xbf16>
    "tpu.trace_start"() <{level = 10 : i32, message = "bqk,bkd->bqd"}> : () -> ()
    %cst_30 = arith.constant dense<0.000000e+00> : vector<2x8x32xf32>
    %76 = tpu.matmul %75, %63, %cst_30 {dimension_numbers = #tpu.dot_dimension_numbers<[2], [1], [1], [2], [0, 0, 0, 1, 1, 2], [0], [0]>} : vector<2x8x8xbf16>, vector<2x8x32xbf16>, vector<2x8x32xf32> -> vector<2x8x32xf32>
    "tpu.trace_stop"() : () -> ()
    %77 = arith.truncf %76 : vector<2x8x32xf32> to vector<2x8x32xbf16>
    %78 = vector.extract_strided_slice %22 {offsets = [0, 0, 96], sizes = [2, 8, 32], strides = [1, 1, 1]} : vector<2x8x128xbf16> to vector<2x8x32xbf16>
    %79 = vector.extract_strided_slice %24 {offsets = [0, 0, 96], sizes = [2, 8, 32], strides = [1, 1, 1]} : vector<2x8x128xbf16> to vector<2x8x32xbf16>
    %80 = vector.extract_strided_slice %26 {offsets = [0, 0, 96], sizes = [2, 8, 32], strides = [1, 1, 1]} : vector<2x8x128xbf16> to vector<2x8x32xbf16>
    "tpu.trace_start"() <{level = 10 : i32, message = "bqd,bkd->bqk"}> : () -> ()
    %cst_31 = arith.constant dense<0.000000e+00> : vector<2x8x8xf32>
    %81 = tpu.matmul %78, %79, %cst_31 {dimension_numbers = #tpu.dot_dimension_numbers<[2], [2], [1], [1], [0, 0, 0, 1, 1, 1], [0], [0]>} : vector<2x8x32xbf16>, vector<2x8x32xbf16>, vector<2x8x8xf32> -> vector<2x8x8xf32>
    "tpu.trace_stop"() : () -> ()
    %cst_32 = arith.constant dense<0xFF800000> : vector<2x8xf32>
    %82 = vector.multi_reduction <maximumf>, %81, %cst_32 [2] : vector<2x8x8xf32> to vector<2x8xf32>
    %83 = vector.shape_cast %82 : vector<2x8xf32> to vector<2x8x1xf32>
    %84 = vector.broadcast %83 : vector<2x8x1xf32> to vector<2x8x8xf32>
    %85 = arith.subf %81, %84 : vector<2x8x8xf32>
    %86 = math.exp %85 : vector<2x8x8xf32>
    %cst_33 = arith.constant dense<0.000000e+00> : vector<2x8xf32>
    %87 = vector.multi_reduction <add>, %86, %cst_33 [2] : vector<2x8x8xf32> to vector<2x8xf32>
    %88 = vector.shape_cast %87 : vector<2x8xf32> to vector<2x8x1xf32>
    %89 = tpu.reciprocal %88 {approx = true} : vector<2x8x1xf32> -> vector<2x8x1xf32>
    %90 = vector.broadcast %89 : vector<2x8x1xf32> to vector<2x8x8xf32>
    %91 = arith.mulf %86, %90 : vector<2x8x8xf32>
    %92 = arith.truncf %91 : vector<2x8x8xf32> to vector<2x8x8xbf16>
    "tpu.trace_start"() <{level = 10 : i32, message = "bqk,bkd->bqd"}> : () -> ()
    %cst_34 = arith.constant dense<0.000000e+00> : vector<2x8x32xf32>
    %93 = tpu.matmul %92, %80, %cst_34 {dimension_numbers = #tpu.dot_dimension_numbers<[2], [1], [1], [2], [0, 0, 0, 1, 1, 2], [0], [0]>} : vector<2x8x8xbf16>, vector<2x8x32xbf16>, vector<2x8x32xf32> -> vector<2x8x32xf32>
    "tpu.trace_stop"() : () -> ()
    %94 = arith.truncf %93 : vector<2x8x32xf32> to vector<2x8x32xbf16>
    %95 = tpu.concatenate %43, %60, %77, %94 in 2 : vector<2x8x32xbf16>, vector<2x8x32xbf16>, vector<2x8x32xbf16>, vector<2x8x32xbf16> -> vector<2x8x128xbf16>
    %96 = vector.shape_cast %95 : vector<2x8x128xbf16> to vector<16x128xbf16>
    %c0_35 = arith.constant 0 : index
    %c0_36 = arith.constant 0 : index
    %97 = vector.load %arg10[%c0_35, %c0_36] : memref<128x128xbf16, #tpu.memory_space<vmem>>, vector<128x128xbf16>
    %cst_37 = arith.constant dense<0.000000e+00> : vector<16x128xf32>
    %98 = tpu.matmul %96, %97, %cst_37 {dimension_numbers = #tpu.dot_dimension_numbers<[1], [0], [0], [1], [0, 0, 1, 1], [], []>} : vector<16x128xbf16>, vector<128x128xbf16>, vector<16x128xf32> -> vector<16x128xf32>
    %99 = arith.addf %0, %98 : vector<16x128xf32>
    %c0_38 = arith.constant 0 : index
    %c0_39 = arith.constant 0 : index
    %100 = vector.load %arg11[%c0_38, %c0_39] : memref<1x128xf32, #tpu.memory_space<vmem>>, vector<1x128xf32>
    %101 = vector.broadcast %100 : vector<1x128xf32> to vector<16x128xf32>
    %102 = arith.addf %99, %101 : vector<16x128xf32>
    %cst_40 = arith.constant dense<0.000000e+00> : vector<16xf32>
    %103 = vector.multi_reduction <add>, %102, %cst_40 [1] : vector<16x128xf32> to vector<16xf32>
    %104 = vector.shape_cast %103 : vector<16xf32> to vector<16x1xf32>
    %cst_41 = arith.constant 1.280000e+02 : f32
    %105 = vector.broadcast %cst_41 : f32 to vector<16x1xf32>
    %106 = arith.divf %104, %105 : vector<16x1xf32>
    %107 = vector.broadcast %106 : vector<16x1xf32> to vector<16x128xf32>
    %108 = arith.subf %102, %107 : vector<16x128xf32>
    %109 = arith.mulf %108, %108 : vector<16x128xf32>
    %cst_42 = arith.constant dense<0.000000e+00> : vector<16xf32>
    %110 = vector.multi_reduction <add>, %109, %cst_42 [1] : vector<16x128xf32> to vector<16xf32>
    %111 = vector.shape_cast %110 : vector<16xf32> to vector<16x1xf32>
    %cst_43 = arith.constant 1.280000e+02 : f32
    %112 = vector.broadcast %cst_43 : f32 to vector<16x1xf32>
    %113 = arith.divf %111, %112 : vector<16x1xf32>
    %114 = vector.broadcast %106 : vector<16x1xf32> to vector<16x128xf32>
    %115 = arith.subf %102, %114 : vector<16x128xf32>
    %cst_44 = arith.constant 9.99999974E-6 : f32
    %116 = vector.broadcast %cst_44 : f32 to vector<16x1xf32>
    %117 = arith.addf %113, %116 : vector<16x1xf32>
    %118 = math.rsqrt %117 : vector<16x1xf32>
    %119 = vector.broadcast %118 : vector<16x1xf32> to vector<16x128xf32>
    %120 = arith.mulf %115, %119 : vector<16x128xf32>
    %c0_45 = arith.constant 0 : index
    %c0_46 = arith.constant 0 : index
    %121 = vector.load %arg16[%c0_45, %c0_46] : memref<1x128xf32, #tpu.memory_space<vmem>>, vector<1x128xf32>
    %122 = vector.broadcast %121 : vector<1x128xf32> to vector<16x128xf32>
    %123 = arith.mulf %120, %122 : vector<16x128xf32>
    %c0_47 = arith.constant 0 : index
    %c0_48 = arith.constant 0 : index
    %124 = vector.load %arg17[%c0_47, %c0_48] : memref<1x128xf32, #tpu.memory_space<vmem>>, vector<1x128xf32>
    %125 = vector.broadcast %124 : vector<1x128xf32> to vector<16x128xf32>
    %126 = arith.addf %123, %125 : vector<16x128xf32>
    %127 = arith.truncf %126 : vector<16x128xf32> to vector<16x128xbf16>
    %c0_49 = arith.constant 0 : index
    %c0_50 = arith.constant 0 : index
    %128 = vector.load %arg12[%c0_49, %c0_50] : memref<128x512xbf16, #tpu.memory_space<vmem>>, vector<128x512xbf16>
    %cst_51 = arith.constant dense<0.000000e+00> : vector<16x512xf32>
    %129 = tpu.matmul %127, %128, %cst_51 {dimension_numbers = #tpu.dot_dimension_numbers<[1], [0], [0], [1], [0, 0, 1, 1], [], []>} : vector<16x128xbf16>, vector<128x512xbf16>, vector<16x512xf32> -> vector<16x512xf32>
    %c0_52 = arith.constant 0 : index
    %c0_53 = arith.constant 0 : index
    %130 = vector.load %arg13[%c0_52, %c0_53] : memref<1x512xf32, #tpu.memory_space<vmem>>, vector<1x512xf32>
    %131 = vector.broadcast %130 : vector<1x512xf32> to vector<16x512xf32>
    %132 = arith.addf %129, %131 : vector<16x512xf32>
    %cst_54 = arith.constant 0.000000e+00 : f32
    %133 = vector.broadcast %cst_54 : f32 to vector<16x512xf32>
    %134 = arith.maximumf %132, %133 : vector<16x512xf32>
    %135 = arith.truncf %134 : vector<16x512xf32> to vector<16x512xbf16>
    %c0_55 = arith.constant 0 : index
    %c0_56 = arith.constant 0 : index
    %136 = vector.load %arg14[%c0_55, %c0_56] : memref<512x128xbf16, #tpu.memory_space<vmem>>, vector<512x128xbf16>
    %cst_57 = arith.constant dense<0.000000e+00> : vector<16x128xf32>
    %137 = tpu.matmul %135, %136, %cst_57 {dimension_numbers = #tpu.dot_dimension_numbers<[1], [0], [0], [1], [0, 0, 1, 1], [], []>} : vector<16x512xbf16>, vector<512x128xbf16>, vector<16x128xf32> -> vector<16x128xf32>
    %c0_58 = arith.constant 0 : index
    %c0_59 = arith.constant 0 : index
    %138 = vector.load %arg15[%c0_58, %c0_59] : memref<1x128xf32, #tpu.memory_space<vmem>>, vector<1x128xf32>
    %139 = vector.broadcast %138 : vector<1x128xf32> to vector<16x128xf32>
    %140 = arith.addf %137, %139 : vector<16x128xf32>
    %141 = arith.addf %126, %140 : vector<16x128xf32>
    %cst_60 = arith.constant dense<0.000000e+00> : vector<16xf32>
    %142 = vector.multi_reduction <add>, %141, %cst_60 [1] : vector<16x128xf32> to vector<16xf32>
    %143 = vector.shape_cast %142 : vector<16xf32> to vector<16x1xf32>
    %cst_61 = arith.constant 1.280000e+02 : f32
    %144 = vector.broadcast %cst_61 : f32 to vector<16x1xf32>
    %145 = arith.divf %143, %144 : vector<16x1xf32>
    %146 = vector.broadcast %145 : vector<16x1xf32> to vector<16x128xf32>
    %147 = arith.subf %141, %146 : vector<16x128xf32>
    %148 = arith.mulf %147, %147 : vector<16x128xf32>
    %cst_62 = arith.constant dense<0.000000e+00> : vector<16xf32>
    %149 = vector.multi_reduction <add>, %148, %cst_62 [1] : vector<16x128xf32> to vector<16xf32>
    %150 = vector.shape_cast %149 : vector<16xf32> to vector<16x1xf32>
    %cst_63 = arith.constant 1.280000e+02 : f32
    %151 = vector.broadcast %cst_63 : f32 to vector<16x1xf32>
    %152 = arith.divf %150, %151 : vector<16x1xf32>
    %153 = vector.broadcast %145 : vector<16x1xf32> to vector<16x128xf32>
    %154 = arith.subf %141, %153 : vector<16x128xf32>
    %cst_64 = arith.constant 9.99999974E-6 : f32
    %155 = vector.broadcast %cst_64 : f32 to vector<16x1xf32>
    %156 = arith.addf %152, %155 : vector<16x1xf32>
    %157 = math.rsqrt %156 : vector<16x1xf32>
    %158 = vector.broadcast %157 : vector<16x1xf32> to vector<16x128xf32>
    %159 = arith.mulf %154, %158 : vector<16x128xf32>
    %c0_65 = arith.constant 0 : index
    %c0_66 = arith.constant 0 : index
    %160 = vector.load %arg18[%c0_65, %c0_66] : memref<1x128xf32, #tpu.memory_space<vmem>>, vector<1x128xf32>
    %161 = vector.broadcast %160 : vector<1x128xf32> to vector<16x128xf32>
    %162 = arith.mulf %159, %161 : vector<16x128xf32>
    %c0_67 = arith.constant 0 : index
    %c0_68 = arith.constant 0 : index
    %163 = vector.load %arg19[%c0_67, %c0_68] : memref<1x128xf32, #tpu.memory_space<vmem>>, vector<1x128xf32>
    %164 = vector.broadcast %163 : vector<1x128xf32> to vector<16x128xf32>
    %165 = arith.addf %162, %164 : vector<16x128xf32>
    %c0_69 = arith.constant 0 : index
    %c0_70 = arith.constant 0 : index
    %166 = vector.load %arg20[%c0_69, %c0_70] : memref<16x128xf32, #tpu.memory_space<vmem>>, vector<16x128xf32>
    tpu.vector_store %arg20[%c0_69, %c0_70], %165 {strides = array<i32>} : memref<16x128xf32, #tpu.memory_space<vmem>>, vector<16x128xf32>,
    return
  }
  func.func @transform_0(%arg0: i32) -> (i32, i32) {
    %c0_i32 = arith.constant 0 : i32
    %c0_i32_0 = arith.constant 0 : i32
    return %arg0, %c0_i32 : i32, i32
  }
  func.func @transform_1(%arg0: i32) -> (i32, i32) {
    %c0_i32 = arith.constant 0 : i32
    %c0_i32_0 = arith.constant 0 : i32
    return %arg0, %c0_i32 : i32, i32
  }
  func.func @transform_2(%arg0: i32) -> (i32, i32) {
    %c0_i32 = arith.constant 0 : i32
    %c0_i32_0 = arith.constant 0 : i32
    return %arg0, %c0_i32 : i32, i32
  }
  func.func @transform_3(%arg0: i32) -> (i32, i32) {
    %c0_i32 = arith.constant 0 : i32
    %c0_i32_0 = arith.constant 0 : i32
    %c0_i32_1 = arith.constant 0 : i32
    return %c0_i32, %c0_i32_0 : i32, i32
  }
  func.func @transform_4(%arg0: i32) -> (i32, i32) {
    %c0_i32 = arith.constant 0 : i32
    %c0_i32_0 = arith.constant 0 : i32
    %c0_i32_1 = arith.constant 0 : i32
    return %c0_i32, %c0_i32_0 : i32, i32
  }
  func.func @transform_5(%arg0: i32) -> (i32, i32) {
    %c0_i32 = arith.constant 0 : i32
    %c0_i32_0 = arith.constant 0 : i32
    %c0_i32_1 = arith.constant 0 : i32
    return %c0_i32, %c0_i32_0 : i32, i32
  }
  func.func @transform_6(%arg0: i32) -> (i32, i32) {
    %c0_i32 = arith.constant 0 : i32
    %c0_i32_0 = arith.constant 0 : i32
    %c0_i32_1 = arith.constant 0 : i32
    return %c0_i32, %c0_i32_0 : i32, i32
  }
  func.func @transform_7(%arg0: i32) -> (i32, i32) {
    %c0_i32 = arith.constant 0 : i32
    %c0_i32_0 = arith.constant 0 : i32
    %c0_i32_1 = arith.constant 0 : i32
    return %c0_i32, %c0_i32_0 : i32, i32
  }
  func.func @transform_8(%arg0: i32) -> (i32, i32) {
    %c0_i32 = arith.constant 0 : i32
    %c0_i32_0 = arith.constant 0 : i32
    %c0_i32_1 = arith.constant 0 : i32
    return %c0_i32, %c0_i32_0 : i32, i32
  }
  func.func @transform_9(%arg0: i32) -> (i32, i32) {
    %c0_i32 = arith.constant 0 : i32
    %c0_i32_0 = arith.constant 0 : i32
    %c0_i32_1 = arith.constant 0 : i32
    return %c0_i32, %c0_i32_0 : i32, i32
  }
  func.func @transform_10(%arg0: i32) -> (i32, i32) {
    %c0_i32 = arith.constant 0 : i32
    %c0_i32_0 = arith.constant 0 : i32
    %c0_i32_1 = arith.constant 0 : i32
    return %c0_i32, %c0_i32_0 : i32, i32
  }
  func.func @transform_11(%arg0: i32) -> (i32, i32) {
    %c0_i32 = arith.constant 0 : i32
    %c0_i32_0 = arith.constant 0 : i32
    %c0_i32_1 = arith.constant 0 : i32
    return %c0_i32, %c0_i32_0 : i32, i32
  }
  func.func @transform_12(%arg0: i32) -> (i32, i32) {
    %c0_i32 = arith.constant 0 : i32
    %c0_i32_0 = arith.constant 0 : i32
    %c0_i32_1 = arith.constant 0 : i32
    return %c0_i32, %c0_i32_0 : i32, i32
  }
  func.func @transform_13(%arg0: i32) -> (i32, i32) {
    %c0_i32 = arith.constant 0 : i32
    %c0_i32_0 = arith.constant 0 : i32
    %c0_i32_1 = arith.constant 0 : i32
    return %c0_i32, %c0_i32_0 : i32, i32
  }
  func.func @transform_14(%arg0: i32) -> (i32, i32) {
    %c0_i32 = arith.constant 0 : i32
    %c0_i32_0 = arith.constant 0 : i32
    %c0_i32_1 = arith.constant 0 : i32
    return %c0_i32, %c0_i32_0 : i32, i32
  }
  func.func @transform_15(%arg0: i32) -> (i32, i32) {
    %c0_i32 = arith.constant 0 : i32
    %c0_i32_0 = arith.constant 0 : i32
    %c0_i32_1 = arith.constant 0 : i32
    return %c0_i32, %c0_i32_0 : i32, i32
  }
  func.func @transform_16(%arg0: i32) -> (i32, i32) {
    %c0_i32 = arith.constant 0 : i32
    %c0_i32_0 = arith.constant 0 : i32
    %c0_i32_1 = arith.constant 0 : i32
    return %c0_i32, %c0_i32_0 : i32, i32
  }
  func.func @transform_17(%arg0: i32) -> (i32, i32) {
    %c0_i32 = arith.constant 0 : i32
    %c0_i32_0 = arith.constant 0 : i32
    %c0_i32_1 = arith.constant 0 : i32
    return %c0_i32, %c0_i32_0 : i32, i32
  }
  func.func @transform_18(%arg0: i32) -> (i32, i32) {
    %c0_i32 = arith.constant 0 : i32
    %c0_i32_0 = arith.constant 0 : i32
    %c0_i32_1 = arith.constant 0 : i32
    return %c0_i32, %c0_i32_0 : i32, i32
  }
  func.func @transform_19(%arg0: i32) -> (i32, i32) {
    %c0_i32 = arith.constant 0 : i32
    %c0_i32_0 = arith.constant 0 : i32
    return %arg0, %c0_i32 : i32, i32
  }
}

module attributes {stable_mosaic.version = 11 : i64} {
  func.func @_attention_block_kernel(%arg0: i32, %arg1: memref<16x128xf32, #tpu.memory_space<vmem>>, %arg2: memref<16x128xf32, #tpu.memory_space<vmem>>, %arg3: memref<16x128xf32, #tpu.memory_space<vmem>>, %arg4: memref<128x128xbf16, #tpu.memory_space<vmem>>, %arg5: memref<1x128xf32, #tpu.memory_space<vmem>>, %arg6: memref<128x128xbf16, #tpu.memory_space<vmem>>, %arg7: memref<1x128xf32, #tpu.memory_space<vmem>>, %arg8: memref<128x128xbf16, #tpu.memory_space<vmem>>, %arg9: memref<1x128xf32, #tpu.memory_space<vmem>>, %arg10: memref<128x128xbf16, #tpu.memory_space<vmem>>, %arg11: memref<1x128xf32, #tpu.memory_space<vmem>>, %arg12: memref<128x512xbf16, #tpu.memory_space<vmem>>, %arg13: memref<1x512xf32, #tpu.memory_space<vmem>>, %arg14: memref<512x128xbf16, #tpu.memory_space<vmem>>, %arg15: memref<1x128xf32, #tpu.memory_space<vmem>>, %arg16: memref<1x128xf32, #tpu.memory_space<vmem>>, %arg17: memref<1x128xf32, #tpu.memory_space<vmem>>, %arg18: memref<1x128xf32, #tpu.memory_space<vmem>>, %arg19: memref<1x128xf32, #tpu.memory_space<vmem>>, %arg20: memref<16x128xf32, #tpu.memory_space<vmem>>) attributes {dimension_semantics = [#tpu.dimension_semantics<parallel>], iteration_bounds = array<i64: 4>, scalar_prefetch = 0 : i64, scratch_operands = 0 : i64, tpu.core_type = #tpu.core_type<tc>, window_params = [{transform_indices = @transform_0, window_bounds = array<i64: 16, 128>}, {transform_indices = @transform_1, window_bounds = array<i64: 16, 128>}, {transform_indices = @transform_2, window_bounds = array<i64: 16, 128>}, {pipeline_mode = #tpu.pipeline_mode<synchronous>, transform_indices = @transform_3, window_bounds = array<i64: 128, 128>}, {pipeline_mode = #tpu.pipeline_mode<synchronous>, transform_indices = @transform_4, window_bounds = array<i64: 1, 128>}, {pipeline_mode = #tpu.pipeline_mode<synchronous>, transform_indices = @transform_5, window_bounds = array<i64: 128, 128>}, {pipeline_mode = #tpu.pipeline_mode<synchronous>, transform_indices = @transform_6, window_bounds = array<i64: 1, 128>}, {pipeline_mode = #tpu.pipeline_mode<synchronous>, transform_indices = @transform_7, window_bounds = array<i64: 128, 128>}, {pipeline_mode = #tpu.pipeline_mode<synchronous>, transform_indices = @transform_8, window_bounds = array<i64: 1, 128>}, {pipeline_mode = #tpu.pipeline_mode<synchronous>, transform_indices = @transform_9, window_bounds = array<i64: 128, 128>}, {pipeline_mode = #tpu.pipeline_mode<synchronous>, transform_indices = @transform_10, window_bounds = array<i64: 1, 128>}, {pipeline_mode = #tpu.pipeline_mode<synchronous>, transform_indices = @transform_11, window_bounds = array<i64: 128, 512>}, {pipeline_mode = #tpu.pipeline_mode<synchronous>, transform_indices = @transform_12, window_bounds = array<i64: 1, 512>}, {pipeline_mode = #tpu.pipeline_mode<synchronous>, transform_indices = @transform_13, window_bounds = array<i64: 512, 128>}, {pipeline_mode = #tpu.pipeline_mode<synchronous>, transform_indices = @transform_14, window_bounds = array<i64: 1, 128>}, {pipeline_mode = #tpu.pipeline_mode<synchronous>, transform_indices = @transform_15, window_bounds = array<i64: 1, 128>}, {pipeline_mode = #tpu.pipeline_mode<synchronous>, transform_indices = @transform_16, window_bounds = array<i64: 1, 128>}, {pipeline_mode = #tpu.pipeline_mode<synchronous>, transform_indices = @transform_17, window_bounds = array<i64: 1, 128>}, {pipeline_mode = #tpu.pipeline_mode<synchronous>, transform_indices = @transform_18, window_bounds = array<i64: 1, 128>}, {transform_indices = @transform_19, window_bounds = array<i64: 16, 128>}]} {
    %c0 = arith.constant 0 : index
    %c0_0 = arith.constant 0 : index
    %0 = vector.load %arg1[%c0, %c0_0] : memref<16x128xf32, #tpu.memory_space<vmem>>, vector<16x128xf32>
    %1 = arith.truncf %0 : vector<16x128xf32> to vector<16x128xbf16>
    %c0_1 = arith.constant 0 : index
    %c0_2 = arith.constant 0 : index
    %2 = vector.load %arg4[%c0_1, %c0_2] : memref<128x128xbf16, #tpu.memory_space<vmem>>, vector<128x128xbf16>
    %cst = arith.constant dense<0.000000e+00> : vector<16x128xf32>
    %3 = tpu.matmul %1, %2, %cst {dimension_numbers = #tpu.dot_dimension_numbers<[1], [0], [0], [1], [0, 0, 1, 1], [], []>} : vector<16x128xbf16>, vector<128x128xbf16>, vector<16x128xf32> -> vector<16x128xf32>
    %c0_3 = arith.constant 0 : index
    %c0_4 = arith.constant 0 : index
    %4 = vector.load %arg5[%c0_3, %c0_4] : memref<1x128xf32, #tpu.memory_space<vmem>>, vector<1x128xf32>
    %5 = vector.broadcast %4 : vector<1x128xf32> to vector<16x128xf32>
    %6 = arith.addf %3, %5 : vector<16x128xf32>
    %c0_5 = arith.constant 0 : index
    %c0_6 = arith.constant 0 : index
    %7 = vector.load %arg2[%c0_5, %c0_6] : memref<16x128xf32, #tpu.memory_space<vmem>>, vector<16x128xf32>
    %8 = arith.truncf %7 : vector<16x128xf32> to vector<16x128xbf16>
    %c0_7 = arith.constant 0 : index
    %c0_8 = arith.constant 0 : index
    %9 = vector.load %arg6[%c0_7, %c0_8] : memref<128x128xbf16, #tpu.memory_space<vmem>>, vector<128x128xbf16>
    %cst_9 = arith.constant dense<0.000000e+00> : vector<16x128xf32>
    %10 = tpu.matmul %8, %9, %cst_9 {dimension_numbers = #tpu.dot_dimension_numbers<[1], [0], [0], [1], [0, 0, 1, 1], [], []>} : vector<16x128xbf16>, vector<128x128xbf16>, vector<16x128xf32> -> vector<16x128xf32>
    %c0_10 = arith.constant 0 : index
    %c0_11 = arith.constant 0 : index
    %11 = vector.load %arg7[%c0_10, %c0_11] : memref<1x128xf32, #tpu.memory_space<vmem>>, vector<1x128xf32>
    %12 = vector.broadcast %11 : vector<1x128xf32> to vector<16x128xf32>
    %13 = arith.addf %10, %12 : vector<16x128xf32>
    %c0_12 = arith.constant 0 : index
    %c0_13 = arith.constant 0 : index
    %14 = vector.load %arg3[%c0_12, %c0_13] : memref<16x128xf32, #tpu.memory_space<vmem>>, vector<16x128xf32>
    %15 = arith.truncf %14 : vector<16x128xf32> to vector<16x128xbf16>
    %c0_14 = arith.constant 0 : index
    %c0_15 = arith.constant 0 : index
    %16 = vector.load %arg8[%c0_14, %c0_15] : memref<128x128xbf16, #tpu.memory_space<vmem>>, vector<128x128xbf16>
    %cst_16 = arith.constant dense<0.000000e+00> : vector<16x128xf32>
    %17 = tpu.matmul %15, %16, %cst_16 {dimension_numbers = #tpu.dot_dimension_numbers<[1], [0], [0], [1], [0, 0, 1, 1], [], []>} : vector<16x128xbf16>, vector<128x128xbf16>, vector<16x128xf32> -> vector<16x128xf32>
    %c0_17 = arith.constant 0 : index
    %c0_18 = arith.constant 0 : index
    %18 = vector.load %arg9[%c0_17, %c0_18] : memref<1x128xf32, #tpu.memory_space<vmem>>, vector<1x128xf32>
    %19 = vector.broadcast %18 : vector<1x128xf32> to vector<16x128xf32>
    %20 = arith.addf %17, %19 : vector<16x128xf32>
    %21 = vector.shape_cast %6 : vector<16x128xf32> to vector<2x8x128xf32>
    %22 = arith.truncf %21 : vector<2x8x128xf32> to vector<2x8x128xbf16>
    %23 = vector.shape_cast %13 : vector<16x128xf32> to vector<2x8x128xf32>
    %24 = arith.truncf %23 : vector<2x8x128xf32> to vector<2x8x128xbf16>
    %25 = vector.shape_cast %20 : vector<16x128xf32> to vector<2x8x128xf32>
    %26 = arith.truncf %25 : vector<2x8x128xf32> to vector<2x8x128xbf16>
    %27 = vector.extract_strided_slice %22 {offsets = [0, 0, 0], sizes = [2, 8, 32], strides = [1, 1, 1]} : vector<2x8x128xbf16> to vector<2x8x32xbf16>
    %28 = vector.extract_strided_slice %24 {offsets = [0, 0, 0], sizes = [2, 8, 32], strides = [1, 1, 1]} : vector<2x8x128xbf16> to vector<2x8x32xbf16>
    %29 = vector.extract_strided_slice %26 {offsets = [0, 0, 0], sizes = [2, 8, 32], strides = [1, 1, 1]} : vector<2x8x128xbf16> to vector<2x8x32xbf16>
    "tpu.trace_start"() <{level = 10 : i32, message = "bqd,bkd->bqk"}> : () -> ()
    %cst_19 = arith.constant dense<0.000000e+00> : vector<2x8x8xf32>
    %30 = tpu.matmul %27, %28, %cst_19 {dimension_numbers = #tpu.dot_dimension_numbers<[2], [2], [1], [1], [0, 0, 0, 1, 1, 1], [0], [0]>} : vector<2x8x32xbf16>, vector<2x8x32xbf16>, vector<2x8x8xf32> -> vector<2x8x8xf32>
    "tpu.trace_stop"() : () -> ()
    %cst_20 = arith.constant dense<0xFF800000> : vector<2x8xf32>
    %31 = vector.multi_reduction <maximumf>, %30, %cst_20 [2] : vector<2x8x8xf32> to vector<2x8xf32>
    %32 = vector.shape_cast %31 : vector<2x8xf32> to vector<2x8x1xf32>
    %33 = vector.broadcast %32 : vector<2x8x1xf32> to vector<2x8x8xf32>
    %34 = arith.subf %30, %33 : vector<2x8x8xf32>
    %35 = math.exp %34 : vector<2x8x8xf32>
    %cst_21 = arith.constant dense<0.000000e+00> : vector<2x8xf32>
    %36 = vector.multi_reduction <add>, %35, %cst_21 [2] : vector<2x8x8xf32> to vector<2x8xf32>
    %37 = vector.shape_cast %36 : vector<2x8xf32> to vector<2x8x1xf32>
    %38 = tpu.reciprocal %37 {approx = true} : vector<2x8x1xf32> -> vector<2x8x1xf32>
    %39 = vector.broadcast %38 : vector<2x8x1xf32> to vector<2x8x8xf32>
    %40 = arith.mulf %35, %39 : vector<2x8x8xf32>
    %41 = arith.truncf %40 : vector<2x8x8xf32> to vector<2x8x8xbf16>
    "tpu.trace_start"() <{level = 10 : i32, message = "bqk,bkd->bqd"}> : () -> ()
    %cst_22 = arith.constant dense<0.000000e+00> : vector<2x8x32xf32>
    %42 = tpu.matmul %41, %29, %cst_22 {dimension_numbers = #tpu.dot_dimension_numbers<[2], [1], [1], [2], [0, 0, 0, 1, 1, 2], [0], [0]>} : vector<2x8x8xbf16>, vector<2x8x32xbf16>, vector<2x8x32xf32> -> vector<2x8x32xf32>
    "tpu.trace_stop"() : () -> ()
    %43 = arith.truncf %42 : vector<2x8x32xf32> to vector<2x8x32xbf16>
    %44 = vector.extract_strided_slice %22 {offsets = [0, 0, 32], sizes = [2, 8, 32], strides = [1, 1, 1]} : vector<2x8x128xbf16> to vector<2x8x32xbf16>
    %45 = vector.extract_strided_slice %24 {offsets = [0, 0, 32], sizes = [2, 8, 32], strides = [1, 1, 1]} : vector<2x8x128xbf16> to vector<2x8x32xbf16>
    %46 = vector.extract_strided_slice %26 {offsets = [0, 0, 32], sizes = [2, 8, 32], strides = [1, 1, 1]} : vector<2x8x128xbf16> to vector<2x8x32xbf16>
    "tpu.trace_start"() <{level = 10 : i32, message = "bqd,bkd->bqk"}> : () -> ()
    %cst_23 = arith.constant dense<0.000000e+00> : vector<2x8x8xf32>
    %47 = tpu.matmul %44, %45, %cst_23 {dimension_numbers = #tpu.dot_dimension_numbers<[2], [2], [1], [1], [0, 0, 0, 1, 1, 1], [0], [0]>} : vector<2x8x32xbf16>, vector<2x8x32xbf16>, vector<2x8x8xf32> -> vector<2x8x8xf32>
    "tpu.trace_stop"() : () -> ()
    %cst_24 = arith.constant dense<0xFF800000> : vector<2x8xf32>
    %48 = vector.multi_reduction <maximumf>, %47, %cst_24 [2] : vector<2x8x8xf32> to vector<2x8xf32>
    %49 = vector.shape_cast %48 : vector<2x8xf32> to vector<2x8x1xf32>
    %50 = vector.broadcast %49 : vector<2x8x1xf32> to vector<2x8x8xf32>
    %51 = arith.subf %47, %50 : vector<2x8x8xf32>
    %52 = math.exp %51 : vector<2x8x8xf32>
    %cst_25 = arith.constant dense<0.000000e+00> : vector<2x8xf32>
    %53 = vector.multi_reduction <add>, %52, %cst_25 [2] : vector<2x8x8xf32> to vector<2x8xf32>
    %54 = vector.shape_cast %53 : vector<2x8xf32> to vector<2x8x1xf32>
    %55 = tpu.reciprocal %54 {approx = true} : vector<2x8x1xf32> -> vector<2x8x1xf32>
    %56 = vector.broadcast %55 : vector<2x8x1xf32> to vector<2x8x8xf32>
    %57 = arith.mulf %52, %56 : vector<2x8x8xf32>
    %58 = arith.truncf %57 : vector<2x8x8xf32> to vector<2x8x8xbf16>
    "tpu.trace_start"() <{level = 10 : i32, message = "bqk,bkd->bqd"}> : () -> ()
    %cst_26 = arith.constant dense<0.000000e+00> : vector<2x8x32xf32>
    %59 = tpu.matmul %58, %46, %cst_26 {dimension_numbers = #tpu.dot_dimension_numbers<[2], [1], [1], [2], [0, 0, 0, 1, 1, 2], [0], [0]>} : vector<2x8x8xbf16>, vector<2x8x32xbf16>, vector<2x8x32xf32> -> vector<2x8x32xf32>
    "tpu.trace_stop"() : () -> ()
    %60 = arith.truncf %59 : vector<2x8x32xf32> to vector<2x8x32xbf16>
    %61 = vector.extract_strided_slice %22 {offsets = [0, 0, 64], sizes = [2, 8, 32], strides = [1, 1, 1]} : vector<2x8x128xbf16> to vector<2x8x32xbf16>
    %62 = vector.extract_strided_slice %24 {offsets = [0, 0, 64], sizes = [2, 8, 32], strides = [1, 1, 1]} : vector<2x8x128xbf16> to vector<2x8x32xbf16>
    %63 = vector.extract_strided_slice %26 {offsets = [0, 0, 64], sizes = [2, 8, 32], strides = [1, 1, 1]} : vector<2x8x128xbf16> to vector<2x8x32xbf16>
    "tpu.trace_start"() <{level = 10 : i32, message = "bqd,bkd->bqk"}> : () -> ()
    %cst_27 = arith.constant dense<0.000000e+00> : vector<2x8x8xf32>
    %64 = tpu.matmul %61, %62, %cst_27 {dimension_numbers = #tpu.dot_dimension_numbers<[2], [2], [1], [1], [0, 0, 0, 1, 1, 1], [0], [0]>} : vector<2x8x32xbf16>, vector<2x8x32xbf16>, vector<2x8x8xf32> -> vector<2x8x8xf32>
    "tpu.trace_stop"() : () -> ()
    %cst_28 = arith.constant dense<0xFF800000> : vector<2x8xf32>
    %65 = vector.multi_reduction <maximumf>, %64, %cst_28 [2] : vector<2x8x8xf32> to vector<2x8xf32>
    %66 = vector.shape_cast %65 : vector<2x8xf32> to vector<2x8x1xf32>
    %67 = vector.broadcast %66 : vector<2x8x1xf32> to vector<2x8x8xf32>
    %68 = arith.subf %64, %67 : vector<2x8x8xf32>
    %69 = math.exp %68 : vector<2x8x8xf32>
    %cst_29 = arith.constant dense<0.000000e+00> : vector<2x8xf32>
    %70 = vector.multi_reduction <add>, %69, %cst_29 [2] : vector<2x8x8xf32> to vector<2x8xf32>
    %71 = vector.shape_cast %70 : vector<2x8xf32> to vector<2x8x1xf32>
    %72 = tpu.reciprocal %71 {approx = true} : vector<2x8x1xf32> -> vector<2x8x1xf32>
    %73 = vector.broadcast %72 : vector<2x8x1xf32> to vector<2x8x8xf32>
    %74 = arith.mulf %69, %73 : vector<2x8x8xf32>
    %75 = arith.truncf %74 : vector<2x8x8xf32> to vector<2x8x8xbf16>
    "tpu.trace_start"() <{level = 10 : i32, message = "bqk,bkd->bqd"}> : () -> ()
    %cst_30 = arith.constant dense<0.000000e+00> : vector<2x8x32xf32>
    %76 = tpu.matmul %75, %63, %cst_30 {dimension_numbers = #tpu.dot_dimension_numbers<[2], [1], [1], [2], [0, 0, 0, 1, 1, 2], [0], [0]>} : vector<2x8x8xbf16>, vector<2x8x32xbf16>, vector<2x8x32xf32> -> vector<2x8x32xf32>
    "tpu.trace_stop"() : () -> ()
    %77 = arith.truncf %76 : vector<2x8x32xf32> to vector<2x8x32xbf16>
    %78 = vector.extract_strided_slice %22 {offsets = [0, 0, 96], sizes = [2, 8, 32], strides = [1, 1, 1]} : vector<2x8x128xbf16> to vector<2x8x32xbf16>
    %79 = vector.extract_strided_slice %24 {offsets = [0, 0, 96], sizes = [2, 8, 32], strides = [1, 1, 1]} : vector<2x8x128xbf16> to vector<2x8x32xbf16>
    %80 = vector.extract_strided_slice %26 {offsets = [0, 0, 96], sizes = [2, 8, 32], strides = [1, 1, 1]} : vector<2x8x128xbf16> to vector<2x8x32xbf16>
    "tpu.trace_start"() <{level = 10 : i32, message = "bqd,bkd->bqk"}> : () -> ()
    %cst_31 = arith.constant dense<0.000000e+00> : vector<2x8x8xf32>
    %81 = tpu.matmul %78, %79, %cst_31 {dimension_numbers = #tpu.dot_dimension_numbers<[2], [2], [1], [1], [0, 0, 0, 1, 1, 1], [0], [0]>} : vector<2x8x32xbf16>, vector<2x8x32xbf16>, vector<2x8x8xf32> -> vector<2x8x8xf32>
    "tpu.trace_stop"() : () -> ()
    %cst_32 = arith.constant dense<0xFF800000> : vector<2x8xf32>
    %82 = vector.multi_reduction <maximumf>, %81, %cst_32 [2] : vector<2x8x8xf32> to vector<2x8xf32>
    %83 = vector.shape_cast %82 : vector<2x8xf32> to vector<2x8x1xf32>
    %84 = vector.broadcast %83 : vector<2x8x1xf32> to vector<2x8x8xf32>
    %85 = arith.subf %81, %84 : vector<2x8x8xf32>
    %86 = math.exp %85 : vector<2x8x8xf32>
    %cst_33 = arith.constant dense<0.000000e+00> : vector<2x8xf32>
    %87 = vector.multi_reduction <add>, %86, %cst_33 [2] : vector<2x8x8xf32> to vector<2x8xf32>
    %88 = vector.shape_cast %87 : vector<2x8xf32> to vector<2x8x1xf32>
    %89 = tpu.reciprocal %88 {approx = true} : vector<2x8x1xf32> -> vector<2x8x1xf32>
    %90 = vector.broadcast %89 : vector<2x8x1xf32> to vector<2x8x8xf32>
    %91 = arith.mulf %86, %90 : vector<2x8x8xf32>
    %92 = arith.truncf %91 : vector<2x8x8xf32> to vector<2x8x8xbf16>
    "tpu.trace_start"() <{level = 10 : i32, message = "bqk,bkd->bqd"}> : () -> ()
    %cst_34 = arith.constant dense<0.000000e+00> : vector<2x8x32xf32>
    %93 = tpu.matmul %92, %80, %cst_34 {dimension_numbers = #tpu.dot_dimension_numbers<[2], [1], [1], [2], [0, 0, 0, 1, 1, 2], [0], [0]>} : vector<2x8x8xbf16>, vector<2x8x32xbf16>, vector<2x8x32xf32> -> vector<2x8x32xf32>
    "tpu.trace_stop"() : () -> ()
    %94 = arith.truncf %93 : vector<2x8x32xf32> to vector<2x8x32xbf16>
    %95 = tpu.concatenate %43, %60, %77, %94 in 2 : vector<2x8x32xbf16>, vector<2x8x32xbf16>, vector<2x8x32xbf16>, vector<2x8x32xbf16> -> vector<2x8x128xbf16>
    %96 = vector.shape_cast %95 : vector<2x8x128xbf16> to vector<16x128xbf16>
    %c0_35 = arith.constant 0 : index
    %c0_36 = arith.constant 0 : index
    %97 = vector.load %arg10[%c0_35, %c0_36] : memref<128x128xbf16, #tpu.memory_space<vmem>>, vector<128x128xbf16>
    %cst_37 = arith.constant dense<0.000000e+00> : vector<16x128xf32>
    %98 = tpu.matmul %96, %97, %cst_37 {dimension_numbers = #tpu.dot_dimension_numbers<[1], [0], [0], [1], [0, 0, 1, 1], [], []>} : vector<16x128xbf16>, vector<128x128xbf16>, vector<16x128xf32> -> vector<16x128xf32>
    %99 = arith.addf %0, %98 : vector<16x128xf32>
    %c0_38 = arith.constant 0 : index
    %c0_39 = arith.constant 0 : index
    %100 = vector.load %arg11[%c0_38, %c0_39] : memref<1x128xf32, #tpu.memory_space<vmem>>, vector<1x128xf32>
    %101 = vector.broadcast %100 : vector<1x128xf32> to vector<16x128xf32>
    %102 = arith.addf %99, %101 : vector<16x128xf32>
    %cst_40 = arith.constant dense<0.000000e+00> : vector<16xf32>
    %103 = vector.multi_reduction <add>, %102, %cst_40 [1] : vector<16x128xf32> to vector<16xf32>
    %104 = vector.shape_cast %103 : vector<16xf32> to vector<16x1xf32>
    %cst_41 = arith.constant 1.280000e+02 : f32
    %105 = vector.broadcast %cst_41 : f32 to vector<16x1xf32>
    %106 = arith.divf %104, %105 : vector<16x1xf32>
    %107 = vector.broadcast %106 : vector<16x1xf32> to vector<16x128xf32>
    %108 = arith.subf %102, %107 : vector<16x128xf32>
    %109 = arith.mulf %108, %108 : vector<16x128xf32>
    %cst_42 = arith.constant dense<0.000000e+00> : vector<16xf32>
    %110 = vector.multi_reduction <add>, %109, %cst_42 [1] : vector<16x128xf32> to vector<16xf32>
    %111 = vector.shape_cast %110 : vector<16xf32> to vector<16x1xf32>
    %cst_43 = arith.constant 1.280000e+02 : f32
    %112 = vector.broadcast %cst_43 : f32 to vector<16x1xf32>
    %113 = arith.divf %111, %112 : vector<16x1xf32>
    %114 = vector.broadcast %106 : vector<16x1xf32> to vector<16x128xf32>
    %115 = arith.subf %102, %114 : vector<16x128xf32>
    %cst_44 = arith.constant 9.99999974E-6 : f32
    %116 = vector.broadcast %cst_44 : f32 to vector<16x1xf32>
    %117 = arith.addf %113, %116 : vector<16x1xf32>
    %118 = math.rsqrt %117 : vector<16x1xf32>
    %119 = vector.broadcast %118 : vector<16x1xf32> to vector<16x128xf32>
    %120 = arith.mulf %115, %119 : vector<16x128xf32>
    %c0_45 = arith.constant 0 : index
    %c0_46 = arith.constant 0 : index
    %121 = vector.load %arg16[%c0_45, %c0_46] : memref<1x128xf32, #tpu.memory_space<vmem>>, vector<1x128xf32>
    %122 = vector.broadcast %121 : vector<1x128xf32> to vector<16x128xf32>
    %123 = arith.mulf %120, %122 : vector<16x128xf32>
    %c0_47 = arith.constant 0 : index
    %c0_48 = arith.constant 0 : index
    %124 = vector.load %arg17[%c0_47, %c0_48] : memref<1x128xf32, #tpu.memory_space<vmem>>, vector<1x128xf32>
    %125 = vector.broadcast %124 : vector<1x128xf32> to vector<16x128xf32>
    %126 = arith.addf %123, %125 : vector<16x128xf32>
    %127 = arith.truncf %126 : vector<16x128xf32> to vector<16x128xbf16>
    %c0_49 = arith.constant 0 : index
    %c0_50 = arith.constant 0 : index
    %128 = vector.load %arg12[%c0_49, %c0_50] : memref<128x512xbf16, #tpu.memory_space<vmem>>, vector<128x512xbf16>
    %cst_51 = arith.constant dense<0.000000e+00> : vector<16x512xf32>
    %129 = tpu.matmul %127, %128, %cst_51 {dimension_numbers = #tpu.dot_dimension_numbers<[1], [0], [0], [1], [0, 0, 1, 1], [], []>} : vector<16x128xbf16>, vector<128x512xbf16>, vector<16x512xf32> -> vector<16x512xf32>
    %c0_52 = arith.constant 0 : index
    %c0_53 = arith.constant 0 : index
    %130 = vector.load %arg13[%c0_52, %c0_53] : memref<1x512xf32, #tpu.memory_space<vmem>>, vector<1x512xf32>
    %131 = vector.broadcast %130 : vector<1x512xf32> to vector<16x512xf32>
    %132 = arith.addf %129, %131 : vector<16x512xf32>
    %cst_54 = arith.constant 0.000000e+00 : f32
    %133 = vector.broadcast %cst_54 : f32 to vector<16x512xf32>
    %134 = arith.maximumf %132, %133 : vector<16x512xf32>
    %135 = arith.truncf %134 : vector<16x512xf32> to vector<16x512xbf16>
    %c0_55 = arith.constant 0 : index
    %c0_56 = arith.constant 0 : index
    %136 = vector.load %arg14[%c0_55, %c0_56] : memref<512x128xbf16, #tpu.memory_space<vmem>>, vector<512x128xbf16>
    %cst_57 = arith.constant dense<0.000000e+00> : vector<16x128xf32>
    %137 = tpu.matmul %135, %136, %cst_57 {dimension_numbers = #tpu.dot_dimension_numbers<[1], [0], [0], [1], [0, 0, 1, 1], [], []>} : vector<16x512xbf16>, vector<512x128xbf16>, vector<16x128xf32> -> vector<16x128xf32>
    %c0_58 = arith.constant 0 : index
    %c0_59 = arith.constant 0 : index
    %138 = vector.load %arg15[%c0_58, %c0_59] : memref<1x128xf32, #tpu.memory_space<vmem>>, vector<1x128xf32>
    %139 = vector.broadcast %138 : vector<1x128xf32> to vector<16x128xf32>
    %140 = arith.addf %137, %139 : vector<16x128xf32>
    %141 = arith.addf %126, %140 : vector<16x128xf32>
    %cst_60 = arith.constant dense<0.000000e+00> : vector<16xf32>
    %142 = vector.multi_reduction <add>, %141, %cst_60 [1] : vector<16x128xf32> to vector<16xf32>
    %143 = vector.shape_cast %142 : vector<16xf32> to vector<16x1xf32>
    %cst_61 = arith.constant 1.280000e+02 : f32
    %144 = vector.broadcast %cst_61 : f32 to vector<16x1xf32>
    %145 = arith.divf %143, %144 : vector<16x1xf32>
    %146 = vector.broadcast %145 : vector<16x1xf32> to vector<16x128xf32>
    %147 = arith.subf %141, %146 : vector<16x128xf32>
    %148 = arith.mulf %147, %147 : vector<16x128xf32>
    %cst_62 = arith.constant dense<0.000000e+00> : vector<16xf32>
    %149 = vector.multi_reduction <add>, %148, %cst_62 [1] : vector<16x128xf32> to vector<16xf32>
    %150 = vector.shape_cast %149 : vector<16xf32> to vector<16x1xf32>
    %cst_63 = arith.constant 1.280000e+02 : f32
    %151 = vector.broadcast %cst_63 : f32 to vector<16x1xf32>
    %152 = arith.divf %150, %151 : vector<16x1xf32>
    %153 = vector.broadcast %145 : vector<16x1xf32> to vector<16x128xf32>
    %154 = arith.subf %141, %153 : vector<16x128xf32>
    %cst_64 = arith.constant 9.99999974E-6 : f32
    %155 = vector.broadcast %cst_64 : f32 to vector<16x1xf32>
    %156 = arith.addf %152, %155 : vector<16x1xf32>
    %157 = math.rsqrt %156 : vector<16x1xf32>
    %158 = vector.broadcast %157 : vector<16x1xf32> to vector<16x128xf32>
    %159 = arith.mulf %154, %158 : vector<16x128xf32>
    %c0_65 = arith.constant 0 : index
    %c0_66 = arith.constant 0 : index
    %160 = vector.load %arg18[%c0_65, %c0_66] : memref<1x128xf32, #tpu.memory_space<vmem>>, vector<1x128xf32>
    %161 = vector.broadcast %160 : vector<1x128xf32> to vector<16x128xf32>
    %162 = arith.mulf %159, %161 : vector<16x128xf32>
    %c0_67 = arith.constant 0 : index
    %c0_68 = arith.constant 0 : index
    %163 = vector.load %arg19[%c0_67, %c0_68] : memref<1x128xf32, #tpu.memory_space<vmem>>, vector<1x128xf32>
    %164 = vector.broadcast %163 : vector<1x128xf32> to vector<16x128xf32>
    %165 = arith.addf %162, %164 : vector<16x128xf32>
    %c0_69 = arith.constant 0 : index
    %c0_70 = arith.constant 0 : index
    %166 = vector.load %arg20[%c0_69, %c0_70] : memref<16x128xf32, #tpu.memory_space<vmem>>, vector<16x128xf32>
    tpu.vector_store %arg20[%c0_69, %c0_70], %165 {strides = array<i32>} : memref<16x128xf32, #tpu.memory_space<vmem>>, vector<16x128xf32>,
    return
  }
  func.func @transform_0(%arg0: i32) -> (i32, i32) {
    %c0_i32 = arith.constant 0 : i32
    %c0_i32_0 = arith.constant 0 : i32
    return %arg0, %c0_i32 : i32, i32
  }
  func.func @transform_1(%arg0: i32) -> (i32, i32) {
    %c0_i32 = arith.constant 0 : i32
    %c0_i32_0 = arith.constant 0 : i32
    return %arg0, %c0_i32 : i32, i32
  }
  func.func @transform_2(%arg0: i32) -> (i32, i32) {
    %c0_i32 = arith.constant 0 : i32
    %c0_i32_0 = arith.constant 0 : i32
    return %arg0, %c0_i32 : i32, i32
  }
  func.func @transform_3(%arg0: i32) -> (i32, i32) {
    %c0_i32 = arith.constant 0 : i32
    %c0_i32_0 = arith.constant 0 : i32
    %c0_i32_1 = arith.constant 0 : i32
    return %c0_i32, %c0_i32_0 : i32, i32
  }
  func.func @transform_4(%arg0: i32) -> (i32, i32) {
    %c0_i32 = arith.constant 0 : i32
    %c0_i32_0 = arith.constant 0 : i32
    %c0_i32_1 = arith.constant 0 : i32
    return %c0_i32, %c0_i32_0 : i32, i32
  }
  func.func @transform_5(%arg0: i32) -> (i32, i32) {
    %c0_i32 = arith.constant 0 : i32
    %c0_i32_0 = arith.constant 0 : i32
    %c0_i32_1 = arith.constant 0 : i32
    return %c0_i32, %c0_i32_0 : i32, i32
  }
  func.func @transform_6(%arg0: i32) -> (i32, i32) {
    %c0_i32 = arith.constant 0 : i32
    %c0_i32_0 = arith.constant 0 : i32
    %c0_i32_1 = arith.constant 0 : i32
    return %c0_i32, %c0_i32_0 : i32, i32
  }
  func.func @transform_7(%arg0: i32) -> (i32, i32) {
    %c0_i32 = arith.constant 0 : i32
    %c0_i32_0 = arith.constant 0 : i32
    %c0_i32_1 = arith.constant 0 : i32
    return %c0_i32, %c0_i32_0 : i32, i32
  }
  func.func @transform_8(%arg0: i32) -> (i32, i32) {
    %c0_i32 = arith.constant 0 : i32
    %c0_i32_0 = arith.constant 0 : i32
    %c0_i32_1 = arith.constant 0 : i32
    return %c0_i32, %c0_i32_0 : i32, i32
  }
  func.func @transform_9(%arg0: i32) -> (i32, i32) {
    %c0_i32 = arith.constant 0 : i32
    %c0_i32_0 = arith.constant 0 : i32
    %c0_i32_1 = arith.constant 0 : i32
    return %c0_i32, %c0_i32_0 : i32, i32
  }
  func.func @transform_10(%arg0: i32) -> (i32, i32) {
    %c0_i32 = arith.constant 0 : i32
    %c0_i32_0 = arith.constant 0 : i32
    %c0_i32_1 = arith.constant 0 : i32
    return %c0_i32, %c0_i32_0 : i32, i32
  }
  func.func @transform_11(%arg0: i32) -> (i32, i32) {
    %c0_i32 = arith.constant 0 : i32
    %c0_i32_0 = arith.constant 0 : i32
    %c0_i32_1 = arith.constant 0 : i32
    return %c0_i32, %c0_i32_0 : i32, i32
  }
  func.func @transform_12(%arg0: i32) -> (i32, i32) {
    %c0_i32 = arith.constant 0 : i32
    %c0_i32_0 = arith.constant 0 : i32
    %c0_i32_1 = arith.constant 0 : i32
    return %c0_i32, %c0_i32_0 : i32, i32
  }
  func.func @transform_13(%arg0: i32) -> (i32, i32) {
    %c0_i32 = arith.constant 0 : i32
    %c0_i32_0 = arith.constant 0 : i32
    %c0_i32_1 = arith.constant 0 : i32
    return %c0_i32, %c0_i32_0 : i32, i32
  }
  func.func @transform_14(%arg0: i32) -> (i32, i32) {
    %c0_i32 = arith.constant 0 : i32
    %c0_i32_0 = arith.constant 0 : i32
    %c0_i32_1 = arith.constant 0 : i32
    return %c0_i32, %c0_i32_0 : i32, i32
  }
  func.func @transform_15(%arg0: i32) -> (i32, i32) {
    %c0_i32 = arith.constant 0 : i32
    %c0_i32_0 = arith.constant 0 : i32
    %c0_i32_1 = arith.constant 0 : i32
    return %c0_i32, %c0_i32_0 : i32, i32
  }
  func.func @transform_16(%arg0: i32) -> (i32, i32) {
    %c0_i32 = arith.constant 0 : i32
    %c0_i32_0 = arith.constant 0 : i32
    %c0_i32_1 = arith.constant 0 : i32
    return %c0_i32, %c0_i32_0 : i32, i32
  }
  func.func @transform_17(%arg0: i32) -> (i32, i32) {
    %c0_i32 = arith.constant 0 : i32
    %c0_i32_0 = arith.constant 0 : i32
    %c0_i32_1 = arith.constant 0 : i32
    return %c0_i32, %c0_i32_0 : i32, i32
  }
  func.func @transform_18(%arg0: i32) -> (i32, i32) {
    %c0_i32 = arith.constant 0 : i32
    %c0_i32_0 = arith.constant 0 : i32
    %c0_i32_1 = arith.constant 0 : i32
    return %c0_i32, %c0_i32_0 : i32, i32
  }
  func.func @transform_19(%arg0: i32) -> (i32, i32) {
    %c0_i32 = arith.constant 0 : i32
    %c0_i32_0 = arith.constant 0 : i32
    return %arg0, %c0_i32 : i32, i32
  }
}

</mosaic_0001>

<bundles_post_ra>
// kernel: tpu_custom_call.1
= control target key start
LH: loop header
LB: loop body
LE: loop exit
PB: predicated region body
PF: predicated region fallthrough
CT: control target
= control target key end

     0   :  { %s4910_s0 = inlined_call_operand.hbm [shape: f32[64,128], index: 0, kind: input, shape index: {}]   ;;  %s4911_s1 = inlined_call_operand.hbm [shape: f32[64,128], index: 1, kind: input, shape index: {}]   ;;  %s4912_s2 = inlined_call_operand.hbm [shape: f32[64,128], index: 2, kind: input, shape index: {}]   ;;  %s4913_s3 = inlined_call_operand.hbm [shape: bf16[128,128], index: 3, kind: input, shape index: {}]   ;;  %s4914_s4 = inlined_call_operand.vmem [shape: f32[1,128], index: 4, kind: input, shape index: {}]   ;;  %s4915_s5 = inlined_call_operand.hbm [shape: bf16[128,128], index: 5, kind: input, shape index: {}]   ;;  %s4916_s6 = inlined_call_operand.vmem [shape: f32[1,128], index: 6, kind: input, shape index: {}]   ;;  %s4917_s7 = inlined_call_operand.hbm [shape: bf16[128,128], index: 7, kind: input, shape index: {}]   ;;  %s4918_s8 = inlined_call_operand.vmem [shape: f32[1,128], index: 8, kind: input, shape index: {}]   ;;  %s4919_s9 = inlined_call_operand.hbm [shape: bf16[128,128], index: 9, kind: input, shape index: {}]   ;;  %s4920_s10 = inlined_call_operand.vmem [shape: f32[1,128], index: 10, kind: input, shape index: {}]   ;;  %s4921_s11 = inlined_call_operand.hbm [shape: bf16[128,512], index: 11, kind: input, shape index: {}]   ;;  %s4922_s12 = inlined_call_operand.vmem [shape: f32[1,512], index: 12, kind: input, shape index: {}]   ;;  %s4923_s13 = inlined_call_operand.hbm [shape: bf16[512,128], index: 13, kind: input, shape index: {}]   ;;  %s4924_s14 = inlined_call_operand.vmem [shape: f32[1,128], index: 14, kind: input, shape index: {}]   ;;  %s4925_s15 = inlined_call_operand.vmem [shape: f32[1,128], index: 15, kind: input, shape index: {}]   ;;  %s4926_s16 = inlined_call_operand.vmem [shape: f32[1,128], index: 16, kind: input, shape index: {}]   ;;  %s4927_s17 = inlined_call_operand.vmem [shape: f32[1,128], index: 17, kind: input, shape index: {}]   ;;  %s4928_s18 = inlined_call_operand.vmem [shape: f32[1,128], index: 18, kind: input, shape index: {}]   ;;  %s4929_s19 = inlined_call_operand.hbm [shape: f32[64,128], index: 19, kind: output, shape index: {}]  }
   0x1   :  { %4959 = sst [smem:[#allocation30_spill]] %s4910_s0 }
   0x2   :  { %4960 = sst [smem:[#allocation31_spill]] %s4911_s1 }
   0x3   :  { %4961 = sst [smem:[#allocation32_spill]] %s4912_s2 }
   0x4   :  { %4962 = sst [smem:[#allocation33_spill]] %s4913_s3 }
   0x5   :  { %4963 = sst [smem:[#allocation34_spill]] %s4915_s5 }
   0x6   :  { %4964 = sst [smem:[#allocation35_spill]] %s4917_s7 }
   0x7   :  { %4965 = sst [smem:[#allocation36_spill]] %s4919_s9 }
   0x8   :  { %4966 = sst [smem:[#allocation37_spill]] %s4921_s11 }
   0x9   :  { %4967 = sst [smem:[#allocation38_spill]] %s4922_s12 }
   0xa   :  { %4968 = sst [smem:[#allocation39_spill]] %s4924_s14 }
   0xb   :  { %4969 = sst [smem:[#allocation40_spill]] %s4926_s16 }
   0xc   :  { %4970 = sst [smem:[#allocation41_spill]] %s4927_s17 }
   0xd   :  { %4971 = sst [smem:[#allocation42_spill]] %s4928_s18 }
   0xe   :  { %4972 = sst [smem:[#allocation43_spill]] %s4929_s19 }
   0xf   :  { %24 = vsyncpa [#allocation3], 0 }
  0x10   :  { %26 = vsyncpa [#allocation3 + $0x1], 0 }
  0x11   :  { %27 = vsyncpa [#allocation6], 0 }
  0x12   :  { %29 = vsyncpa [#allocation6 + $0x1], 0 }
  0x13   :  { %30 = vsyncpa [#allocation9], 0 }
  0x14   :  { %31 = vsyncpa [#allocation12], 0 }
  0x15   :  { %32 = vsyncpa [#allocation15], 0 }
  0x16   :  { %33 = vsyncpa [#allocation4], 0 }
  0x17   :  { %35 = vsyncpa [#allocation4 + $0x1], 0  ;;  %s4291_s0 = smov 0   ;;  %s4293_s30 = smov 0  }
  0x18   :  { %s4295_s20 = smov 0   ;;  %s4297_s21 = smov 0  }
  0x19 LB: > { %4973 = sst [smem:[#allocation24_spill]] %s4153_s0  ;;  %s4167_s1 = smov [#allocation8]   ;;  %s4165_s21 = sphi %s4297_s21, %s5022_s21   ;;  %s4161_s20 = sphi %s4295_s20, %s5026_s20   ;;  %s4157_s30 = sphi %s4293_s30, %s5025_s30   ;;  %s4153_s0 = sphi %s4291_s0, %s5024_s0  }
  0x1a   : > { %4974 = sst [smem:[#allocation25_spill]] %s4165_s21  ;;  %s498_s22 = sshll.u32 %s4167_s1, 4  ;;  %s499_s22 = int_to_ptr.vmem [resolvable:$true] %s498_s22 }
  0x1b   : > { %s4312_s2 = sadd.s32 4294967295, %s4165_s21   ;;  %p3113_p0 = scmp.ge.s32.totalorder %s4165_s21, 1 }
  0x1c   : > { %p4947_p1 = scmp.eq.s32.totalorder %s4312_s2, 0  ;;  %p486_p2 = scmp.lt.s32.totalorder %s4165_s21, 5 }
  0x1d   : > { %s4168_s24 = smov [#allocation11]   ;;  %s4169_s26 = smov [#allocation14]  }
  0x1e   : > { %p4317_p3 = pnand %p3113_p0, %p486_p2  ;;  %s530_s25 = sshll.u32 %s4168_s24, 4  ;;  %s4329_s25 = int_to_ptr.vmem [resolvable:$true] %s530_s25 }
  0x1f   : > { %s562_s27 = sshll.u32 %s4169_s26, 4  ;;  %s3856_s29 = scalar_lea.vmem %s499_s22, 1024  ;;  %s4331_s27 = int_to_ptr.vmem [resolvable:$true] %s562_s27 }
  0x20   : > { %s4975_s23 = scalar_select %p4317_p3, 1, 0 }
  0x21   : > { %p3592_p4 = pneg %p4317_p3  ;;  %p3857_p7 = scmp.ne.s32.totalorder %s499_s22, %s3856_s29 }
  0x22   : > { %p3864_p10 = scmp.lt.s32.totalorder %s499_s22, %s499_s22  ;;  %p3865_p11 = scmp.lt.s32.totalorder %s3856_s29, %s3856_s29 }
  0x23   : > { %p4325_p5 = pnand %p3592_p4, %p4947_p1 }
  0x24   : > { %p3866_p12 = por %p3865_p11, %p3864_p10 }
  0x25   : > { %s4976_s3 = scalar_select %p4325_p5, 1, 0 }
  0x26   : > { %p4335_p6 = pneg %p4325_p5 }
  0x28   : > { %s4977_s28 = scalar_select %p4335_p6, 1, 0 }
  0x29   : > { %p3859_p8 = pnand %p3857_p7, %p4335_p6 }
  0x2b   : > { %p3860_p9 = pneg %p3859_p8 }
  0x2d   : > { %p3867_p13 = pnand %p3866_p12, %p3860_p9 }
  0x2f   : > { %3870 = shalt.err (!%p3867_p13)
}
  0x30   : > { %s4934_s1 = smov 64   ;;  %s4936_s24 = smov 4  }
  0x31   : > { %s4978_s18 = sld [smem:[#allocation33_spill]]  ;;  %s3882_s17 = scalar_lea.vmem %s4329_s25, 1024 }
  0x32   : > { %p3883_p0 = scmp.ne.s32.totalorder %s4329_s25, %s3882_s17  ;;  %p3890_p7 = scmp.lt.s32.totalorder %s4329_s25, %s4329_s25 }
  0x33   : > { %p3891_p8 = scmp.lt.s32.totalorder %s3882_s17, %s3882_s17 }
  0x34   : > { %p3885_p2 = pnand %p3883_p0, %p4335_p6 }
  0x35   : > { %p3892_p9 = por %p3891_p8, %p3890_p7 }
  0x36   : > { %p3886_p4 = pneg %p3885_p2 }
  0x37   : > { %3595 = dma.hbm_to_vmem [thread:$0]  (!%p4325_p5), %s4978_s18, 1024, %s499_s22, [#allocation9], %s4934_s1, %s4934_s1, %s4936_s24  }
  0x38   : > { %p3893_p10 = pnand %p3892_p9, %p3886_p4 }
  0x3a   : > { %3896 = shalt.err (!%p3893_p10)
}
  0x3b   : > { %s4979_s7 = sld [smem:[#allocation35_spill]]  ;;  %s3908_s18 = scalar_lea.vmem %s4331_s27, 4096 }
  0x3c   : > { %p3909_p11 = scmp.ne.s32.totalorder %s4331_s27, %s3908_s18  ;;  %p3916_p0 = scmp.lt.s32.totalorder %s4331_s27, %s4331_s27 }
  0x3d   : > { %p3917_p2 = scmp.lt.s32.totalorder %s3908_s18, %s3908_s18 }
  0x3e   : > { %p3911_p12 = pnand %p3909_p11, %p4335_p6 }
  0x3f   : > { %p3918_p4 = por %p3917_p2, %p3916_p0 }
  0x40   : > { %p3912_p13 = pneg %p3911_p12 }
  0x41   : > { %3601 = dma.hbm_to_vmem [thread:$0]  (!%p4325_p5), %s4979_s7, 1024, %s4329_s25, [#allocation12], %s4934_s1, %s4934_s1, %s4936_s24  }
  0x42   : > { %p3919_p7 = pnand %p3918_p4, %p3912_p13 }
  0x44   : > { %3922 = shalt.err (!%p3919_p7)
}
  0x45   : > { %s4172_s17 = smov 256   ;;  %s4173_s22 = smov 16  }
  0x46   : > { %s4980_s11 = sld [smem:[#allocation37_spill]]  ;;  %s3112_s29 = sadd.s32 4294967294, %s4165_s21  }
  0x47   : > { %s4378_s19 = sadd.s32 1, %s4165_s21   ;;  %s48_s18 = sadd.s32 1, %s4161_s20 }
  0x48   : > { %4981 = sst [smem:[#allocation26_spill]] %s4378_s19  ;;  %s45_s1 = ssub.s32 %s4165_s21, %s4378_s19 }
  0x49   : > { %p55_p8 = scmp.ne.s32.totalorder %s4161_s20, %s4157_s30  ;;  %p46_p9 = scmp.eq.s32.totalorder %s45_s1, 0 }
  0x4a   : > { %p56_p10 = scmp.eq.s32.totalorder %s4165_s21, 0  ;;  %p61_p11 = scmp.ne.s32.totalorder %s4157_s30, %s4153_s0 }
  0x4b   : > { %p473_p12 = scmp.eq.s32.totalorder %s4312_s2, 3  ;;  %p479_p4 = scmp.eq.s32.totalorder %s3112_s29, 3 }
  0x4c   : > { %3607 = dma.hbm_to_vmem [thread:$0]  (!%p4325_p5), %s4980_s11, 4096, %s4331_s27, [#allocation15], %s4172_s17, %s4172_s17, %s4173_s22  }
  0x4d   : > { %s4390_s24 = scalar_select %p46_p9, %s4161_s20, %s48_s18  }
  0x4e   : > { %p57_p13 = por %p56_p10, %p55_p8  ;;  %p4394_p0 = por %p4947_p1, %p61_p11 }
  0x4f   : > { %4982 = sst [smem:[#allocation27_spill]] %s4390_s24  ;;  %p4398_p2 = por %p473_p12, %p55_p8 }
  0x50   : > { %s4983_s27 = scalar_select %p4394_p0, 1, 0 }
  0x51   : > { %s4984_s17 = scalar_select %p4398_p2, 1, 0 }
  0x52   : > { %p3631_p7 = scmp.lt.s32.totalorder %s4165_s21, 4  ;;  %s4941_s22 = sand.u32 1, %s4161_s20  }
  0x53   : > { %4985 = sst [smem:[#allocation28_spill]] %s4984_s17  ;;  %p4404_p3 = por %p479_p4, %p61_p11 }
  0x54   : > { %s4410_s25 = sshll.u32 %s4941_s22, 4  ;;  %s4413_s26 = sshll.u32 %s4165_s21, 8 }
  0x55   : > { %s4986_s1 = scalar_select %p4404_p3, 1, 0 }
  0x56   : > { %p4415_p9 = pnand %p3631_p7, %p57_p13  ;;  %s628_s7 = sand.u32 1, %s4165_s21  }
  0x57   : > { %4987 = sst [smem:[#allocation29_spill]] %s4986_s1  ;;  %s632_s22 = scalar_lea.vmem [#allocation5], %s4410_s25 }
  0x58   : > { %s4989_s24 = sld [smem:[#allocation31_spill]]  ;;  %s639_s1 = sshll.u32 %s632_s22, 4  ;;  %s4427_s1 = int_to_ptr.vmem [resolvable:$true] %s639_s1 }
  0x59   : > { %s4429_s0 = scalar_lea.sflag [#allocation6], %s628_s7  ;;  %p4435_p10 = pneg %p4415_p9 }
  0x5e   : > { %s4424_s19 = scalar_lea.hbm %s4989_s24, %s4413_s26  ;;  %s3928_s21 = scalar_lea.hbm %s4989_s24, 1024 }
  0x5f   : > { %s3923_s17 = scalar_lea.hbm %s4424_s19, 256  ;;  %p3929_p13 = scmp.lt.s32.totalorder %s4424_s19, %s4989_s24 }
  0x60   : > { %p3924_p8 = scmp.ne.s32.totalorder %s4424_s19, %s3923_s17  ;;  %p3930_p4 = scmp.lt.s32.totalorder %s3928_s21, %s3923_s17 }
  0x62   : > { %p3926_p11 = pnand %p4435_p10, %p3924_p8  ;;  %p3931_p7 = por %p3930_p4, %p3929_p13 }
  0x64   : > { %p3927_p12 = pneg %p3926_p11 }
  0x66   : > { %p3932_p1 = pnand %p3931_p7, %p3927_p12 }
  0x68   : > { %3935 = shalt.err (!%p3932_p1)
}
  0x69   : > { %s3936_s7 = scalar_lea.vmem %s4427_s1, 256  ;;  %s4174_s16 = smov [#allocation5]  }
  0x6a   : > { %p3937_p3 = scmp.ne.s32.totalorder %s4427_s1, %s3936_s7  ;;  %s3941_s11 = sshll.u32 %s4174_s16, 4  ;;  %s3942_s11 = int_to_ptr.vmem [resolvable:$false] %s3941_s11 }
  0x6b   : > { %s3943_s29 = scalar_lea.vmem %s3942_s11, 512  ;;  %p3944_p2 = scmp.lt.s32.totalorder %s4427_s1, %s3942_s11 }
  0x6c   : > { %p3939_p8 = pnand %p3937_p3, %p4435_p10  ;;  %p3945_p0 = scmp.lt.s32.totalorder %s3943_s29, %s3936_s7 }
  0x6e   : > { %p3940_p11 = pneg %p3939_p8  ;;  %p3946_p5 = por %p3945_p0, %p3944_p2 }
  0x70   : > { %p3947_p6 = pnand %p3946_p5, %p3940_p11 }
  0x72   : > { %3950 = shalt.err (!%p3947_p6)
}
  0x73   : > { %s4955_s12 = smov 128   ;;  %s4957_s21 = smov 8  }
  0x74   : > { %3617 = dma.hbm_to_vmem [thread:$0]  (!%p4415_p9), %s4424_s19, 256, %s4427_s1, %s4429_s0, %s4955_s12, %s4955_s12, %s4957_s21  }
  0x75   : > { %s4177_s16 = smov [#allocation10]   ;;  %s4178_s22 = smov [#allocation13]  }
  0x76   : > { %s514_s17 = sshll.u32 %s4177_s16, 4  ;;  %s546_s7 = sshll.u32 %s4178_s22, 4  ;;  %s515_s17 = int_to_ptr.vmem [resolvable:$true] %s514_s17  ;;  %s547_s7 = int_to_ptr.vmem [resolvable:$true] %s546_s7 }
  0x77   : > { %s3962_s11 = scalar_lea.vmem %s515_s17, 1024  ;;  %p4991_p3 = scmp.ne.s32.totalorder %s4977_s28, 0 }
  0x78   : > { %p3963_p1 = scmp.ne.s32.totalorder %s515_s17, %s3962_s11  ;;  %p3970_p0 = scmp.lt.s32.totalorder %s515_s17, %s515_s17 }
  0x79   : > { %p3971_p2 = scmp.lt.s32.totalorder %s3962_s11, %s3962_s11 }
  0x7a   : > { %p3965_p5 = pnand %p3963_p1, %p4991_p3 }
  0x7b   : > { %p3972_p12 = por %p3971_p2, %p3970_p0 }
  0x7c   : > { %p3966_p6 = pneg %p3965_p5 }
  0x7e   : > { %p3973_p13 = pnand %p3972_p12, %p3966_p6 }
  0x80   : > { %3976 = shalt.err (!%p3973_p13)
}
  0x81   : > { %p4992_p4 = scmp.ne.s32.totalorder %s4976_s3, 0  ;;  %s4993_s29 = smov 4  }
  0x82   : > { %s4994_s24 = smov 64   ;;  %s4995_s5 = sld [smem:[#allocation34_spill]] }
  0x83   : > { %s3988_s16 = scalar_lea.vmem %s547_s7, 1024  ;;  %p3996_p1 = scmp.lt.s32.totalorder %s547_s7, %s547_s7 }
  0x84   : > { %p3989_p7 = scmp.ne.s32.totalorder %s547_s7, %s3988_s16  ;;  %p3997_p5 = scmp.lt.s32.totalorder %s3988_s16, %s3988_s16 }
  0x86   : > { %p3991_p8 = pnand %p3989_p7, %p4991_p3  ;;  %p3998_p6 = por %p3997_p5, %p3996_p1 }
  0x88   : > { %3598 = dma.hbm_to_vmem [thread:$0]  (!%p4992_p4), %s4995_s5, 1024, %s515_s17, [#allocation9], %s4994_s24, %s4994_s24, %s4993_s29  }
  0x89   : > { %p3992_p11 = pneg %p3991_p8 }
  0x8b   : > { %p3999_p0 = pnand %p3998_p6, %p3992_p11 }
  0x8d   : > { %4002 = shalt.err (!%p3999_p0)
}
  0x8e   : > { %s4996_s9 = sld [smem:[#allocation36_spill]]  ;;  %s4179_s17 = smov [#allocation16]  }
  0x8f   : > { %s578_s19 = sshll.u32 %s4179_s17, 4  ;;  %s579_s19 = int_to_ptr.vmem [resolvable:$true] %s578_s19 }
  0x90   : > { %s4014_s1 = scalar_lea.vmem %s579_s19, 4096  ;;  %p4022_p7 = scmp.lt.s32.totalorder %s579_s19, %s579_s19 }
  0x91   : > { %p4015_p2 = scmp.ne.s32.totalorder %s579_s19, %s4014_s1  ;;  %p4023_p8 = scmp.lt.s32.totalorder %s4014_s1, %s4014_s1 }
  0x93   : > { %p4017_p12 = pnand %p4015_p2, %p4991_p3  ;;  %p4024_p11 = por %p4023_p8, %p4022_p7 }
  0x94   : > { %3604 = dma.hbm_to_vmem [thread:$0]  (!%p4992_p4), %s4996_s9, 1024, %s547_s7, [#allocation12], %s4994_s24, %s4994_s24, %s4993_s29  }
  0x95   : > { %p4018_p13 = pneg %p4017_p12 }
  0x97   : > { %p4025_p1 = pnand %p4024_p11, %p4018_p13 }
  0x99   : > { %4028 = shalt.err (!%p4025_p1)
}
  0x9a   : > { %3610 = dma.hbm_to_vmem [thread:$0]  (!%p4992_p4), %s4923_s13, 4096, %s579_s19, [#allocation15], %s4994_s24, %s4994_s24, %s4993_s29  }
  0x9b   : > { %s4997_s11 = sld [smem:[#allocation30_spill]]  ;;  %s611_s3 = scalar_lea.vmem [#allocation2], %s4410_s25 }
  0x9c   : > { %s618_s1 = sshll.u32 %s611_s3, 4  ;;  %s4998_s12 = sand.u32 1, %s4161_s20   ;;  %s4498_s1 = int_to_ptr.vmem [resolvable:$true] %s618_s1 }
  0x9d   : > { %s608_s21 = scalar_lea.sflag [#allocation3], %s4998_s12 }
  0xa1   : > { %s4495_s17 = scalar_lea.hbm %s4997_s11, %s4413_s26  ;;  %s4034_s19 = scalar_lea.hbm %s4997_s11, 1024 }
  0xa2   : > { %s4029_s16 = scalar_lea.hbm %s4495_s17, 256  ;;  %p4035_p4 = scmp.lt.s32.totalorder %s4495_s17, %s4997_s11 }
  0xa3   : > { %p4030_p3 = scmp.ne.s32.totalorder %s4495_s17, %s4029_s16  ;;  %p4036_p0 = scmp.lt.s32.totalorder %s4034_s19, %s4029_s16 }
  0xa5   : > { %p4032_p5 = pnand %p4030_p3, %p4435_p10  ;;  %p4037_p2 = por %p4036_p0, %p4035_p4 }
  0xa7   : > { %p4033_p6 = pneg %p4032_p5 }
  0xa9   : > { %p4038_p12 = pnand %p4037_p2, %p4033_p6 }
  0xab   : > { %4041 = shalt.err (!%p4038_p12)
}
  0xac   : > { %s4042_s12 = scalar_lea.vmem %s4498_s1, 256  ;;  %s4180_s22 = smov [#allocation2]  }
  0xad   : > { %p4043_p13 = scmp.ne.s32.totalorder %s4498_s1, %s4042_s12  ;;  %s4047_s3 = sshll.u32 %s4180_s22, 4  ;;  %s4048_s3 = int_to_ptr.vmem [resolvable:$false] %s4047_s3 }
  0xae   : > { %s4049_s24 = scalar_lea.vmem %s4048_s3, 512  ;;  %p4050_p11 = scmp.lt.s32.totalorder %s4498_s1, %s4048_s3 }
  0xaf   : > { %p4045_p7 = pnand %p4043_p13, %p4435_p10  ;;  %p4051_p1 = scmp.lt.s32.totalorder %s4049_s24, %s4042_s12 }
  0xb1   : > { %p4046_p8 = pneg %p4045_p7  ;;  %p4052_p3 = por %p4051_p1, %p4050_p11 }
  0xb3   : > { %p4053_p5 = pnand %p4052_p3, %p4046_p8 }
  0xb5   : > { %4056 = shalt.err (!%p4053_p5)
}
  0xb6   : > { %s4999_s16 = smov 8   ;;  %s5000_s29 = smov 128  }
  0xb7   : > { %3614 = dma.hbm_to_vmem [thread:$0]  (!%p4415_p9), %s4495_s17, 256, %s4498_s1, %s608_s21, %s5000_s29, %s5000_s29, %s4999_s16  }
  0xb8   : > { %s5001_s28 = sld [smem:[#allocation32_spill]]  ;;  %s653_s12 = scalar_lea.vmem [#allocation7], %s4410_s25 }
  0xb9   : > { %s660_s3 = sshll.u32 %s653_s12, 4  ;;  %s661_s3 = int_to_ptr.vmem [resolvable:$true] %s660_s3 }
  0xbe   : > { %s4529_s22 = scalar_lea.hbm %s5001_s28, %s4413_s26  ;;  %s4062_s21 = scalar_lea.hbm %s5001_s28, 1024 }
  0xbf   : > { %s4057_s24 = scalar_lea.hbm %s4529_s22, 256  ;;  %p4063_p2 = scmp.lt.s32.totalorder %s4529_s22, %s5001_s28 }
  0xc0   : > { %p4058_p6 = scmp.ne.s32.totalorder %s4529_s22, %s4057_s24  ;;  %p4064_p12 = scmp.lt.s32.totalorder %s4062_s21, %s4057_s24 }
  0xc2   : > { %p4060_p4 = pnand %p4058_p6, %p4435_p10  ;;  %p4065_p13 = por %p4064_p12, %p4063_p2 }
  0xc4   : > { %p4061_p0 = pneg %p4060_p4 }
  0xc6   : > { %p4066_p7 = pnand %p4065_p13, %p4061_p0 }
  0xc8   : > { %4069 = shalt.err (!%p4066_p7)
}
  0xc9   : > { %s4070_s25 = scalar_lea.vmem %s661_s3, 256  ;;  %s4181_s26 = smov [#allocation7]  }
  0xca   : > { %p4071_p8 = scmp.ne.s32.totalorder %s661_s3, %s4070_s25  ;;  %s4075_s19 = sshll.u32 %s4181_s26, 4  ;;  %s4076_s19 = int_to_ptr.vmem [resolvable:$false] %s4075_s19 }
  0xcb   : > { %s4077_s7 = scalar_lea.vmem %s4076_s19, 512  ;;  %p4078_p3 = scmp.lt.s32.totalorder %s661_s3, %s4076_s19 }
  0xcc   : > { %p4073_p11 = pnand %p4071_p8, %p4435_p10  ;;  %p4079_p5 = scmp.lt.s32.totalorder %s4077_s7, %s4070_s25 }
  0xce   : > { %p4074_p1 = pneg %p4073_p11  ;;  %p4080_p6 = por %p4079_p5, %p4078_p3 }
  0xd0   : > { %p4081_p4 = pnand %p4080_p6, %p4074_p1 }
  0xd2   : > { %4084 = shalt.err (!%p4081_p4)
}
  0xd3   : > { %3620 = dma.hbm_to_vmem [thread:$0]  (!%p4415_p9), %s4529_s22, 256, %s661_s3, %s4429_s0, %s5000_s29, %s5000_s29, %s4999_s16  }
  0xd4   : > { %p5002_p10 = scmp.ne.s32.totalorder %s4975_s23, 0 }
  0xd5   : > { %s4555_s5 = sand.u32 (!%p5002_p10), 1, %s4157_s30   ;;  %p5003_p0 = scmp.ne.s32.totalorder (!%p5002_p10), %s4983_s27, 0 }
  0xd6   : > { %672 = sbr.rel (%p5002_p10) target bundleno = 4095 (0xfff), region = 96  ;;  %s4558_s9 = sshll.u32 (!%p5002_p10), %s4555_s5, 4 }
  0xd7   : > { %s675_s14 = scalar_lea.sflag (!%p5002_p10), [#allocation3], %s4555_s5  ;;  %s4562_s18 = scalar_lea.vmem (!%p5002_p10), [#allocation2], %s4558_s9 }
  0xdb   : > { %4128 = dma.done.wait (%p5003_p0), %s675_s14, 256  }
  0xdc   : > { %4130 = vsyncadd (%p5003_p0), %s675_s14, 4294967040  ;;  %s683_s0 = sand.u32 1, %s4312_s2   ;;  %s687_s16 = scalar_lea.vmem [#allocation5], %s4558_s9 }
  0xdd   : > { %s684_s23 = scalar_lea.sflag [#allocation6], %s683_s0 }
  0xde   : > { %4132 = dma.done.wait (%p5003_p0), %s684_s23, 512  }
  0xdf   : > { %4134 = vsyncadd (%p5003_p0), %s684_s23, 4294966784  ;;  %s696_s29 = scalar_lea.vmem [#allocation7], %s4558_s9  ;;  %p5004_p9 = scmp.eq.s32.totalorder %s4312_s2, 0 }
  0xe1   : > { %4136 = dma.done.wait (%p5004_p9), [#allocation9], 2048   ;;  %p5005_p2 = pmov %p5004_p9 }
  0xe3   : > { %4138 = vsyncadd (%p5005_p2), [#allocation9], 4294965248  ;;  %p5006_p12 = pmov %p5005_p2 }
  0xe4   : > { %p5007_p13 = pmov %p5005_p2 }
  0xe5   : > { %4140 = dma.done.wait (%p5006_p12), [#allocation12], 2048  }
  0xe6   : > { %4142 = vsyncadd (%p5007_p13), [#allocation12], 4294965248  ;;  %p5008_p7 = pmov %p5005_p2 }
  0xe7   : > { %p5009_p8 = pmov %p5005_p2 }
  0xe8   : > { %4144 = dma.done.wait (%p5008_p7), [#allocation15], 8192  }
  0xe9   : > { %4146 = vsyncadd (%p5009_p8), [#allocation15], 4294959104  ;;  %v4182_v0 = vmov 0.0   ;;  %vm4183_vm0 = vmmov 0   ;;  %v3691_v1 = vld [vmem:[#allocation10 + $0x38] sm:$0xff]   ;;  %v3693_v3 = vld [vmem:[#allocation10 + $0x30] sm:$0xff]  }
  0xea   : > { %3404 = vmatprep.subr.bf16.mxu1 %v4182_v0  ;;  %3384 = vmatprep.subr.bf16.mxu0 %v4182_v0  ;;  %v3692_v2 = vld [vmem:[#allocation8 + $0x38] sm:$0xff]   ;;  %v3694_v4 = vld [vmem:[#allocation8 + $0x30] sm:$0xff]   ;;  %v3695_v5 = vld [vmem:[#allocation10 + $0x28] sm:$0xff]   ;;  %vm1141_vm1 = vcmask 261120   ;;  %vm1234_vm2 = vcmask 64512   ;;  %s4184_s24 = smov 96  }
  0xeb   : > { %3420 = vmatprep.mubr.msk.bf16.mxu1 %vm4183_vm0, %v4182_v0  ;;  %3400 = vmatprep.mubr.msk.bf16.mxu0 %vm4183_vm0, %v4182_v0  ;;  %v3696_v6 = vld [vmem:[#allocation8 + $0x28] sm:$0xff]   ;;  %v3697_v7 = vld [vmem:[#allocation10 + $0x20] sm:$0xff]   ;;  %v3699_v9 = vld [vmem:[#allocation10 + $0x18] sm:$0xff]   ;;  %vm1262_vm3 = vcmask 1043456   ;;  %s4185_s1 = smov 64   ;;  %s4186_s25 = smov 32  }
  0xec   : > { %3405 = vmatpush3.bf16.msra.mxu1 %v3691_v1  ;;  %3385 = vmatpush3.bf16.msra.mxu0 %v3692_v2  ;;  %v3698_v8 = vld [vmem:[#allocation8 + $0x20] sm:$0xff]   ;;  %v3700_v10 = vld [vmem:[#allocation8 + $0x18] sm:$0xff]   ;;  %v3701_v11 = vld [vmem:[#allocation10 + $0x10] sm:$0xff]   ;;  %vm2050_vm4 = vcmask 523264   ;;  %vm2055_vm5 = vcmask 785408   ;;  %s5010_s23 = sld [smem:[#allocation40_spill]] }
  0xed   : > { %3406 = vmatprep.subr.bf16.mxu1 %v4182_v0  ;;  %3386 = vmatprep.subr.bf16.mxu0 %v4182_v0  ;;  %v3702_v12 = vld [vmem:[#allocation8 + $0x10] sm:$0xff]   ;;  %v3703_v13 = vld [vmem:[#allocation10 + $0x8] sm:$0xff]   ;;  %v3705_v15 = vld [vmem:[#allocation10] sm:$0xff]   ;;  %s5011_s27 = sld [smem:[#allocation38_spill]]  ;;  %s3271_s7 = sshll.u32 %s4312_s2, 8 }
  0xee   : > { %v3704_v14 = vld [vmem:[#allocation8 + $0x8] sm:$0xff]   ;;  %v905_v16 = vld [vmem:[%s687_s16] sm:$0xff]  ;;  %v3707_v43 = vld [vmem:[#allocation11 + $0x38] sm:$0xff]   ;;  %s5012_s3 = sld [smem:[#allocation39_spill]]  ;;  %s784_s14 = scalar_lea.vmem [#allocation17], %s4558_s9 }
  0xef   : > { %v906_v17 = vld [vmem:[%s687_s16 + $0x8] sm:$0xff]  ;;  %v3706_v18 = vld [vmem:[#allocation8] sm:$0xff]   ;;  %v3708_v44 = vld [vmem:[#allocation11 + $0x30] sm:$0xff]   ;;  %s5013_s17 = sld [smem:[#allocation41_spill]]  ;;  %s4188_s2 = smov [#allocation17]  }
  0xf0   : > { %3407 = vmatpush3.bf16.msra.mxu1 %v3693_v3  ;;  %3387 = vmatpush3.bf16.msra.mxu0 %v3694_v4  ;;  %v790_v19 = vld [vmem:[%s4562_s18] sm:$0xff]  ;;  %v791_v20 = vld [vmem:[%s4562_s18 + $0x8] sm:$0xff]  ;;  %v907_v21 = vpack.c.bf16 %v906_v17, %v905_v16  ;;  %s5014_s26 = sld [smem:[#allocation42_spill]]  ;;  %s4089_s9 = sshll.u32 %s4188_s2, 4  ;;  %s4090_s9 = int_to_ptr.vmem [resolvable:$false] %s4089_s9 }
  0xf1   : > { %3408 = vmatprep.subr.bf16.mxu1 %v4182_v0  ;;  %3388 = vmatprep.subr.bf16.mxu0 %v4182_v0  ;;  %v792_v22 = vpack.c.bf16 %v791_v20, %v790_v19  ;;  %v3150_v23 = vld [vmem:[%s4916_s6] ss:$0 sm:$0xff]  ;;  %v3709_v45 = vld [vmem:[#allocation11 + $0x28] sm:$0xff]   ;;  %v3711_v47 = vld [vmem:[#allocation11 + $0x18] sm:$0xff]   ;;  %s5015_s19 = sld [smem:[#allocation28_spill]]  ;;  %s4091_s12 = scalar_lea.vmem %s4090_s9, 512 }
  0xf2   : > { %v3141_v27 = vld [vmem:[%s4914_s4] ss:$0 sm:$0xff]  ;;  %v3712_v48 = vld [vmem:[#allocation11 + $0x10] sm:$0xff]   ;;  %v3713_v49 = vld [vmem:[#allocation11 + $0x8] sm:$0xff]   ;;  %s5016_s16 = sld [smem:[#allocation43_spill]] }
  0xf3   : > { %v3710_v46 = vld [vmem:[#allocation11 + $0x20] sm:$0xff]   ;;  %v1021_v52 = vld [vmem:[%s696_s29 + $0x8] sm:$0xff] }
  0xf4   : > { %3409 = vmatpush3.bf16.msra.mxu1 %v3695_v5  ;;  %3389 = vmatpush3.bf16.msra.mxu0 %v3696_v6  ;;  %v3714_v50 = vld [vmem:[#allocation11] sm:$0xff]  }
  0xf5   : > { %3410 = vmatprep.subr.bf16.mxu1 %v4182_v0  ;;  %3390 = vmatprep.subr.bf16.mxu0 %v4182_v0  ;;  %v1020_v51 = vld [vmem:[%s696_s29] sm:$0xff] }
  0xf6   : > { %v1022_v53 = vpack.c.bf16 %v1021_v52, %v1020_v51 }
  0xf7   : > { %p5017_p1 = scmp.ne.s32.totalorder %s5015_s19, 0 }
  0xf8   : > { %3411 = vmatpush3.bf16.msra.mxu1 %v3697_v7  ;;  %3391 = vmatpush3.bf16.msra.mxu0 %v3698_v8  ;;  %s4866_s29 = scalar_lea.hbm %s5016_s16, %s3271_s7 }
  0xf9   : > { %3412 = vmatprep.subr.bf16.mxu1 %v4182_v0  ;;  %3392 = vmatprep.subr.bf16.mxu0 %v4182_v0 }
  0xfc   : > { %3413 = vmatpush3.bf16.msra.mxu1 %v3699_v9  ;;  %3393 = vmatpush3.bf16.msra.mxu0 %v3700_v10 }
  0xfd   : > { %3414 = vmatprep.subr.bf16.mxu1 %v4182_v0  ;;  %3394 = vmatprep.subr.bf16.mxu0 %v4182_v0 }
 0x100   : > { %3415 = vmatpush3.bf16.msra.mxu1 %v3701_v11  ;;  %3395 = vmatpush3.bf16.msra.mxu0 %v3702_v12  ;;  %v3159_v12 = vld [vmem:[%s4918_s8] ss:$0 sm:$0xff] }
 0x101   : > { %3416 = vmatprep.subr.bf16.mxu1 %v4182_v0  ;;  %3396 = vmatprep.subr.bf16.mxu0 %v4182_v0 }
 0x104   : > { %3417 = vmatpush3.bf16.msra.mxu1 %v3703_v13  ;;  %3397 = vmatpush3.bf16.msra.mxu0 %v3704_v14 }
 0x105   : > { %3418 = vmatprep.subr.bf16.mxu1 %v4182_v0  ;;  %3398 = vmatprep.subr.bf16.mxu0 %v4182_v0 }
 0x108   : > { %3419 = vmatpush3.bf16.msra.mxu1 %v3705_v15  ;;  %3399 = vmatpush3.bf16.msra.mxu0 %v3706_v18 }
 0x109   : > { %3444 = vmatprep.subr.bf16.mxu1 %v4182_v0  ;;  %3424 = vmatprep.subr.bf16.mxu0 %v4182_v0 }
 0x10b   : > { %3421 = vmatmul.mubr.bf16.vlgmr.msra.gmra.mxu1 %v907_v21  ;;  %3401 = vmatmul.mubr.bf16.vlgmr.msra.gmra.mxu0 %v792_v22 }
 0x10c   : > { %3446 = vmatprep.mubr.msk.bf16.mxu1 %vm4183_vm0, %v4182_v0  ;;  %3440 = vmatprep.mubr.msk.bf16.mxu0 %vm4183_vm0, %v4182_v0 }
 0x10d   : > { %3425 = vmatpush3.bf16.msra.mxu0 %v3707_v43 }
 0x10e   : > { %3426 = vmatprep.subr.bf16.mxu0 %v4182_v0 }
 0x111   : > { %3427 = vmatpush3.bf16.msra.mxu0 %v3708_v44 }
 0x112   : > { %3428 = vmatprep.subr.bf16.mxu0 %v4182_v0 }
 0x115   : > { %3429 = vmatpush3.bf16.msra.mxu0 %v3709_v45 }
 0x116   : > { %3430 = vmatprep.subr.bf16.mxu0 %v4182_v0 }
 0x119   : > { %3431 = vmatpush3.bf16.msra.mxu0 %v3710_v46 }
 0x11a   : > { %3432 = vmatprep.subr.bf16.mxu0 %v4182_v0 }
 0x11d   : > { %3433 = vmatpush3.bf16.msra.mxu0 %v3711_v47 }
 0x11e   : > { %3434 = vmatprep.subr.bf16.mxu0 %v4182_v0 }
 0x121   : > { %3435 = vmatpush3.bf16.msra.mxu0 %v3712_v48 }
 0x122   : > { %3436 = vmatprep.subr.bf16.mxu0 %v4182_v0 }
 0x125   : > { %3437 = vmatpush3.bf16.msra.mxu0 %v3713_v49 }
 0x126   : > { %3438 = vmatprep.subr.bf16.mxu0 %v4182_v0 }
 0x129   : > { %3439 = vmatpush3.bf16.msra.mxu0 %v3714_v50 }
 0x12a   : > { %3492 = vmatprep.subr.bf16.mxu0 %v4182_v0 }
 0x12c   : > { %3441 = vmatmul.mubr.bf16.vlgmr.msra.gmra.mxu0 %v1022_v53 }
 0x12d   : > { %3494 = vmatprep.mubr.msk.bf16.mxu0 %vm4183_vm0, %v4182_v0 }
 0x1cb   : > { %v1013_v24 = vpop.f32.mrf.mxu1  ;;  %v898_v26 = vpop.f32.mrf.mxu0 }
 0x1cc   : > { %v1014_v25 = vadd.f32 %v3150_v23, %v1013_v24  ;;  %v899_v32 = vadd.f32 %v3141_v27, %v898_v26 }
 0x1cd   : > { %v3422_v28 = vpop.f32.mrf.mxu1  ;;  %v3402_v30 = vpop.f32.mrf.mxu0 }
 0x1ce   : > { %v4625_v29 = vpack.c.bf16 %v1014_v25, %v1014_v25  ;;  %v4630_v38 = vpack.c.bf16 %v899_v32, %v899_v32 }
 0x1cf   : > { %v1016_v31 = vpop.f32.mrf.mxu1  ;;  %v901_v34 = vpop.f32.mrf.mxu0 }
 0x1d0   : > { %v1017_v33 = vadd.f32 %v3150_v23, %v1016_v31  ;;  %v1146_v35 = vsel %vm1141_vm1, %v4625_v29, 0  ;;  %v902_v41 = vadd.f32 %v3141_v27, %v901_v34 }
 0x1d1   : > { %v3423_v36 = vpop.f32.mrf.mxu1  ;;  %3445 = vmatpush3.bf16.xpose.msra.mxu1 %v1146_v35  ;;  %v3403_v37 = vpop.f32.mrf.mxu0 }
 0x1d2   : > { %3450 = vmatprep.subr.bf16.mxu1 %v4182_v0  ;;  %v4632_v39 = vpack.c.bf16 %v1017_v33, %v1017_v33  ;;  %v4641_v42 = vpack.c.bf16 %v902_v41, %v902_v41 }
 0x1d4   : > { %v1192_v40 = vsel %vm1141_vm1, %v4632_v39, 0 }
 0x1d8   : > { %3447 = vmatmul.mubr.msk.bf16.vlgmr.msra.gmra.mxu1 %vm1141_vm1, %v4630_v38 }
 0x1d9   : > { %3451 = vmatpush3.bf16.xpose.msra.mxu1 %v1192_v40  ;;  %3452 = vmatprep.mubr.msk.bf16.mxu1 %vm4183_vm0, %v4182_v0 }
 0x1da   : > { %3456 = vmatprep.subr.bf16.mxu1 %v4182_v0 }
 0x1e0   : > { %3453 = vmatmul.mubr.msk.bf16.vlgmr.msra.gmra.mxu1 %vm1141_vm1, %v4641_v42 }
 0x1e1   : > { %3458 = vmatprep.mubr.msk.bf16.mxu1 %vm4183_vm0, %v4182_v0 }
 0x1ec   : > { %v1128_v11 = vpop.f32.mrf.mxu0 }
 0x1ed   : > { %v1129_v14 = vadd.f32 %v3159_v12, %v1128_v11 }
 0x1ee   : > { %v3442_v13 = vpop.f32.mrf.mxu0 }
 0x1ef   : > { %v4670_v18 = vpack.c.bf16 %v1129_v14, %v1129_v14 }
 0x1f0   : > { %v1131_v15 = vpop.f32.mrf.mxu0 }
 0x1f1   : > { %v1132_v16 = vadd.f32 %v3159_v12, %v1131_v15  ;;  %v1264_v19 = vsel %vm1262_vm3, %v4670_v18, 0 }
 0x1f2   : > { %v3443_v17 = vpop.f32.mrf.mxu0  ;;  %3457 = vmatpush3.bf16.msra.mxu1 %v1264_v19 }
 0x1f3   : > { %3462 = vmatprep.subr.bf16.mxu1 %v4182_v0  ;;  %v4681_v23 = vpack.c.bf16 %v1132_v16, %v1132_v16 }
 0x1f5   : > { %v1310_v26 = vsel %vm1262_vm3, %v4681_v23, 0 }
 0x298   : > { %v1182_v54 = vpop.f32.mrf.mxu1 }
 0x299   : > { %v1235_v55 = vsel %vm1234_vm2, %v1182_v54, -inf }
 0x29a   : > { %1236 = vmax.xlane.f32.xlu0 %v1235_v55  ;;  %v3448_v56 = vpop.f32.mrf.mxu1 }
 0x29c   : > { %v1185_v57 = vpop.f32.mrf.mxu1 }
 0x29e   : > { %v3449_v58 = vpop.f32.mrf.mxu1 }
 0x2a0   : > { %v1228_v59 = vpop.f32.mrf.mxu1 }
 0x2a1   : > { %v1238_v60 = vsel %vm1234_vm2, %v1228_v59, -inf }
 0x2a2   : > { %1239 = vmax.xlane.f32.xlu0 %v1238_v60  ;;  %v3454_v61 = vpop.f32.mrf.mxu1 }
 0x2a4   : > { %v1231_v62 = vpop.f32.mrf.mxu1 }
 0x2a6   : > { %v3455_v63 = vpop.f32.mrf.mxu1 }
 0x2b8   : > { %1358 = vrot.lane.b32.xlu0 %v4625_v29, %s4184_s24 }
 0x323   : > { %v1237_v1 = vpop.xlane.xlu0 %1236 }
 0x324   : > { %v1241_v2 = vsub.f32 %v1182_v54, %v1237_v1 }
 0x326   : > { %v1243_v3 = vmul.f32 1.442695, %v1241_v2 }
 0x328   : > { %3803 = vpow2.f32 %v1243_v3 }
 0x32b   : > { %v1240_v4 = vpop.xlane.xlu0 %1239 }
 0x32c   : > { %v1242_v5 = vsub.f32 %v1228_v59, %v1240_v4 }
 0x32e   : > { %v1245_v6 = vmul.f32 1.442695, %v1242_v5 }
 0x32f   : > { %v1359_v30 = vpop.permute.xlu0 %1358 }
 0x330   : > { %3805 = vpow2.f32 %v1245_v6  ;;  %v1364_v33 = vsel %vm1141_vm1, %v1359_v30, 0 }
 0x335   : > { %v3804_v7 = vpop.eup %3803 }
 0x336   : > { %v1247_v8 = vsel %vm1234_vm2, %v3804_v7, 0.0 }
 0x337   : > { %1248 = vadd.xlane.f32.xlu1 %v1247_v8 }
 0x33d   : > { %v3806_v9 = vpop.eup %3805 }
 0x33e   : > { %v1250_v10 = vsel %vm1234_vm2, %v3806_v9, 0.0 }
 0x33f   : > { %1251 = vadd.xlane.f32.xlu1 %v1250_v10 }
 0x350   : > { %1355 = vrot.lane.b32.xlu1 %v4630_v38, %s4184_s24 }
 0x354   : > { %1410 = vrot.lane.b32.xlu1 %v4632_v39, %s4184_s24 }
 0x358   : > { %1407 = vrot.lane.b32.xlu1 %v4641_v42, %s4184_s24 }
 0x3c0   : > { %v1249_v20 = vpop.xlane.xlu1 %1248 }
 0x3c1   : > { %3807 = vrcp.f32 %v1249_v20 }
 0x3c8   : > { %v1252_v21 = vpop.xlane.xlu1 %1251 }
 0x3c9   : > { %3809 = vrcp.f32 %v1252_v21 }
 0x3cc   : > { %v1356_v32 = vpop.permute.xlu1 %1355 }
 0x3ce   : > { %v3808_v22 = vpop.eup %3807 }
 0x3cf   : > { %v1255_v24 = vmul.f32 %v3808_v22, %v3804_v7 }
 0x3d0   : > { %v1411_v34 = vpop.permute.xlu1 %1410 }
 0x3d1   : > { %v1257_v25 = vpack.c.bf16 %v1255_v24, %v1255_v24  ;;  %v1416_v35 = vsel %vm1141_vm1, %v1411_v34, 0 }
 0x3d3   : > { %3459 = vmatmul.mubr.msk.bf16.vlgmr.msra.gmra.mxu1 %vm1234_vm2, %v1257_v25 }
 0x3d4   : > { %3463 = vmatpush3.bf16.msra.mxu1 %v1310_v26  ;;  %3464 = vmatprep.mubr.msk.bf16.mxu1 %vm4183_vm0, %v4182_v0  ;;  %v1408_v36 = vpop.permute.xlu1 %1407 }
 0x3d5   : > { %3468 = vmatprep.subr.bf16.mxu1 %v4182_v0 }
 0x3d6   : > { %v3810_v27 = vpop.eup %3809 }
 0x3d7   : > { %v1256_v28 = vmul.f32 %v3810_v27, %v3806_v9 }
 0x3d9   : > { %v1258_v31 = vpack.c.bf16 %v1256_v28, %v1256_v28 }
 0x3db   : > { %3465 = vmatmul.mubr.msk.bf16.vlgmr.msra.gmra.mxu1 %vm1234_vm2, %v1258_v31 }
 0x3dc   : > { %3469 = vmatpush3.bf16.xpose.msra.mxu1 %v1364_v33  ;;  %3470 = vmatprep.mubr.msk.bf16.mxu1 %vm4183_vm0, %v4182_v0 }
 0x3dd   : > { %3474 = vmatprep.subr.bf16.mxu1 %v4182_v0 }
 0x3e3   : > { %3471 = vmatmul.mubr.msk.bf16.vlgmr.msra.gmra.mxu1 %vm1141_vm1, %v1356_v32 }
 0x3e4   : > { %3475 = vmatpush3.bf16.xpose.msra.mxu1 %v1416_v35  ;;  %3476 = vmatprep.mubr.msk.bf16.mxu1 %vm4183_vm0, %v4182_v0 }
 0x3e5   : > { %3480 = vmatprep.subr.bf16.mxu1 %v4182_v0 }
 0x3eb   : > { %3477 = vmatmul.mubr.msk.bf16.vlgmr.msra.gmra.mxu1 %vm1141_vm1, %v1408_v36 }
 0x3ec   : > { %3482 = vmatprep.mubr.msk.bf16.mxu1 %vm4183_vm0, %v4182_v0 }
 0x493   : > { %v4702_v37 = vpop.f32.mrf.mxu1 }
 0x495   : > { %v3460_v40 = vpop.f32.mrf.mxu1 }
 0x497   : > { %v1303_v41 = vpop.f32.mrf.mxu1 }
 0x499   : > { %v3461_v43 = vpop.f32.mrf.mxu1 }
 0x49b   : > { %v4704_v44 = vpop.f32.mrf.mxu1 }
 0x49d   : > { %v3466_v45 = vpop.f32.mrf.mxu1 }
 0x49f   : > { %v1349_v46 = vpop.f32.mrf.mxu1 }
 0x4a1   : > { %v3467_v47 = vpop.f32.mrf.mxu1 }
 0x4a3   : > { %v1400_v48 = vpop.f32.mrf.mxu1 }
 0x4a4   : > { %v1458_v49 = vsel %vm1234_vm2, %v1400_v48, -inf }
 0x4a5   : > { %1459 = vmax.xlane.f32.xlu0 %v1458_v49  ;;  %v3472_v50 = vpop.f32.mrf.mxu1 }
 0x4a7   : > { %v1403_v51 = vpop.f32.mrf.mxu1 }
 0x4a9   : > { %v3473_v52 = vpop.f32.mrf.mxu1 }
 0x4ab   : > { %v1452_v53 = vpop.f32.mrf.mxu1 }
 0x4ac   : > { %v1461_v54 = vsel %vm1234_vm2, %v1452_v53, -inf }
 0x4ad   : > { %1462 = vmax.xlane.f32.xlu1 %v1461_v54  ;;  %v3478_v55 = vpop.f32.mrf.mxu1 }
 0x4af   : > { %v1455_v56 = vpop.f32.mrf.mxu1 }
 0x4b1   : > { %v3479_v57 = vpop.f32.mrf.mxu1 }
 0x4be   : > { %1532 = vrot.lane.b32.xlu1 %v4681_v23, %s4184_s24 }
 0x4c2   : > { %1584 = vrot.lane.b32.xlu1 %v4625_v29, %s4185_s1 }
 0x4c6   : > { %1634 = vrot.lane.b32.xlu1 %v4632_v39, %s4185_s1 }
 0x4ca   : > { %1632 = vrot.lane.b32.xlu1 %v4641_v42, %s4185_s1 }
 0x52e   : > { %v1460_v58 = vpop.xlane.xlu0 %1459 }
 0x52f   : > { %v1464_v59 = vsub.f32 %v1400_v48, %v1460_v58 }
 0x531   : > { %v1466_v60 = vmul.f32 1.442695, %v1464_v59 }
 0x533   : > { %3811 = vpow2.f32 %v1466_v60 }
 0x536   : > { %v1463_v61 = vpop.xlane.xlu1 %1462 }
 0x537   : > { %v1465_v62 = vsub.f32 %v1452_v53, %v1463_v61 }
 0x539   : > { %v1468_v63 = vmul.f32 1.442695, %v1465_v62 }
 0x53a   : > { %v1533_v1 = vpop.permute.xlu1 %1532 }
 0x53b   : > { %3813 = vpow2.f32 %v1468_v63  ;;  %v1538_v16 = vsel %vm1262_vm3, %v1533_v1, 0 }
 0x53e   : > { %v1585_v2 = vpop.permute.xlu1 %1584 }
 0x53f   : > { %v1590_v3 = vsel %vm1141_vm1, %v1585_v2, 0 }
 0x540   : > { %v3812_v4 = vpop.eup %3811  ;;  %3493 = vmatpush3.bf16.xpose.msra.mxu0 %v1590_v3 }
 0x541   : > { %v1470_v5 = vsel %vm1234_vm2, %v3812_v4, 0.0  ;;  %3504 = vmatprep.subr.bf16.mxu0 %v4182_v0 }
 0x542   : > { %1471 = vadd.xlane.f32.xlu0 %v1470_v5  ;;  %v1635_v20 = vpop.permute.xlu1 %1634 }
 0x543   : > { %v1640_v22 = vsel %vm1141_vm1, %v1635_v20, 0 }
 0x546   : > { %v1633_v24 = vpop.permute.xlu1 %1632 }
 0x548   : > { %v3814_v6 = vpop.eup %3813 }
 0x549   : > { %v1473_v7 = vsel %vm1234_vm2, %v3814_v6, 0.0 }
 0x54a   : > { %1474 = vadd.xlane.f32.xlu0 %v1473_v7 }
 0x560   : > { %1483 = vrot.lane.b32.xlu0 %v4670_v18, %s4184_s24 }
 0x564   : > { %1582 = vrot.lane.b32.xlu0 %v4630_v38, %s4185_s1 }
 0x5cb   : > { %v1472_v8 = vpop.xlane.xlu0 %1471 }
 0x5cc   : > { %3815 = vrcp.f32 %v1472_v8 }
 0x5d3   : > { %v1475_v9 = vpop.xlane.xlu0 %1474 }
 0x5d4   : > { %3817 = vrcp.f32 %v1475_v9 }
 0x5d7   : > { %v1484_v10 = vpop.permute.xlu0 %1483 }
 0x5d8   : > { %v1489_v11 = vsel %vm1262_vm3, %v1484_v10, 0 }
 0x5d9   : > { %v3816_v12 = vpop.eup %3815  ;;  %3481 = vmatpush3.bf16.msra.mxu1 %v1489_v11 }
 0x5da   : > { %3486 = vmatprep.subr.bf16.mxu1 %v4182_v0  ;;  %v1478_v13 = vmul.f32 %v3816_v12, %v3812_v4 }
 0x5db   : > { %v1583_v14 = vpop.permute.xlu0 %1582 }
 0x5dc   : > { %3495 = vmatmul.mubr.msk.bf16.vlgmr.msra.gmra.mxu0 %vm1141_vm1, %v1583_v14  ;;  %v1480_v15 = vpack.c.bf16 %v1478_v13, %v1478_v13 }
 0x5dd   : > { %3506 = vmatprep.mubr.msk.bf16.mxu0 %vm4183_vm0, %v4182_v0 }
 0x5de   : > { %3483 = vmatmul.mubr.msk.bf16.vlgmr.msra.gmra.mxu1 %vm1234_vm2, %v1480_v15 }
 0x5df   : > { %3487 = vmatpush3.bf16.msra.mxu1 %v1538_v16  ;;  %3488 = vmatprep.mubr.msk.bf16.mxu1 %vm4183_vm0, %v4182_v0 }
 0x5e0   : > { %3498 = vmatprep.subr.bf16.mxu1 %v4182_v0 }
 0x5e1   : > { %v3818_v17 = vpop.eup %3817 }
 0x5e2   : > { %v1479_v19 = vmul.f32 %v3818_v17, %v3814_v6 }
 0x5e4   : > { %v1481_v21 = vpack.c.bf16 %v1479_v19, %v1479_v19 }
 0x5e6   : > { %3489 = vmatmul.mubr.msk.bf16.vlgmr.msra.gmra.mxu1 %vm1234_vm2, %v1481_v21 }
 0x5e7   : > { %3499 = vmatpush3.bf16.xpose.msra.mxu1 %v1640_v22  ;;  %3500 = vmatprep.mubr.msk.bf16.mxu1 %vm4183_vm0, %v4182_v0 }
 0x5e8   : > { %3510 = vmatprep.subr.bf16.mxu1 %v4182_v0 }
 0x5ee   : > { %3501 = vmatmul.mubr.msk.bf16.vlgmr.msra.gmra.mxu1 %vm1141_vm1, %v1633_v24 }
 0x5ef   : > { %3512 = vmatprep.mubr.msk.bf16.mxu1 %vm4183_vm0, %v4182_v0 }
 0x69c   : > { %v1626_v25 = vpop.f32.mrf.mxu0 }
 0x69d   : > { %v1682_v26 = vsel %vm1234_vm2, %v1626_v25, -inf }
 0x69e   : > { %v4743_v27 = vpop.f32.mrf.mxu1  ;;  %1683 = vmax.xlane.f32.xlu0 %v1682_v26  ;;  %v3496_v28 = vpop.f32.mrf.mxu0 }
 0x6a0   : > { %v3484_v30 = vpop.f32.mrf.mxu1  ;;  %v1629_v31 = vpop.f32.mrf.mxu0 }
 0x6a2   : > { %v1528_v32 = vpop.f32.mrf.mxu1  ;;  %v3497_v33 = vpop.f32.mrf.mxu0 }
 0x6a3   : > { %v1580_v32 = vpack.c.bf16 %v4743_v27, %v4743_v27 }
 0x6a4   : > { %v3485_v34 = vpop.f32.mrf.mxu1 }
 0x6a6   : > { %v4745_v35 = vpop.f32.mrf.mxu1 }
 0x6a7   : > { %v1581_v33 = vpack.c.bf16 %v4745_v35, %v4745_v35 }
 0x6a8   : > { %v3490_v36 = vpop.f32.mrf.mxu1 }
 0x6aa   : > { %v1577_v40 = vpop.f32.mrf.mxu1 }
 0x6ac   : > { %v3491_v41 = vpop.f32.mrf.mxu1 }
 0x6ae   : > { %v1676_v43 = vpop.f32.mrf.mxu1 }
 0x6af   : > { %v1685_v45 = vsel %vm1234_vm2, %v1676_v43, -inf }
 0x6b0   : > { %1686 = vmax.xlane.f32.xlu1 %v1685_v45  ;;  %v3502_v46 = vpop.f32.mrf.mxu1 }
 0x6b2   : > { %v1679_v47 = vpop.f32.mrf.mxu1 }
 0x6b4   : > { %v3503_v48 = vpop.f32.mrf.mxu1 }
 0x6c1   : > { %1754 = vrot.lane.b32.xlu1 %v4681_v23, %s4185_s1 }
 0x6c5   : > { %1806 = vrot.lane.b32.xlu1 %v4625_v29, %s4186_s25 }
 0x6c9   : > { %1856 = vrot.lane.b32.xlu1 %v4632_v39, %s4186_s25 }
 0x6cd   : > { %1854 = vrot.lane.b32.xlu1 %v4641_v42, %s4186_s25 }
 0x727   : > { %v1684_v49 = vpop.xlane.xlu0 %1683 }
 0x728   : > { %v1688_v50 = vsub.f32 %v1626_v25, %v1684_v49 }
 0x72a   : > { %v1690_v51 = vmul.f32 1.442695, %v1688_v50 }
 0x72c   : > { %3819 = vpow2.f32 %v1690_v51 }
 0x739   : > { %v3820_v52 = vpop.eup %3819  ;;  %v1687_v53 = vpop.xlane.xlu1 %1686 }
 0x73a   : > { %v1689_v54 = vsub.f32 %v1676_v43, %v1687_v53  ;;  %v1694_v55 = vsel %vm1234_vm2, %v3820_v52, 0.0 }
 0x73b   : > { %1695 = vadd.xlane.f32.xlu0 %v1694_v55 }
 0x73c   : > { %v1692_v56 = vmul.f32 1.442695, %v1689_v54 }
 0x73d   : > { %v1755_v57 = vpop.permute.xlu1 %1754 }
 0x73e   : > { %3821 = vpow2.f32 %v1692_v56  ;;  %v1760_v29 = vsel %vm1262_vm3, %v1755_v57, 0 }
 0x73f   : > { %3511 = vmatpush3.bf16.msra.mxu1 %v1760_v29 }
 0x740   : > { %3522 = vmatprep.subr.bf16.mxu1 %v4182_v0 }
 0x741   : > { %v1807_v1 = vpop.permute.xlu1 %1806 }
 0x742   : > { %v1812_v3 = vsel %vm1141_vm1, %v1807_v1, 0  ;;  %v3722_v1 = vld [vmem:[#allocation13] sm:$0xff]  }
 0x745   : > { %v1857_v5 = vpop.permute.xlu1 %1856 }
 0x746   : > { %v1862_v8 = vsel %vm1141_vm1, %v1857_v5, 0 }
 0x749   : > { %v1855_v9 = vpop.permute.xlu1 %1854 }
 0x74b   : > { %v3822_v39 = vpop.eup %3821 }
 0x74c   : > { %v1697_v42 = vsel %vm1234_vm2, %v3822_v39, 0.0 }
 0x74d   : > { %1698 = vadd.xlane.f32.xlu0 %v1697_v42  ;;  %v3715_v42 = vld [vmem:[#allocation13 + $0x38] sm:$0xff]  }
 0x763   : > { %1706 = vrot.lane.b32.xlu0 %v4670_v18, %s4185_s1 }
 0x767   : > { %1804 = vrot.lane.b32.xlu0 %v4630_v38, %s4186_s25 }
 0x7c4   : > { %v1696_v58 = vpop.xlane.xlu0 %1695 }
 0x7c5   : > { %3823 = vrcp.f32 %v1696_v58  ;;  %v3716_v58 = vld [vmem:[#allocation13 + $0x30] sm:$0xff]  }
 0x7d2   : > { %v3824_v59 = vpop.eup %3823 }
 0x7d3   : > { %v1702_v61 = vmul.f32 %v3824_v59, %v3820_v52  ;;  %v3717_v59 = vld [vmem:[#allocation13 + $0x28] sm:$0xff]  }
 0x7d5   : > { %v1704_v2 = vpack.c.bf16 %v1702_v61, %v1702_v61  ;;  %v3719_v61 = vld [vmem:[#allocation13 + $0x18] sm:$0xff]  }
 0x7d6   : > { %v1699_v60 = vpop.xlane.xlu0 %1698 }
 0x7d7   : > { %3825 = vrcp.f32 %v1699_v60  ;;  %v3718_v60 = vld [vmem:[#allocation13 + $0x20] sm:$0xff]  }
 0x7da   : > { %v1707_v62 = vpop.permute.xlu0 %1706 }
 0x7db   : > { %v1712_v63 = vsel %vm1262_vm3, %v1707_v62, 0  ;;  %v3720_v62 = vld [vmem:[#allocation13 + $0x10] sm:$0xff]  }
 0x7dc   : > { %3505 = vmatpush3.bf16.msra.mxu0 %v1712_v63  ;;  %v3721_v63 = vld [vmem:[#allocation13 + $0x8] sm:$0xff]  }
 0x7dd   : > { %3516 = vmatprep.subr.bf16.mxu0 %v4182_v0 }
 0x7de   : > { %v1805_v6 = vpop.permute.xlu0 %1804 }
 0x7df   : > { %3507 = vmatmul.mubr.msk.bf16.vlgmr.msra.gmra.mxu0 %vm1234_vm2, %v1704_v2 }
 0x7e0   : > { %3517 = vmatpush3.bf16.xpose.msra.mxu0 %v1812_v3  ;;  %3518 = vmatprep.mubr.msk.bf16.mxu0 %vm4183_vm0, %v4182_v0 }
 0x7e1   : > { %3528 = vmatprep.subr.bf16.mxu0 %v4182_v0 }
 0x7e4   : > { %v3826_v38 = vpop.eup %3825 }
 0x7e5   : > { %v1703_v4 = vmul.f32 %v3826_v38, %v3822_v39 }
 0x7e7   : > { %3519 = vmatmul.mubr.msk.bf16.vlgmr.msra.gmra.mxu0 %vm1141_vm1, %v1805_v6  ;;  %v1705_v7 = vpack.c.bf16 %v1703_v4, %v1703_v4 }
 0x7e8   : > { %3530 = vmatprep.mubr.msk.bf16.mxu0 %vm4183_vm0, %v4182_v0 }
 0x7e9   : > { %3513 = vmatmul.mubr.msk.bf16.vlgmr.msra.gmra.mxu1 %vm1234_vm2, %v1705_v7 }
 0x7ea   : > { %3523 = vmatpush3.bf16.xpose.msra.mxu1 %v1862_v8  ;;  %3524 = vmatprep.mubr.msk.bf16.mxu1 %vm4183_vm0, %v4182_v0 }
 0x7eb   : > { %3534 = vmatprep.subr.bf16.mxu1 %v4182_v0 }
 0x7f1   : > { %3525 = vmatmul.mubr.msk.bf16.vlgmr.msra.gmra.mxu1 %vm1141_vm1, %v1855_v9 }
 0x7f2   : > { %3536 = vmatprep.mubr.msk.bf16.mxu1 %vm4183_vm0, %v4182_v0 }
 0x89f   : > { %v1748_v10 = vpop.f32.mrf.mxu0 }
 0x8a0   : > { %v1802_v50 = vpack.c.bf16 %v1748_v10, %v1748_v10 }
 0x8a1   : > { %v3508_v11 = vpop.f32.mrf.mxu0 }
 0x8a3   : > { %v1751_v12 = vpop.f32.mrf.mxu0 }
 0x8a5   : > { %v3509_v13 = vpop.f32.mrf.mxu0 }
 0x8a7   : > { %v1848_v14 = vpop.f32.mrf.mxu0 }
 0x8a8   : > { %v1904_v15 = vsel %vm1234_vm2, %v1848_v14, -inf }
 0x8a9   : > { %v1796_v16 = vpop.f32.mrf.mxu1  ;;  %1905 = vmax.xlane.f32.xlu0 %v1904_v15  ;;  %v3520_v17 = vpop.f32.mrf.mxu0  ;;  %v1353_v15 = vpack.c.bf16 %v4704_v44, %v4704_v44  ;;  %v3193_v44 = vld [vmem:[%s4920_s10] ss:$0 sm:$0xff] }
 0x8aa   : > { %v1803_v34 = vpack.c.bf16 %v1796_v16, %v1796_v16 }
 0x8ab   : > { %v3514_v19 = vpop.f32.mrf.mxu1  ;;  %v1851_v20 = vpop.f32.mrf.mxu0 }
 0x8ad   : > { %v1799_v21 = vpop.f32.mrf.mxu1  ;;  %v3521_v22 = vpop.f32.mrf.mxu0 }
 0x8af   : > { %v3515_v24 = vpop.f32.mrf.mxu1 }
 0x8b1   : > { %v1898_v25 = vpop.f32.mrf.mxu1 }
 0x8b2   : > { %v1907_v26 = vsel %vm1234_vm2, %v1898_v25, -inf }
 0x8b3   : > { %1908 = vmax.xlane.f32.xlu1 %v1907_v26  ;;  %v3526_v28 = vpop.f32.mrf.mxu1 }
 0x8b4   : > { %v3843_v28 = vld [vmem:[%s4562_s18] sm:$0xff] }
 0x8b5   : > { %v1901_v30 = vpop.f32.mrf.mxu1 }
 0x8b7   : > { %v3527_v31 = vpop.f32.mrf.mxu1 }
 0x8c4   : > { %1976 = vrot.lane.b32.xlu1 %v4681_v23, %s4186_s25 }
 0x8c8   : > { %2028 = vrot.lane.b32.xlu1 %v1580_v32, %s4186_s25 }
 0x8cc   : > { %2030 = vrot.lane.b32.xlu1 %v1581_v33, %s4186_s25 }
 0x8d0   : > { %2036 = vrot.lane.b32.xlu1 %v1803_v34, %s4185_s1  ;;  %v3844_v34 = vld [vmem:[%s4562_s18 + $0x8] sm:$0xff]  ;;  %s2939_s18 = sshll.u32 %s784_s14, 4  ;;  %s4868_s18 = int_to_ptr.vmem [resolvable:$true] %s2939_s18 }
 0x8d1   : > { %s4085_s22 = scalar_lea.vmem %s4868_s18, 256  ;;  %p4092_p6 = scmp.lt.s32.totalorder %s4868_s18, %s4090_s9 }
 0x8d2   : > { %p4086_p11 = scmp.ne.s32.totalorder %s4868_s18, %s4085_s22  ;;  %p4093_p4 = scmp.lt.s32.totalorder %s4091_s12, %s4085_s22 }
 0x8d4   : > { %p4087_p3 = pnand %p4086_p11, %p5017_p1  ;;  %p4094_p10 = por %p4093_p4, %p4092_p6 }
 0x8d6   : > { %p4088_p5 = pneg %p4087_p3 }
 0x8d8   : > { %p4095_p0 = pnand %p4094_p10, %p4088_p5 }
 0x932   : > { %v1906_v36 = vpop.xlane.xlu0 %1905 }
 0x933   : > { %v1910_v40 = vsub.f32 %v1848_v14, %v1906_v36  ;;  %v1352_v14 = vpack.c.bf16 %v4702_v37, %v4702_v37 }
 0x935   : > { %v1912_v41 = vmul.f32 1.442695, %v1910_v40 }
 0x937   : > { %3827 = vpow2.f32 %v1912_v41 }
 0x93c   : > { %v1909_v43 = vpop.xlane.xlu1 %1908 }
 0x93d   : > { %v1911_v45 = vsub.f32 %v1898_v25, %v1909_v43  ;;  %v3723_v43 = vld [vmem:[#allocation14 + $0xe0] ss:$16 sps:$4 sm:$0xff]  }
 0x93f   : > { %v1914_v23 = vmul.f32 1.442695, %v1911_v45  ;;  %v3725_v45 = vld [vmem:[#allocation14 + $0xe4] ss:$16 sps:$4 sm:$0xff]  }
 0x940   : > { %v1977_v46 = vpop.permute.xlu1 %1976 }
 0x941   : > { %3829 = vpow2.f32 %v1914_v23  ;;  %v1982_v27 = vsel %vm1262_vm3, %v1977_v46, 0  ;;  %v3726_v23 = vld [vmem:[#allocation14 + $0xe8] ss:$16 sps:$4 sm:$0xff]   ;;  %v3728_v46 = vld [vmem:[#allocation14 + $0xec] ss:$16 sps:$4 sm:$0xff]  }
 0x942   : > { %3535 = vmatpush3.bf16.msra.mxu1 %v1982_v27 }
 0x943   : > { %2438 = vmatprep.subr.bf16.mxu1 %v3725_v45  ;;  %v3778_v45 = vld [vmem:[#allocation16 + $0xb0] sm:$0xff]  }
 0x944   : > { %v3828_v47 = vpop.eup %3827  ;;  %v2029_v11 = vpop.permute.xlu1 %2028 }
 0x945   : > { %v1916_v35 = vsel %vm1234_vm2, %v3828_v47, 0.0  ;;  %v2046_v17 = vsel %vm1141_vm1, %v1352_v14, %v2029_v11  ;;  %v3770_v11 = vld [vmem:[#allocation14 + $0xc] ss:$16 sps:$4 sm:$0xff]  }
 0x946   : > { %1917 = vadd.xlane.f32.xlu0 %v1916_v35  ;;  %v3772_v14 = vld [vmem:[#allocation16 + $0xf8] sm:$0xff]  }
 0x948   : > { %v2031_v12 = vpop.permute.xlu1 %2030 }
 0x949   : > { %v2049_v19 = vsel %vm1141_vm1, %v1353_v15, %v2031_v12  ;;  %v3765_v12 = vld [vmem:[#allocation14] ss:$16 sps:$4 sm:$0xff]  }
 0x94e   : > { %v3830_v48 = vpop.eup %3829 }
 0x94f   : > { %v1919_v49 = vsel %vm1234_vm2, %v3830_v48, 0.0 }
 0x950   : > { %1920 = vadd.xlane.f32.xlu0 %v1919_v49 }
 0x966   : > { %1928 = vrot.lane.b32.xlu0 %v4670_v18, %s4186_s25 }
 0x96a   : > { %2034 = vrot.lane.b32.xlu0 %v1802_v50, %s4185_s1 }
 0x9cf   : > { %v1918_v51 = vpop.xlane.xlu0 %1917 }
 0x9d0   : > { %3831 = vrcp.f32 %v1918_v51 }
 0x9d9   : > { %v1921_v52 = vpop.xlane.xlu0 %1920 }
 0x9da   : > { %3833 = vrcp.f32 %v1921_v52 }
 0x9dd   : > { %v3832_v53 = vpop.eup %3831  ;;  %v1929_v54 = vpop.permute.xlu0 %1928 }
 0x9de   : > { %v1934_v55 = vsel %vm1262_vm3, %v1929_v54, 0  ;;  %v1924_v56 = vmul.f32 %v3832_v53, %v3828_v47  ;;  %v3731_v53 = vld [vmem:[#allocation14 + $0xc4] ss:$16 sps:$4 sm:$0xff]   ;;  %v3734_v54 = vld [vmem:[#allocation14 + $0xcc] ss:$16 sps:$4 sm:$0xff]  }
 0x9df   : > { %3529 = vmatpush3.bf16.msra.mxu0 %v1934_v55  ;;  %v3729_v55 = vld [vmem:[#allocation14 + $0xc0] ss:$16 sps:$4 sm:$0xff]  }
 0x9e0   : > { %v1926_v57 = vpack.c.bf16 %v1924_v56, %v1924_v56  ;;  %3540 = vmatprep.subr.bf16.mxu0 %v4182_v0  ;;  %v3732_v56 = vld [vmem:[#allocation14 + $0xc8] ss:$16 sps:$4 sm:$0xff]  }
 0x9e1   : > { %v2035_v13 = vpop.permute.xlu0 %2034 }
 0x9e2   : > { %3531 = vmatmul.mubr.msk.bf16.vlgmr.msra.gmra.mxu0 %vm1234_vm2, %v1926_v57  ;;  %v2052_v21 = vsel %vm2050_vm4, %v2046_v17, %v2035_v13  ;;  %v3737_v57 = vld [vmem:[#allocation14 + $0xa4] ss:$16 sps:$4 sm:$0xff]   ;;  %v3768_v13 = vld [vmem:[#allocation14 + $0x8] ss:$16 sps:$4 sm:$0xff]  }
 0x9e3   : > { %3556 = vmatprep.mubr.msk.bf16.mxu0 %vm4183_vm0, %v4182_v0  ;;  %3541 = vmatpush3.bf16.msra.mxu0 %v3715_v42  ;;  %v3741_v42 = vld [vmem:[#allocation14 + $0x80] ss:$16 sps:$4 sm:$0xff]  }
 0x9e4   : > { %3542 = vmatprep.subr.bf16.mxu0 %v4182_v0 }
 0x9e7   : > { %v3834_v18 = vpop.eup %3833  ;;  %3543 = vmatpush3.bf16.msra.mxu0 %v3716_v58  ;;  %v3743_v58 = vld [vmem:[#allocation14 + $0x84] ss:$16 sps:$4 sm:$0xff]  }
 0x9e8   : > { %v1925_v29 = vmul.f32 %v3834_v18, %v3830_v48  ;;  %3544 = vmatprep.subr.bf16.mxu0 %v4182_v0  ;;  %v3740_v18 = vld [vmem:[#allocation14 + $0xac] ss:$16 sps:$4 sm:$0xff]  }
 0x9ea   : > { %v1927_v39 = vpack.c.bf16 %v1925_v29, %v1925_v29  ;;  %v3735_v29 = vld [vmem:[#allocation14 + $0xa0] ss:$16 sps:$4 sm:$0xff]  }
 0x9eb   : > { %3545 = vmatpush3.bf16.msra.mxu0 %v3717_v59  ;;  %v3744_v59 = vld [vmem:[#allocation14 + $0x88] ss:$16 sps:$4 sm:$0xff]  }
 0x9ec   : > { %3537 = vmatmul.mubr.msk.bf16.vlgmr.msra.gmra.mxu1 %vm1234_vm2, %v1927_v39  ;;  %3546 = vmatprep.subr.bf16.mxu0 %v4182_v0  ;;  %v3738_v39 = vld [vmem:[#allocation14 + $0xa8] ss:$16 sps:$4 sm:$0xff]  }
 0x9ed   : > { %2439 = vmatpush1.bf16.msra.mxu1 %v3723_v43  ;;  %v3777_v43 = vld [vmem:[#allocation16 + $0x30] sm:$0xff]  }
 0x9ee   : > { %2440 = vmatprep.subr.bf16.mxu1 %v3731_v53  ;;  %v3789_v53 = vld [vmem:[#allocation16 + $0x18] sm:$0xff]  }
 0x9ef   : > { %3547 = vmatpush3.bf16.msra.mxu0 %v3718_v60  ;;  %v3746_v60 = vld [vmem:[#allocation14 + $0x8c] ss:$16 sps:$4 sm:$0xff]  }
 0x9f0   : > { %3548 = vmatprep.subr.bf16.mxu0 %v4182_v0 }
 0x9f1   : > { %2441 = vmatpush1.bf16.msra.mxu1 %v3729_v55  ;;  %v3791_v55 = vld [vmem:[#allocation16 + $0x50] sm:$0xff]  }
 0x9f2   : > { %2442 = vmatprep.subr.bf16.mxu1 %v3737_v57  ;;  %v3793_v57 = vld [vmem:[#allocation16 + $0x10] sm:$0xff]  }
 0x9f3   : > { %3549 = vmatpush3.bf16.msra.mxu0 %v3719_v61  ;;  %v3749_v61 = vld [vmem:[#allocation14 + $0x64] ss:$16 sps:$4 sm:$0xff]  }
 0x9f4   : > { %3550 = vmatprep.subr.bf16.mxu0 %v4182_v0 }
 0x9f5   : > { %2443 = vmatpush1.bf16.msra.mxu1 %v3735_v29  ;;  %v3795_v29 = vld [vmem:[#allocation16 + $0x48] sm:$0xff]  }
 0x9f6   : > { %2444 = vmatprep.subr.bf16.mxu1 %v3743_v58  ;;  %v3798_v58 = vld [vmem:[#allocation16 + $0x88] sm:$0xff]  }
 0x9f7   : > { %3551 = vmatpush3.bf16.msra.mxu0 %v3720_v62  ;;  %v3752_v62 = vld [vmem:[#allocation14 + $0x6c] ss:$16 sps:$4 sm:$0xff]  }
 0x9f8   : > { %3552 = vmatprep.subr.bf16.mxu0 %v4182_v0 }
 0x9f9   : > { %2445 = vmatpush1.bf16.msra.mxu1 %v3741_v42  ;;  %v3797_v42 = vld [vmem:[#allocation16 + $0x8] sm:$0xff]  }
 0x9fa   : > { %2446 = vmatprep.subr.bf16.mxu1 %v3749_v61  ;;  %v3801_v61 = vld [vmem:[#allocation16] sm:$0xff]  }
 0x9fb   : > { %3553 = vmatpush3.bf16.msra.mxu0 %v3721_v63  ;;  %v3747_v63 = vld [vmem:[#allocation14 + $0x60] ss:$16 sps:$4 sm:$0xff]  }
 0x9fc   : > { %3554 = vmatprep.subr.bf16.mxu0 %v4182_v0  ;;  %v2037_v0 = vpop.permute.xlu1 %2036 }
 0x9fd   : > { %v2054_v20 = vsel %vm2050_vm4, %v2049_v19, %v2037_v0  ;;  %2447 = vmatpush1.bf16.msra.mxu1 %v3747_v63  ;;  %v3771_v0 = vld [vmem:[#allocation16 + $0x78] sm:$0xff]   ;;  %v2258_v63 = vlaneseq }
 0x9ff   : > { %3555 = vmatpush3.bf16.msra.mxu0 %v3722_v1  ;;  %v3750_v1 = vld [vmem:[#allocation14 + $0x68] ss:$16 sps:$4 sm:$0xff]  }
 0xa00   : > { %2481 = vmatprep.subr.bf16.mxu0 %v3728_v46  ;;  %v3780_v46 = vld [vmem:[#allocation16 + $0xe8] sm:$0xff]  }
 0xaa2   : > { %v1970_v2 = vpop.f32.mrf.mxu0 }
 0xaa3   : > { %v2024_v3 = vpack.c.bf16 %v1970_v2, %v1970_v2  ;;  %v3755_v2 = vld [vmem:[#allocation14 + $0x44] ss:$16 sps:$4 sm:$0xff]  }
 0xaa4   : > { %v3532_v38 = vpop.f32.mrf.mxu0  ;;  %2448 = vmatprep.subr.bf16.mxu1 %v3755_v2 }
 0xaa5   : > { %2040 = vrot.lane.b32.xlu0 %v2024_v3, %s4184_s24  ;;  %v3758_v3 = vld [vmem:[#allocation14 + $0x4c] ss:$16 sps:$4 sm:$0xff]   ;;  %v4187_v38 = vmov 0  }
 0xaa6   : > { %v1973_v4 = vpop.f32.mrf.mxu0  ;;  %2470 = vmatprep.mubr.bf16.mxu1 %v4187_v38 }
 0xaa7   : > { %v3753_v4 = vld [vmem:[#allocation14 + $0x40] ss:$16 sps:$4 sm:$0xff]  }
 0xaa8   : > { %v3533_v5 = vpop.f32.mrf.mxu0  ;;  %2449 = vmatpush1.bf16.msra.mxu1 %v3753_v4 }
 0xaa9   : > { %v3756_v5 = vld [vmem:[#allocation14 + $0x48] ss:$16 sps:$4 sm:$0xff]  }
 0xaac   : > { %v2018_v6 = vpop.f32.mrf.mxu1 }
 0xaad   : > { %v2025_v7 = vpack.c.bf16 %v2018_v6, %v2018_v6  ;;  %v3761_v6 = vld [vmem:[#allocation14 + $0x24] ss:$16 sps:$4 sm:$0xff]  }
 0xaae   : > { %v3538_v8 = vpop.f32.mrf.mxu1  ;;  %2450 = vmatprep.subr.bf16.mxu1 %v3761_v6 }
 0xaaf   : > { %2042 = vrot.lane.b32.xlu1 %v2025_v7, %s4184_s24  ;;  %v3764_v7 = vld [vmem:[#allocation14 + $0x2c] ss:$16 sps:$4 sm:$0xff]   ;;  %v3759_v8 = vld [vmem:[#allocation14 + $0x20] ss:$16 sps:$4 sm:$0xff]  }
 0xab0   : > { %v2021_v9 = vpop.f32.mrf.mxu1  ;;  %2451 = vmatpush1.bf16.msra.mxu1 %v3759_v8 }
 0xab1   : > { %v3762_v9 = vld [vmem:[#allocation14 + $0x28] ss:$16 sps:$4 sm:$0xff]  }
 0xab2   : > { %v3539_v10 = vpop.f32.mrf.mxu1 }
 0xab3   : > { %v3767_v10 = vld [vmem:[#allocation14 + $0x4] ss:$16 sps:$4 sm:$0xff]  }
 0xab4   : > { %2452 = vmatprep.subr.bf16.mxu1 %v3767_v10 }
 0xab5   : > { %2453 = vmatpush1.bf16.msra.mxu1 %v3765_v12 }
 0xab6   : > { %3340 = vmatprep.subr.bf16.mxu1 %v3771_v0 }
 0xb17   : > { %v2041_v16 = vpop.permute.xlu0 %2040 }
 0xb18   : > { %v2057_v24 = vsel %vm2055_vm5, %v2052_v21, %v2041_v16 }
 0xb21   : > { %v2043_v22 = vpop.permute.xlu1 %2042 }
 0xb22   : > { %v2059_v25 = vsel %vm2055_vm5, %v2054_v20, %v2043_v22 }
 0xb23   : > { %v3184_v26 = vcombine.low %v2057_v24, %v2059_v25  ;;  %v3194_v25 = vld [vmem:[%s4925_s15] ss:$0 sm:$0xff] }
 0xb25   : > { %3557 = vmatmul.mubr.bf16.vlgmr.msra.gmra.mxu0 %v3184_v26 }
 0xb26   : > { %2482 = vmatpush1.bf16.msra.mxu0 %v3726_v23  ;;  %2513 = vmatprep.mubr.bf16.mxu0 %v4187_v38  ;;  %v3779_v23 = vld [vmem:[#allocation16 + $0x68] sm:$0xff]  }
 0xb27   : > { %2483 = vmatprep.subr.bf16.mxu0 %v3734_v54  ;;  %v3790_v54 = vld [vmem:[#allocation16 + $0x98] sm:$0xff]  }
 0xb2a   : > { %2484 = vmatpush1.bf16.msra.mxu0 %v3732_v56  ;;  %v3792_v56 = vld [vmem:[#allocation16 + $0xd0] sm:$0xff]  }
 0xb2b   : > { %2485 = vmatprep.subr.bf16.mxu0 %v3740_v18  ;;  %v3794_v18 = vld [vmem:[#allocation16 + $0x90] sm:$0xff]  }
 0xb2e   : > { %2486 = vmatpush1.bf16.msra.mxu0 %v3738_v39  ;;  %v3796_v39 = vld [vmem:[#allocation16 + $0xc8] sm:$0xff]  }
 0xb2f   : > { %2487 = vmatprep.subr.bf16.mxu0 %v3746_v60  ;;  %v3800_v60 = vld [vmem:[#allocation16 + $0xc0] sm:$0xff]  }
 0xb32   : > { %2488 = vmatpush1.bf16.msra.mxu0 %v3744_v59  ;;  %v3799_v59 = vld [vmem:[#allocation16 + $0x40] sm:$0xff]  }
 0xb33   : > { %2489 = vmatprep.subr.bf16.mxu0 %v3752_v62  ;;  %v3802_v62 = vld [vmem:[#allocation16 + $0x80] sm:$0xff]  }
 0xb36   : > { %2490 = vmatpush1.bf16.msra.mxu0 %v3750_v1  ;;  %v2259_v1 = vshrl.u32 %v2258_v63, 7 }
 0xb37   : > { %2491 = vmatprep.subr.bf16.mxu0 %v3758_v3 }
 0xb38   : > { %v2264_v2 = vsub.s32 1, %v2259_v1  ;;  %v2272_v3 = vsub.s32 3, %v2259_v1  ;;  %v2260_v38 = vsub.s32 0, %v2259_v1  ;;  %v2268_v4 = vsub.s32 2, %v2259_v1 }
 0xb3a   : > { %2492 = vmatpush1.bf16.msra.mxu0 %v3756_v5  ;;  %v2256_v5 = vld [vmem:[%s5011_s27] sm:$0xf]  ;;  %s2926_s27 = scalar_lea.sflag [#allocation4], %s4555_s5 }
 0xb3b   : > { %2493 = vmatprep.subr.bf16.mxu0 %v3764_v7  ;;  %v2265_v8 = vrot.slane %v2256_v5, %v2264_v2  ;;  %v2261_v10 = vrot.slane %v2256_v5, %v2260_v38 }
 0xb3e   : > { %2494 = vmatpush1.bf16.msra.mxu0 %v3762_v9  ;;  %v2273_v9 = vrot.slane %v2256_v5, %v2272_v3 }
 0xb3f   : > { %2495 = vmatprep.subr.bf16.mxu0 %v3770_v11  ;;  %v2269_v11 = vrot.slane %v2256_v5, %v2268_v4 }
 0xb42   : > { %2496 = vmatpush1.bf16.msra.mxu0 %v3768_v13 }
 0xb43   : > { %3362 = vmatprep.subr.bf16.mxu0 %v3772_v14 }
 0xbe5   : > { %v2164_v37 = vpop.f32.mrf.mxu0 }
 0xbe6   : > { %v2171_v30 = vadd.f32 %v3843_v28, %v2164_v37  ;;  %v3195_v28 = vld [vmem:[%s5010_s23] ss:$0 sm:$0xff] }
 0xbe7   : > { %v3558_v31 = vpop.f32.mrf.mxu0 }
 0xbe8   : > { %v2180_v32 = vadd.f32 %v3193_v44, %v2171_v30 }
 0xbe9   : > { %v2167_v33 = vpop.f32.mrf.mxu0 }
 0xbea   : > { %v2172_v36 = vadd.f32 %v3844_v34, %v2167_v33  ;;  %2182 = vadd.xlane.f32.xlu0 %v2180_v32  ;;  %v3773_v33 = vld [vmem:[#allocation16 + $0x38] sm:$0xff]  }
 0xbeb   : > { %v3559_v40 = vpop.f32.mrf.mxu0  ;;  %v3774_v34 = vld [vmem:[#allocation16 + $0xb8] sm:$0xff]  }
 0xbec   : > { %v2181_v41 = vadd.f32 %v3193_v44, %v2172_v36  ;;  %v3775_v40 = vld [vmem:[#allocation16 + $0x70] sm:$0xff]  }
 0xbee   : > { %2184 = vadd.xlane.f32.xlu1 %v2181_v41 }
 0xc73   : > { %v2183_v27 = vpop.xlane.xlu0 %2182 }
 0xc74   : > { %v2187_v47 = vmul.f32 0.0078125, %v2183_v27  ;;  %v3781_v27 = vld [vmem:[#allocation16 + $0x28] sm:$0xff]  }
 0xc76   : > { %v4825_v35 = vsub.f32 %v2180_v32, %v2187_v47  ;;  %v3782_v47 = vld [vmem:[#allocation16 + $0xa8] sm:$0xff]  }
 0xc77   : > { %v2185_v48 = vpop.xlane.xlu1 %2184 }
 0xc78   : > { %v2188_v49 = vmul.f32 0.0078125, %v2185_v48  ;;  %v2191_v50 = vmul.f32 %v4825_v35, %v4825_v35  ;;  %v3784_v48 = vld [vmem:[#allocation16 + $0xe0] sm:$0xff]  }
 0xc7a   : > { %v4829_v51 = vsub.f32 %v2181_v41, %v2188_v49  ;;  %2193 = vadd.xlane.f32.xlu0 %v2191_v50  ;;  %v3776_v41 = vld [vmem:[#allocation16 + $0xf0] sm:$0xff]   ;;  %v3785_v49 = vld [vmem:[#allocation16 + $0x20] sm:$0xff]  }
 0xc7b   : > { %v3786_v50 = vld [vmem:[#allocation16 + $0xa0] sm:$0xff]  }
 0xc7c   : > { %v2192_v52 = vmul.f32 %v4829_v51, %v4829_v51 }
 0xc7e   : > { %2195 = vadd.xlane.f32.xlu0 %v2192_v52  ;;  %v3788_v52 = vld [vmem:[#allocation16 + $0xd8] sm:$0xff]  }
 0xd03   : > { %v2194_v15 = vpop.xlane.xlu0 %2193 }
 0xd04   : > { %v2197_v16 = vmul.f32 0.0078125, %v2194_v15 }
 0xd06   : > { %v2199_v17 = vadd.f32 1e-05, %v2197_v16 }
 0xd07   : > { %v2196_v19 = vpop.xlane.xlu0 %2195 }
 0xd08   : > { %3835 = vrsqrt.f32 %v2199_v17  ;;  %v2198_v20 = vmul.f32 0.0078125, %v2196_v19 }
 0xd0a   : > { %v2200_v21 = vadd.f32 1e-05, %v2198_v20 }
 0xd0c   : > { %3837 = vrsqrt.f32 %v2200_v21 }
 0xd15   : > { %v3836_v22 = vpop.eup %3835 }
 0xd16   : > { %v2203_v24 = vmul.f32 %v3836_v22, %v4825_v35  ;;  %v3783_v35 = vld [vmem:[#allocation16 + $0x60] sm:$0xff]  }
 0xd18   : > { %v2212_v44 = vmul.f32 %v3194_v25, %v2203_v24 }
 0xd19   : > { %v3838_v26 = vpop.eup %3837 }
 0xd1a   : > { %v2204_v37 = vmul.f32 %v3838_v26, %v4829_v51  ;;  %v4841_v31 = vadd.f32 %v3195_v28, %v2212_v44  ;;  %v3787_v51 = vld [vmem:[#allocation16 + $0x58] sm:$0xff]  }
 0xd1c   : > { %v2213_v30 = vmul.f32 %v3194_v25, %v2204_v37 }
 0xd1e   : > { %v4843_v32 = vadd.f32 %v3195_v28, %v2213_v30 }
 0xd20   : > { %v2223_v36 = vpack.c.bf16 %v4843_v32, %v4841_v31 }
 0xd22   : > { %2471 = vmatmul.mubr.bf16.vlgmr.msra.gmra.mxu1 %v2223_v36  ;;  %2514 = vmatmul.mubr.bf16.vlgmr.msra.gmra.mxu0 %v2223_v36 }
 0xd23   : > { %3341 = vmatpush3.bf16.msra.mxu1 %v3773_v33  ;;  %3363 = vmatpush3.bf16.msra.mxu0 %v3774_v34 }
 0xd24   : > { %3342 = vmatprep.subr.bf16.mxu1 %v3775_v40  ;;  %3364 = vmatprep.subr.bf16.mxu0 %v3776_v41 }
 0xd27   : > { %3343 = vmatpush3.bf16.msra.mxu1 %v3777_v43  ;;  %3365 = vmatpush3.bf16.msra.mxu0 %v3778_v45 }
 0xd28   : > { %3344 = vmatprep.subr.bf16.mxu1 %v3779_v23  ;;  %3366 = vmatprep.subr.bf16.mxu0 %v3780_v46 }
 0xd2b   : > { %3345 = vmatpush3.bf16.msra.mxu1 %v3781_v27  ;;  %3367 = vmatpush3.bf16.msra.mxu0 %v3782_v47  ;;  %v3228_v47 = vld [vmem:[%s5012_s3] ss:$0 sm:$0xff] }
 0xd2c   : > { %3346 = vmatprep.subr.bf16.mxu1 %v3783_v35  ;;  %3368 = vmatprep.subr.bf16.mxu0 %v3784_v48 }
 0xd2f   : > { %3347 = vmatpush3.bf16.msra.mxu1 %v3785_v49  ;;  %3369 = vmatpush3.bf16.msra.mxu0 %v3786_v50 }
 0xd30   : > { %3348 = vmatprep.subr.bf16.mxu1 %v3787_v51  ;;  %3370 = vmatprep.subr.bf16.mxu0 %v3788_v52 }
 0xd33   : > { %3349 = vmatpush3.bf16.msra.mxu1 %v3789_v53  ;;  %3371 = vmatpush3.bf16.msra.mxu0 %v3790_v54 }
 0xd34   : > { %3350 = vmatprep.subr.bf16.mxu1 %v3791_v55  ;;  %3372 = vmatprep.subr.bf16.mxu0 %v3792_v56 }
 0xd37   : > { %3351 = vmatpush3.bf16.msra.mxu1 %v3793_v57  ;;  %3373 = vmatpush3.bf16.msra.mxu0 %v3794_v18 }
 0xd38   : > { %3352 = vmatprep.subr.bf16.mxu1 %v3795_v29  ;;  %3374 = vmatprep.subr.bf16.mxu0 %v3796_v39 }
 0xd3b   : > { %3353 = vmatpush3.bf16.msra.mxu1 %v3797_v42  ;;  %3375 = vmatpush3.bf16.msra.mxu0 %v3798_v58 }
 0xd3c   : > { %3354 = vmatprep.subr.bf16.mxu1 %v3799_v59  ;;  %3376 = vmatprep.subr.bf16.mxu0 %v3800_v60 }
 0xd3f   : > { %3355 = vmatpush3.bf16.msra.mxu1 %v3801_v61  ;;  %3377 = vmatpush3.bf16.msra.mxu0 %v3802_v62 }
 0xde2   : > { %v2472_v6 = vpop.f32.mrf.mxu1  ;;  %v2515_v7 = vpop.f32.mrf.mxu0 }
 0xde3   : > { %v2473_v20 = vadd.f32 %v2472_v6, %v2261_v10  ;;  %v2516_v21 = vadd.f32 %v2515_v7, %v2269_v11 }
 0xde4   : > { %v2474_v12 = vpop.f32.mrf.mxu1  ;;  %v2517_v13 = vpop.f32.mrf.mxu0 }
 0xde5   : > { %v2475_v15 = vadd.f32 %v2474_v12, %v2265_v8  ;;  %v2518_v16 = vadd.f32 %v2517_v13, %v2273_v9  ;;  %v2524_v36 = vmax.f32 %v2473_v20, 0.0  ;;  %v2526_v40 = vmax.f32 %v2516_v21, 0.0 }
 0xde6   : > { %v2476_v0 = vpop.f32.mrf.mxu1  ;;  %v2519_v14 = vpop.f32.mrf.mxu0 }
 0xde7   : > { %v2477_v17 = vadd.f32 %v2476_v0, %v2261_v10  ;;  %v2520_v19 = vadd.f32 %v2519_v14, %v2269_v11  ;;  %v2525_v28 = vmax.f32 %v2475_v15, 0.0  ;;  %v2527_v30 = vmax.f32 %v2518_v16, 0.0  ;;  %v3262_v10 = vld [vmem:[%s5014_s26] ss:$0 sm:$0xff] }
 0xde8   : > { %v2478_v22 = vpop.f32.mrf.mxu1  ;;  %v2521_v24 = vpop.f32.mrf.mxu0 }
 0xde9   : > { %v2479_v25 = vadd.f32 %v2478_v22, %v2265_v8  ;;  %v2522_v26 = vadd.f32 %v2521_v24, %v2273_v9  ;;  %v2528_v37 = vmax.f32 %v2477_v17, 0.0  ;;  %v2530_v44 = vmax.f32 %v2520_v19, 0.0  ;;  %v3261_v8 = vld [vmem:[%s5013_s17] ss:$0 sm:$0xff] }
 0xdeb   : > { %v2529_v33 = vmax.f32 %v2479_v25, 0.0  ;;  %v2531_v34 = vmax.f32 %v2522_v26, 0.0  ;;  %v2532_v45 = vpack.c.bf16 %v2528_v37, %v2524_v36  ;;  %v2534_v23 = vpack.c.bf16 %v2530_v44, %v2526_v40 }
 0xded   : > { %v2533_v41 = vpack.c.bf16 %v2529_v33, %v2525_v28  ;;  %v2535_v43 = vpack.c.bf16 %v2531_v34, %v2527_v30 }
 0xdef   : > { %2831 = vmatprep.mubr.bf16.mxu1 %v2533_v41  ;;  %2872 = vmatprep.mubr.bf16.mxu0 %v2535_v43 }
 0xdf0   : > { %2832 = vmatmul.mubr.bf16.vlgmr.msra.gmra.mxu1 %v2532_v45  ;;  %2873 = vmatmul.mubr.bf16.vlgmr.msra.gmra.mxu0 %v2534_v23 }
 0xeb0   : > { %v3356_v46 = vpop.f32.mrf.mxu1  ;;  %v3378_v27 = vpop.f32.mrf.mxu0 }
 0xeb2   : > { %v3357_v35 = vpop.f32.mrf.mxu1  ;;  %v3379_v48 = vpop.f32.mrf.mxu0 }
 0xeb3   : > { %v3358_v49 = vadd.f32 %v3357_v35, %v3356_v46  ;;  %v3380_v53 = vadd.f32 %v3379_v48, %v3378_v27 }
 0xeb4   : > { %v3359_v50 = vpop.f32.mrf.mxu1  ;;  %v3381_v51 = vpop.f32.mrf.mxu0 }
 0xeb5   : > { %v2834_v52 = vadd.f32 %v3358_v49, %v3228_v47 }
 0xeb6   : > { %v3360_v54 = vpop.f32.mrf.mxu1  ;;  %v3382_v55 = vpop.f32.mrf.mxu0 }
 0xeb7   : > { %v2875_v56 = vadd.f32 %v3380_v53, %v2834_v52  ;;  %v3361_v57 = vadd.f32 %v3360_v54, %v3359_v50  ;;  %v3383_v29 = vadd.f32 %v3382_v55, %v3381_v51 }
 0xeb9   : > { %v2837_v18 = vadd.f32 %v3361_v57, %v3228_v47  ;;  %v2881_v39 = vadd.f32 %v2875_v56, %v4841_v31 }
 0xebb   : > { %v2878_v42 = vadd.f32 %v3383_v29, %v2837_v18  ;;  %2883 = vadd.xlane.f32.xlu0 %v2881_v39 }
 0xebd   : > { %v2882_v58 = vadd.f32 %v2878_v42, %v4843_v32 }
 0xebf   : > { %2885 = vadd.xlane.f32.xlu1 %v2882_v58 }
 0xf44   : > { %v2884_v59 = vpop.xlane.xlu0 %2883 }
 0xf45   : > { %v2887_v60 = vmul.f32 0.0078125, %v2884_v59 }
 0xf47   : > { %v2889_v61 = vsub.f32 %v2881_v39, %v2887_v60 }
 0xf48   : > { %v2886_v62 = vpop.xlane.xlu1 %2885 }
 0xf49   : > { %v2888_v63 = vmul.f32 0.0078125, %v2886_v62  ;;  %v2891_v1 = vmul.f32 %v2889_v61, %v2889_v61 }
 0xf4b   : > { %v2890_v2 = vsub.f32 %v2882_v58, %v2888_v63  ;;  %2893 = vadd.xlane.f32.xlu0 %v2891_v1 }
 0xf4d   : > { %v2892_v3 = vmul.f32 %v2890_v2, %v2890_v2 }
 0xf4f   : > { %2895 = vadd.xlane.f32.xlu1 %v2892_v3 }
 0xfd4   : > { %v2894_v38 = vpop.xlane.xlu0 %2893 }
 0xfd5   : > { %v2897_v4 = vmul.f32 0.0078125, %v2894_v38 }
 0xfd7   : > { %v2899_v31 = vadd.f32 1e-05, %v2897_v4 }
 0xfd8   : > { %v2896_v5 = vpop.xlane.xlu1 %2895 }
 0xfd9   : > { %3839 = vrsqrt.f32 %v2899_v31  ;;  %v2898_v6 = vmul.f32 0.0078125, %v2896_v5 }
 0xfdb   : > { %v2900_v32 = vadd.f32 1e-05, %v2898_v6 }
 0xfdd   : > { %3841 = vrsqrt.f32 %v2900_v32 }
 0xfe6   : > { %v3840_v7 = vpop.eup %3839 }
 0xfe7   : > { %v2903_v9 = vmul.f32 %v3840_v7, %v2889_v61 }
 0xfe9   : > { %v2912_v11 = vmul.f32 %v3261_v8, %v2903_v9 }
 0xfea   : > { %v3842_v12 = vpop.eup %3841 }
 0xfeb   : > { %v2921_v13 = vadd.f32 %v3262_v10, %v2912_v11  ;;  %v2904_v0 = vmul.f32 %v3842_v12, %v2890_v2 }
 0xfed   : > { %v2913_v14 = vmul.f32 %v3261_v8, %v2904_v0  ;;  %2923 = vst [vmem:[%s784_s14] sm:$0xff] %v2921_v13 }
 0xfef   : > { %v2922_v15 = vadd.f32 %v3262_v10, %v2913_v14 }
 0xff1   : > { %2924 = vst [vmem:[%s784_s14 + $0x8] sm:$0xff] %v2922_v15 }
 0xff2   : > { %4098 = shalt.err (!%p4095_p0)
}
 0xff3   : > { %s4099_s3 = scalar_lea.hbm %s4866_s29, 256  ;;  %s4103_s17 = scalar_lea.hbm %s5016_s16, 1024 }
 0xff4   : > { %p4100_p9 = scmp.ne.s32.totalorder %s4866_s29, %s4099_s3  ;;  %p4104_p13 = scmp.lt.s32.totalorder %s4866_s29, %s5016_s16 }
 0xff5   : > { %p4105_p7 = scmp.lt.s32.totalorder %s4103_s17, %s4099_s3 }
 0xff6   : > { %p4101_p2 = pnand %p4100_p9, %p5017_p1 }
 0xff7   : > { %p4106_p8 = por %p4105_p7, %p4104_p13 }
 0xff8   : > { %p4102_p12 = pneg %p4101_p2 }
 0xffa   : > { %p4107_p11 = pnand %p4106_p8, %p4102_p12 }
 0xffc   : > { %4110 = shalt.err (!%p4107_p11)
}
 0xffd   : > { %s4189_s26 = smov 128   ;;  %s4190_s7 = smov 8  }
 0xffe   : > { %3590 = dma.vmem_to_hbm [thread:$0]  (%p5017_p1), %s4868_s18, 256, %s4866_s29, %s2926_s27, %s4189_s26, %s4189_s26, %s4190_s7  }
 0xfff PF: > { %s5018_s14 = sld [smem:[#allocation25_spill]] }
0x1000   : > { %s5019_s0 = sld [smem:[#allocation24_spill]] }
0x1001   : > { %s5020_s23 = sld [smem:[#allocation29_spill]] }
0x1005   : > { %p3638_p3 = scmp.ge.s32.totalorder %s5018_s14, 2 }
0x1006   : > { %s2954_s22 = sand.u32 1, %s5019_s0  }
0x1007   : > { %p5021_p5 = scmp.ne.s32.totalorder %s5020_s23, 0  ;;  %s2955_s2 = scalar_lea.sflag [#allocation4], %s2954_s22 }
0x1009   : > { %p3622_p6 = pnand %p3638_p3, %p5021_p5 }
0x100b   : > { %p3623_p4 = pneg %p3622_p6 }
0x100d   : > { %4148 = dma.done.wait (%p3623_p4), %s2955_s2, 256  }
0x100e   : > { %4150 = vsyncadd (%p3623_p4), %s2955_s2, 4294967040  ;;  %s5022_s21 = sld [smem:[#allocation26_spill]]  ;;  %s5024_s0 = smov %s4157_s30 }
0x100f   : > { %s5023_s9 = sld [smem:[#allocation27_spill]]  ;;  %s5025_s30 = smov %s4161_s20 }
0x1014   : > { %p38_p10 = scmp.ge.s32.totalorder %s5022_s21, 6  }
0x1015   : > { %s5026_s20 = smov %s5023_s9 }
0x1016   :  { %40 = sbr.rel (!%p38_p10) target bundleno = 25 (0x19), region = 189 }
0x101b   :  { %2960 = vsyncpa [#allocation3], 1 }
0x101c   :  { %2962 = vsyncpa [#allocation3 + $0x1], 1 }
0x101d   :  { %2963 = vsyncpa [#allocation6], 1 }
0x101e   :  { %2965 = vsyncpa [#allocation6 + $0x1], 1 }
0x101f   :  { %2966 = vsyncpa [#allocation9], 1 }
0x1020   :  { %2967 = vsyncpa [#allocation12], 1 }
0x1021   :  { %2968 = vsyncpa [#allocation15], 1 }
0x1022   :  { %2969 = vsyncpa [#allocation4], 1 }
0x1023   :  { %2971 = vsyncpa [#allocation4 + $0x1], 1 }

// kernel: tpu_custom_call.1
= control target key start
LH: loop header
LB: loop body
LE: loop exit
PB: predicated region body
PF: predicated region fallthrough
CT: control target
= control target key end

     0   :  { %s4910_s0 = inlined_call_operand.hbm [shape: f32[64,128], index: 0, kind: input, shape index: {}]   ;;  %s4911_s1 = inlined_call_operand.hbm [shape: f32[64,128], index: 1, kind: input, shape index: {}]   ;;  %s4912_s2 = inlined_call_operand.hbm [shape: f32[64,128], index: 2, kind: input, shape index: {}]   ;;  %s4913_s3 = inlined_call_operand.hbm [shape: bf16[128,128], index: 3, kind: input, shape index: {}]   ;;  %s4914_s4 = inlined_call_operand.vmem [shape: f32[1,128], index: 4, kind: input, shape index: {}]   ;;  %s4915_s5 = inlined_call_operand.hbm [shape: bf16[128,128], index: 5, kind: input, shape index: {}]   ;;  %s4916_s6 = inlined_call_operand.vmem [shape: f32[1,128], index: 6, kind: input, shape index: {}]   ;;  %s4917_s7 = inlined_call_operand.hbm [shape: bf16[128,128], index: 7, kind: input, shape index: {}]   ;;  %s4918_s8 = inlined_call_operand.vmem [shape: f32[1,128], index: 8, kind: input, shape index: {}]   ;;  %s4919_s9 = inlined_call_operand.hbm [shape: bf16[128,128], index: 9, kind: input, shape index: {}]   ;;  %s4920_s10 = inlined_call_operand.vmem [shape: f32[1,128], index: 10, kind: input, shape index: {}]   ;;  %s4921_s11 = inlined_call_operand.hbm [shape: bf16[128,512], index: 11, kind: input, shape index: {}]   ;;  %s4922_s12 = inlined_call_operand.vmem [shape: f32[1,512], index: 12, kind: input, shape index: {}]   ;;  %s4923_s13 = inlined_call_operand.hbm [shape: bf16[512,128], index: 13, kind: input, shape index: {}]   ;;  %s4924_s14 = inlined_call_operand.vmem [shape: f32[1,128], index: 14, kind: input, shape index: {}]   ;;  %s4925_s15 = inlined_call_operand.vmem [shape: f32[1,128], index: 15, kind: input, shape index: {}]   ;;  %s4926_s16 = inlined_call_operand.vmem [shape: f32[1,128], index: 16, kind: input, shape index: {}]   ;;  %s4927_s17 = inlined_call_operand.vmem [shape: f32[1,128], index: 17, kind: input, shape index: {}]   ;;  %s4928_s18 = inlined_call_operand.vmem [shape: f32[1,128], index: 18, kind: input, shape index: {}]   ;;  %s4929_s19 = inlined_call_operand.hbm [shape: f32[64,128], index: 19, kind: output, shape index: {}]  }
   0x1   :  { %4959 = sst [smem:[#allocation30_spill]] %s4910_s0 }
   0x2   :  { %4960 = sst [smem:[#allocation31_spill]] %s4911_s1 }
   0x3   :  { %4961 = sst [smem:[#allocation32_spill]] %s4912_s2 }
   0x4   :  { %4962 = sst [smem:[#allocation33_spill]] %s4913_s3 }
   0x5   :  { %4963 = sst [smem:[#allocation34_spill]] %s4915_s5 }
   0x6   :  { %4964 = sst [smem:[#allocation35_spill]] %s4917_s7 }
   0x7   :  { %4965 = sst [smem:[#allocation36_spill]] %s4919_s9 }
   0x8   :  { %4966 = sst [smem:[#allocation37_spill]] %s4921_s11 }
   0x9   :  { %4967 = sst [smem:[#allocation38_spill]] %s4922_s12 }
   0xa   :  { %4968 = sst [smem:[#allocation39_spill]] %s4924_s14 }
   0xb   :  { %4969 = sst [smem:[#allocation40_spill]] %s4926_s16 }
   0xc   :  { %4970 = sst [smem:[#allocation41_spill]] %s4927_s17 }
   0xd   :  { %4971 = sst [smem:[#allocation42_spill]] %s4928_s18 }
   0xe   :  { %4972 = sst [smem:[#allocation43_spill]] %s4929_s19 }
   0xf   :  { %24 = vsyncpa [#allocation3], 0 }
  0x10   :  { %26 = vsyncpa [#allocation3 + $0x1], 0 }
  0x11   :  { %27 = vsyncpa [#allocation6], 0 }
  0x12   :  { %29 = vsyncpa [#allocation6 + $0x1], 0 }
  0x13   :  { %30 = vsyncpa [#allocation9], 0 }
  0x14   :  { %31 = vsyncpa [#allocation12], 0 }
  0x15   :  { %32 = vsyncpa [#allocation15], 0 }
  0x16   :  { %33 = vsyncpa [#allocation4], 0 }
  0x17   :  { %35 = vsyncpa [#allocation4 + $0x1], 0  ;;  %s4291_s0 = smov 0   ;;  %s4293_s30 = smov 0  }
  0x18   :  { %s4295_s20 = smov 0   ;;  %s4297_s21 = smov 0  }
  0x19 LB: > { %4973 = sst [smem:[#allocation24_spill]] %s4153_s0  ;;  %s4167_s1 = smov [#allocation8]   ;;  %s4165_s21 = sphi %s4297_s21, %s5022_s21   ;;  %s4161_s20 = sphi %s4295_s20, %s5026_s20   ;;  %s4157_s30 = sphi %s4293_s30, %s5025_s30   ;;  %s4153_s0 = sphi %s4291_s0, %s5024_s0  }
  0x1a   : > { %4974 = sst [smem:[#allocation25_spill]] %s4165_s21  ;;  %s498_s22 = sshll.u32 %s4167_s1, 4  ;;  %s499_s22 = int_to_ptr.vmem [resolvable:$true] %s498_s22 }
  0x1b   : > { %s4312_s2 = sadd.s32 4294967295, %s4165_s21   ;;  %p3113_p0 = scmp.ge.s32.totalorder %s4165_s21, 1 }
  0x1c   : > { %p4947_p1 = scmp.eq.s32.totalorder %s4312_s2, 0  ;;  %p486_p2 = scmp.lt.s32.totalorder %s4165_s21, 5 }
  0x1d   : > { %s4168_s24 = smov [#allocation11]   ;;  %s4169_s26 = smov [#allocation14]  }
  0x1e   : > { %p4317_p3 = pnand %p3113_p0, %p486_p2  ;;  %s530_s25 = sshll.u32 %s4168_s24, 4  ;;  %s4329_s25 = int_to_ptr.vmem [resolvable:$true] %s530_s25 }
  0x1f   : > { %s562_s27 = sshll.u32 %s4169_s26, 4  ;;  %s3856_s29 = scalar_lea.vmem %s499_s22, 1024  ;;  %s4331_s27 = int_to_ptr.vmem [resolvable:$true] %s562_s27 }
  0x20   : > { %s4975_s23 = scalar_select %p4317_p3, 1, 0 }
  0x21   : > { %p3592_p4 = pneg %p4317_p3  ;;  %p3857_p7 = scmp.ne.s32.totalorder %s499_s22, %s3856_s29 }
  0x22   : > { %p3864_p10 = scmp.lt.s32.totalorder %s499_s22, %s499_s22  ;;  %p3865_p11 = scmp.lt.s32.totalorder %s3856_s29, %s3856_s29 }
  0x23   : > { %p4325_p5 = pnand %p3592_p4, %p4947_p1 }
  0x24   : > { %p3866_p12 = por %p3865_p11, %p3864_p10 }
  0x25   : > { %s4976_s3 = scalar_select %p4325_p5, 1, 0 }
  0x26   : > { %p4335_p6 = pneg %p4325_p5 }
  0x28   : > { %s4977_s28 = scalar_select %p4335_p6, 1, 0 }
  0x29   : > { %p3859_p8 = pnand %p3857_p7, %p4335_p6 }
  0x2b   : > { %p3860_p9 = pneg %p3859_p8 }
  0x2d   : > { %p3867_p13 = pnand %p3866_p12, %p3860_p9 }
  0x2f   : > { %3870 = shalt.err (!%p3867_p13)
}
  0x30   : > { %s4934_s1 = smov 64   ;;  %s4936_s24 = smov 4  }
  0x31   : > { %s4978_s18 = sld [smem:[#allocation33_spill]]  ;;  %s3882_s17 = scalar_lea.vmem %s4329_s25, 1024 }
  0x32   : > { %p3883_p0 = scmp.ne.s32.totalorder %s4329_s25, %s3882_s17  ;;  %p3890_p7 = scmp.lt.s32.totalorder %s4329_s25, %s4329_s25 }
  0x33   : > { %p3891_p8 = scmp.lt.s32.totalorder %s3882_s17, %s3882_s17 }
  0x34   : > { %p3885_p2 = pnand %p3883_p0, %p4335_p6 }
  0x35   : > { %p3892_p9 = por %p3891_p8, %p3890_p7 }
  0x36   : > { %p3886_p4 = pneg %p3885_p2 }
  0x37   : > { %3595 = dma.hbm_to_vmem [thread:$0]  (!%p4325_p5), %s4978_s18, 1024, %s499_s22, [#allocation9], %s4934_s1, %s4934_s1, %s4936_s24  }
  0x38   : > { %p3893_p10 = pnand %p3892_p9, %p3886_p4 }
  0x3a   : > { %3896 = shalt.err (!%p3893_p10)
}
  0x3b   : > { %s4979_s7 = sld [smem:[#allocation35_spill]]  ;;  %s3908_s18 = scalar_lea.vmem %s4331_s27, 4096 }
  0x3c   : > { %p3909_p11 = scmp.ne.s32.totalorder %s4331_s27, %s3908_s18  ;;  %p3916_p0 = scmp.lt.s32.totalorder %s4331_s27, %s4331_s27 }
  0x3d   : > { %p3917_p2 = scmp.lt.s32.totalorder %s3908_s18, %s3908_s18 }
  0x3e   : > { %p3911_p12 = pnand %p3909_p11, %p4335_p6 }
  0x3f   : > { %p3918_p4 = por %p3917_p2, %p3916_p0 }
  0x40   : > { %p3912_p13 = pneg %p3911_p12 }
  0x41   : > { %3601 = dma.hbm_to_vmem [thread:$0]  (!%p4325_p5), %s4979_s7, 1024, %s4329_s25, [#allocation12], %s4934_s1, %s4934_s1, %s4936_s24  }
  0x42   : > { %p3919_p7 = pnand %p3918_p4, %p3912_p13 }
  0x44   : > { %3922 = shalt.err (!%p3919_p7)
}
  0x45   : > { %s4172_s17 = smov 256   ;;  %s4173_s22 = smov 16  }
  0x46   : > { %s4980_s11 = sld [smem:[#allocation37_spill]]  ;;  %s3112_s29 = sadd.s32 4294967294, %s4165_s21  }
  0x47   : > { %s4378_s19 = sadd.s32 1, %s4165_s21   ;;  %s48_s18 = sadd.s32 1, %s4161_s20 }
  0x48   : > { %4981 = sst [smem:[#allocation26_spill]] %s4378_s19  ;;  %s45_s1 = ssub.s32 %s4165_s21, %s4378_s19 }
  0x49   : > { %p55_p8 = scmp.ne.s32.totalorder %s4161_s20, %s4157_s30  ;;  %p46_p9 = scmp.eq.s32.totalorder %s45_s1, 0 }
  0x4a   : > { %p56_p10 = scmp.eq.s32.totalorder %s4165_s21, 0  ;;  %p61_p11 = scmp.ne.s32.totalorder %s4157_s30, %s4153_s0 }
  0x4b   : > { %p473_p12 = scmp.eq.s32.totalorder %s4312_s2, 3  ;;  %p479_p4 = scmp.eq.s32.totalorder %s3112_s29, 3 }
  0x4c   : > { %3607 = dma.hbm_to_vmem [thread:$0]  (!%p4325_p5), %s4980_s11, 4096, %s4331_s27, [#allocation15], %s4172_s17, %s4172_s17, %s4173_s22  }
  0x4d   : > { %s4390_s24 = scalar_select %p46_p9, %s4161_s20, %s48_s18  }
  0x4e   : > { %p57_p13 = por %p56_p10, %p55_p8  ;;  %p4394_p0 = por %p4947_p1, %p61_p11 }
  0x4f   : > { %4982 = sst [smem:[#allocation27_spill]] %s4390_s24  ;;  %p4398_p2 = por %p473_p12, %p55_p8 }
  0x50   : > { %s4983_s27 = scalar_select %p4394_p0, 1, 0 }
  0x51   : > { %s4984_s17 = scalar_select %p4398_p2, 1, 0 }
  0x52   : > { %p3631_p7 = scmp.lt.s32.totalorder %s4165_s21, 4  ;;  %s4941_s22 = sand.u32 1, %s4161_s20  }
  0x53   : > { %4985 = sst [smem:[#allocation28_spill]] %s4984_s17  ;;  %p4404_p3 = por %p479_p4, %p61_p11 }
  0x54   : > { %s4410_s25 = sshll.u32 %s4941_s22, 4  ;;  %s4413_s26 = sshll.u32 %s4165_s21, 8 }
  0x55   : > { %s4986_s1 = scalar_select %p4404_p3, 1, 0 }
  0x56   : > { %p4415_p9 = pnand %p3631_p7, %p57_p13  ;;  %s628_s7 = sand.u32 1, %s4165_s21  }
  0x57   : > { %4987 = sst [smem:[#allocation29_spill]] %s4986_s1  ;;  %s632_s22 = scalar_lea.vmem [#allocation5], %s4410_s25 }
  0x58   : > { %s4989_s24 = sld [smem:[#allocation31_spill]]  ;;  %s639_s1 = sshll.u32 %s632_s22, 4  ;;  %s4427_s1 = int_to_ptr.vmem [resolvable:$true] %s639_s1 }
  0x59   : > { %s4429_s0 = scalar_lea.sflag [#allocation6], %s628_s7  ;;  %p4435_p10 = pneg %p4415_p9 }
  0x5e   : > { %s4424_s19 = scalar_lea.hbm %s4989_s24, %s4413_s26  ;;  %s3928_s21 = scalar_lea.hbm %s4989_s24, 1024 }
  0x5f   : > { %s3923_s17 = scalar_lea.hbm %s4424_s19, 256  ;;  %p3929_p13 = scmp.lt.s32.totalorder %s4424_s19, %s4989_s24 }
  0x60   : > { %p3924_p8 = scmp.ne.s32.totalorder %s4424_s19, %s3923_s17  ;;  %p3930_p4 = scmp.lt.s32.totalorder %s3928_s21, %s3923_s17 }
  0x62   : > { %p3926_p11 = pnand %p4435_p10, %p3924_p8  ;;  %p3931_p7 = por %p3930_p4, %p3929_p13 }
  0x64   : > { %p3927_p12 = pneg %p3926_p11 }
  0x66   : > { %p3932_p1 = pnand %p3931_p7, %p3927_p12 }
  0x68   : > { %3935 = shalt.err (!%p3932_p1)
}
  0x69   : > { %s3936_s7 = scalar_lea.vmem %s4427_s1, 256  ;;  %s4174_s16 = smov [#allocation5]  }
  0x6a   : > { %p3937_p3 = scmp.ne.s32.totalorder %s4427_s1, %s3936_s7  ;;  %s3941_s11 = sshll.u32 %s4174_s16, 4  ;;  %s3942_s11 = int_to_ptr.vmem [resolvable:$false] %s3941_s11 }
  0x6b   : > { %s3943_s29 = scalar_lea.vmem %s3942_s11, 512  ;;  %p3944_p2 = scmp.lt.s32.totalorder %s4427_s1, %s3942_s11 }
  0x6c   : > { %p3939_p8 = pnand %p3937_p3, %p4435_p10  ;;  %p3945_p0 = scmp.lt.s32.totalorder %s3943_s29, %s3936_s7 }
  0x6e   : > { %p3940_p11 = pneg %p3939_p8  ;;  %p3946_p5 = por %p3945_p0, %p3944_p2 }
  0x70   : > { %p3947_p6 = pnand %p3946_p5, %p3940_p11 }
  0x72   : > { %3950 = shalt.err (!%p3947_p6)
}
  0x73   : > { %s4955_s12 = smov 128   ;;  %s4957_s21 = smov 8  }
  0x74   : > { %3617 = dma.hbm_to_vmem [thread:$0]  (!%p4415_p9), %s4424_s19, 256, %s4427_s1, %s4429_s0, %s4955_s12, %s4955_s12, %s4957_s21  }
  0x75   : > { %s4177_s16 = smov [#allocation10]   ;;  %s4178_s22 = smov [#allocation13]  }
  0x76   : > { %s514_s17 = sshll.u32 %s4177_s16, 4  ;;  %s546_s7 = sshll.u32 %s4178_s22, 4  ;;  %s515_s17 = int_to_ptr.vmem [resolvable:$true] %s514_s17  ;;  %s547_s7 = int_to_ptr.vmem [resolvable:$true] %s546_s7 }
  0x77   : > { %s3962_s11 = scalar_lea.vmem %s515_s17, 1024  ;;  %p4991_p3 = scmp.ne.s32.totalorder %s4977_s28, 0 }
  0x78   : > { %p3963_p1 = scmp.ne.s32.totalorder %s515_s17, %s3962_s11  ;;  %p3970_p0 = scmp.lt.s32.totalorder %s515_s17, %s515_s17 }
  0x79   : > { %p3971_p2 = scmp.lt.s32.totalorder %s3962_s11, %s3962_s11 }
  0x7a   : > { %p3965_p5 = pnand %p3963_p1, %p4991_p3 }
  0x7b   : > { %p3972_p12 = por %p3971_p2, %p3970_p0 }
  0x7c   : > { %p3966_p6 = pneg %p3965_p5 }
  0x7e   : > { %p3973_p13 = pnand %p3972_p12, %p3966_p6 }
  0x80   : > { %3976 = shalt.err (!%p3973_p13)
}
  0x81   : > { %p4992_p4 = scmp.ne.s32.totalorder %s4976_s3, 0  ;;  %s4993_s29 = smov 4  }
  0x82   : > { %s4994_s24 = smov 64   ;;  %s4995_s5 = sld [smem:[#allocation34_spill]] }
  0x83   : > { %s3988_s16 = scalar_lea.vmem %s547_s7, 1024  ;;  %p3996_p1 = scmp.lt.s32.totalorder %s547_s7, %s547_s7 }
  0x84   : > { %p3989_p7 = scmp.ne.s32.totalorder %s547_s7, %s3988_s16  ;;  %p3997_p5 = scmp.lt.s32.totalorder %s3988_s16, %s3988_s16 }
  0x86   : > { %p3991_p8 = pnand %p3989_p7, %p4991_p3  ;;  %p3998_p6 = por %p3997_p5, %p3996_p1 }
  0x88   : > { %3598 = dma.hbm_to_vmem [thread:$0]  (!%p4992_p4), %s4995_s5, 1024, %s515_s17, [#allocation9], %s4994_s24, %s4994_s24, %s4993_s29  }
  0x89   : > { %p3992_p11 = pneg %p3991_p8 }
  0x8b   : > { %p3999_p0 = pnand %p3998_p6, %p3992_p11 }
  0x8d   : > { %4002 = shalt.err (!%p3999_p0)
}
  0x8e   : > { %s4996_s9 = sld [smem:[#allocation36_spill]]  ;;  %s4179_s17 = smov [#allocation16]  }
  0x8f   : > { %s578_s19 = sshll.u32 %s4179_s17, 4  ;;  %s579_s19 = int_to_ptr.vmem [resolvable:$true] %s578_s19 }
  0x90   : > { %s4014_s1 = scalar_lea.vmem %s579_s19, 4096  ;;  %p4022_p7 = scmp.lt.s32.totalorder %s579_s19, %s579_s19 }
  0x91   : > { %p4015_p2 = scmp.ne.s32.totalorder %s579_s19, %s4014_s1  ;;  %p4023_p8 = scmp.lt.s32.totalorder %s4014_s1, %s4014_s1 }
  0x93   : > { %p4017_p12 = pnand %p4015_p2, %p4991_p3  ;;  %p4024_p11 = por %p4023_p8, %p4022_p7 }
  0x94   : > { %3604 = dma.hbm_to_vmem [thread:$0]  (!%p4992_p4), %s4996_s9, 1024, %s547_s7, [#allocation12], %s4994_s24, %s4994_s24, %s4993_s29  }
  0x95   : > { %p4018_p13 = pneg %p4017_p12 }
  0x97   : > { %p4025_p1 = pnand %p4024_p11, %p4018_p13 }
  0x99   : > { %4028 = shalt.err (!%p4025_p1)
}
  0x9a   : > { %3610 = dma.hbm_to_vmem [thread:$0]  (!%p4992_p4), %s4923_s13, 4096, %s579_s19, [#allocation15], %s4994_s24, %s4994_s24, %s4993_s29  }
  0x9b   : > { %s4997_s11 = sld [smem:[#allocation30_spill]]  ;;  %s611_s3 = scalar_lea.vmem [#allocation2], %s4410_s25 }
  0x9c   : > { %s618_s1 = sshll.u32 %s611_s3, 4  ;;  %s4998_s12 = sand.u32 1, %s4161_s20   ;;  %s4498_s1 = int_to_ptr.vmem [resolvable:$true] %s618_s1 }
  0x9d   : > { %s608_s21 = scalar_lea.sflag [#allocation3], %s4998_s12 }
  0xa1   : > { %s4495_s17 = scalar_lea.hbm %s4997_s11, %s4413_s26  ;;  %s4034_s19 = scalar_lea.hbm %s4997_s11, 1024 }
  0xa2   : > { %s4029_s16 = scalar_lea.hbm %s4495_s17, 256  ;;  %p4035_p4 = scmp.lt.s32.totalorder %s4495_s17, %s4997_s11 }
  0xa3   : > { %p4030_p3 = scmp.ne.s32.totalorder %s4495_s17, %s4029_s16  ;;  %p4036_p0 = scmp.lt.s32.totalorder %s4034_s19, %s4029_s16 }
  0xa5   : > { %p4032_p5 = pnand %p4030_p3, %p4435_p10  ;;  %p4037_p2 = por %p4036_p0, %p4035_p4 }
  0xa7   : > { %p4033_p6 = pneg %p4032_p5 }
  0xa9   : > { %p4038_p12 = pnand %p4037_p2, %p4033_p6 }
  0xab   : > { %4041 = shalt.err (!%p4038_p12)
}
  0xac   : > { %s4042_s12 = scalar_lea.vmem %s4498_s1, 256  ;;  %s4180_s22 = smov [#allocation2]  }
  0xad   : > { %p4043_p13 = scmp.ne.s32.totalorder %s4498_s1, %s4042_s12  ;;  %s4047_s3 = sshll.u32 %s4180_s22, 4  ;;  %s4048_s3 = int_to_ptr.vmem [resolvable:$false] %s4047_s3 }
  0xae   : > { %s4049_s24 = scalar_lea.vmem %s4048_s3, 512  ;;  %p4050_p11 = scmp.lt.s32.totalorder %s4498_s1, %s4048_s3 }
  0xaf   : > { %p4045_p7 = pnand %p4043_p13, %p4435_p10  ;;  %p4051_p1 = scmp.lt.s32.totalorder %s4049_s24, %s4042_s12 }
  0xb1   : > { %p4046_p8 = pneg %p4045_p7  ;;  %p4052_p3 = por %p4051_p1, %p4050_p11 }
  0xb3   : > { %p4053_p5 = pnand %p4052_p3, %p4046_p8 }
  0xb5   : > { %4056 = shalt.err (!%p4053_p5)
}
  0xb6   : > { %s4999_s16 = smov 8   ;;  %s5000_s29 = smov 128  }
  0xb7   : > { %3614 = dma.hbm_to_vmem [thread:$0]  (!%p4415_p9), %s4495_s17, 256, %s4498_s1, %s608_s21, %s5000_s29, %s5000_s29, %s4999_s16  }
  0xb8   : > { %s5001_s28 = sld [smem:[#allocation32_spill]]  ;;  %s653_s12 = scalar_lea.vmem [#allocation7], %s4410_s25 }
  0xb9   : > { %s660_s3 = sshll.u32 %s653_s12, 4  ;;  %s661_s3 = int_to_ptr.vmem [resolvable:$true] %s660_s3 }
  0xbe   : > { %s4529_s22 = scalar_lea.hbm %s5001_s28, %s4413_s26  ;;  %s4062_s21 = scalar_lea.hbm %s5001_s28, 1024 }
  0xbf   : > { %s4057_s24 = scalar_lea.hbm %s4529_s22, 256  ;;  %p4063_p2 = scmp.lt.s32.totalorder %s4529_s22, %s5001_s28 }
  0xc0   : > { %p4058_p6 = scmp.ne.s32.totalorder %s4529_s22, %s4057_s24  ;;  %p4064_p12 = scmp.lt.s32.totalorder %s4062_s21, %s4057_s24 }
  0xc2   : > { %p4060_p4 = pnand %p4058_p6, %p4435_p10  ;;  %p4065_p13 = por %p4064_p12, %p4063_p2 }
  0xc4   : > { %p4061_p0 = pneg %p4060_p4 }
  0xc6   : > { %p4066_p7 = pnand %p4065_p13, %p4061_p0 }
  0xc8   : > { %4069 = shalt.err (!%p4066_p7)
}
  0xc9   : > { %s4070_s25 = scalar_lea.vmem %s661_s3, 256  ;;  %s4181_s26 = smov [#allocation7]  }
  0xca   : > { %p4071_p8 = scmp.ne.s32.totalorder %s661_s3, %s4070_s25  ;;  %s4075_s19 = sshll.u32 %s4181_s26, 4  ;;  %s4076_s19 = int_to_ptr.vmem [resolvable:$false] %s4075_s19 }
  0xcb   : > { %s4077_s7 = scalar_lea.vmem %s4076_s19, 512  ;;  %p4078_p3 = scmp.lt.s32.totalorder %s661_s3, %s4076_s19 }
  0xcc   : > { %p4073_p11 = pnand %p4071_p8, %p4435_p10  ;;  %p4079_p5 = scmp.lt.s32.totalorder %s4077_s7, %s4070_s25 }
  0xce   : > { %p4074_p1 = pneg %p4073_p11  ;;  %p4080_p6 = por %p4079_p5, %p4078_p3 }
  0xd0   : > { %p4081_p4 = pnand %p4080_p6, %p4074_p1 }
  0xd2   : > { %4084 = shalt.err (!%p4081_p4)
}
  0xd3   : > { %3620 = dma.hbm_to_vmem [thread:$0]  (!%p4415_p9), %s4529_s22, 256, %s661_s3, %s4429_s0, %s5000_s29, %s5000_s29, %s4999_s16  }
  0xd4   : > { %p5002_p10 = scmp.ne.s32.totalorder %s4975_s23, 0 }
  0xd5   : > { %s4555_s5 = sand.u32 (!%p5002_p10), 1, %s4157_s30   ;;  %p5003_p0 = scmp.ne.s32.totalorder (!%p5002_p10), %s4983_s27, 0 }
  0xd6   : > { %672 = sbr.rel (%p5002_p10) target bundleno = 4095 (0xfff), region = 96  ;;  %s4558_s9 = sshll.u32 (!%p5002_p10), %s4555_s5, 4 }
  0xd7   : > { %s675_s14 = scalar_lea.sflag (!%p5002_p10), [#allocation3], %s4555_s5  ;;  %s4562_s18 = scalar_lea.vmem (!%p5002_p10), [#allocation2], %s4558_s9 }
  0xdb   : > { %4128 = dma.done.wait (%p5003_p0), %s675_s14, 256  }
  0xdc   : > { %4130 = vsyncadd (%p5003_p0), %s675_s14, 4294967040  ;;  %s683_s0 = sand.u32 1, %s4312_s2   ;;  %s687_s16 = scalar_lea.vmem [#allocation5], %s4558_s9 }
  0xdd   : > { %s684_s23 = scalar_lea.sflag [#allocation6], %s683_s0 }
  0xde   : > { %4132 = dma.done.wait (%p5003_p0), %s684_s23, 512  }
  0xdf   : > { %4134 = vsyncadd (%p5003_p0), %s684_s23, 4294966784  ;;  %s696_s29 = scalar_lea.vmem [#allocation7], %s4558_s9  ;;  %p5004_p9 = scmp.eq.s32.totalorder %s4312_s2, 0 }
  0xe1   : > { %4136 = dma.done.wait (%p5004_p9), [#allocation9], 2048   ;;  %p5005_p2 = pmov %p5004_p9 }
  0xe3   : > { %4138 = vsyncadd (%p5005_p2), [#allocation9], 4294965248  ;;  %p5006_p12 = pmov %p5005_p2 }
  0xe4   : > { %p5007_p13 = pmov %p5005_p2 }
  0xe5   : > { %4140 = dma.done.wait (%p5006_p12), [#allocation12], 2048  }
  0xe6   : > { %4142 = vsyncadd (%p5007_p13), [#allocation12], 4294965248  ;;  %p5008_p7 = pmov %p5005_p2 }
  0xe7   : > { %p5009_p8 = pmov %p5005_p2 }
  0xe8   : > { %4144 = dma.done.wait (%p5008_p7), [#allocation15], 8192  }
  0xe9   : > { %4146 = vsyncadd (%p5009_p8), [#allocation15], 4294959104  ;;  %v4182_v0 = vmov 0.0   ;;  %vm4183_vm0 = vmmov 0   ;;  %v3691_v1 = vld [vmem:[#allocation10 + $0x38] sm:$0xff]   ;;  %v3693_v3 = vld [vmem:[#allocation10 + $0x30] sm:$0xff]  }
  0xea   : > { %3404 = vmatprep.subr.bf16.mxu1 %v4182_v0  ;;  %3384 = vmatprep.subr.bf16.mxu0 %v4182_v0  ;;  %v3692_v2 = vld [vmem:[#allocation8 + $0x38] sm:$0xff]   ;;  %v3694_v4 = vld [vmem:[#allocation8 + $0x30] sm:$0xff]   ;;  %v3695_v5 = vld [vmem:[#allocation10 + $0x28] sm:$0xff]   ;;  %vm1141_vm1 = vcmask 261120   ;;  %vm1234_vm2 = vcmask 64512   ;;  %s4184_s24 = smov 96  }
  0xeb   : > { %3420 = vmatprep.mubr.msk.bf16.mxu1 %vm4183_vm0, %v4182_v0  ;;  %3400 = vmatprep.mubr.msk.bf16.mxu0 %vm4183_vm0, %v4182_v0  ;;  %v3696_v6 = vld [vmem:[#allocation8 + $0x28] sm:$0xff]   ;;  %v3697_v7 = vld [vmem:[#allocation10 + $0x20] sm:$0xff]   ;;  %v3699_v9 = vld [vmem:[#allocation10 + $0x18] sm:$0xff]   ;;  %vm1262_vm3 = vcmask 1043456   ;;  %s4185_s1 = smov 64   ;;  %s4186_s25 = smov 32  }
  0xec   : > { %3405 = vmatpush3.bf16.msra.mxu1 %v3691_v1  ;;  %3385 = vmatpush3.bf16.msra.mxu0 %v3692_v2  ;;  %v3698_v8 = vld [vmem:[#allocation8 + $0x20] sm:$0xff]   ;;  %v3700_v10 = vld [vmem:[#allocation8 + $0x18] sm:$0xff]   ;;  %v3701_v11 = vld [vmem:[#allocation10 + $0x10] sm:$0xff]   ;;  %vm2050_vm4 = vcmask 523264   ;;  %vm2055_vm5 = vcmask 785408   ;;  %s5010_s23 = sld [smem:[#allocation40_spill]] }
  0xed   : > { %3406 = vmatprep.subr.bf16.mxu1 %v4182_v0  ;;  %3386 = vmatprep.subr.bf16.mxu0 %v4182_v0  ;;  %v3702_v12 = vld [vmem:[#allocation8 + $0x10] sm:$0xff]   ;;  %v3703_v13 = vld [vmem:[#allocation10 + $0x8] sm:$0xff]   ;;  %v3705_v15 = vld [vmem:[#allocation10] sm:$0xff]   ;;  %s5011_s27 = sld [smem:[#allocation38_spill]]  ;;  %s3271_s7 = sshll.u32 %s4312_s2, 8 }
  0xee   : > { %v3704_v14 = vld [vmem:[#allocation8 + $0x8] sm:$0xff]   ;;  %v905_v16 = vld [vmem:[%s687_s16] sm:$0xff]  ;;  %v3707_v43 = vld [vmem:[#allocation11 + $0x38] sm:$0xff]   ;;  %s5012_s3 = sld [smem:[#allocation39_spill]]  ;;  %s784_s14 = scalar_lea.vmem [#allocation17], %s4558_s9 }
  0xef   : > { %v906_v17 = vld [vmem:[%s687_s16 + $0x8] sm:$0xff]  ;;  %v3706_v18 = vld [vmem:[#allocation8] sm:$0xff]   ;;  %v3708_v44 = vld [vmem:[#allocation11 + $0x30] sm:$0xff]   ;;  %s5013_s17 = sld [smem:[#allocation41_spill]]  ;;  %s4188_s2 = smov [#allocation17]  }
  0xf0   : > { %3407 = vmatpush3.bf16.msra.mxu1 %v3693_v3  ;;  %3387 = vmatpush3.bf16.msra.mxu0 %v3694_v4  ;;  %v790_v19 = vld [vmem:[%s4562_s18] sm:$0xff]  ;;  %v791_v20 = vld [vmem:[%s4562_s18 + $0x8] sm:$0xff]  ;;  %v907_v21 = vpack.c.bf16 %v906_v17, %v905_v16  ;;  %s5014_s26 = sld [smem:[#allocation42_spill]]  ;;  %s4089_s9 = sshll.u32 %s4188_s2, 4  ;;  %s4090_s9 = int_to_ptr.vmem [resolvable:$false] %s4089_s9 }
  0xf1   : > { %3408 = vmatprep.subr.bf16.mxu1 %v4182_v0  ;;  %3388 = vmatprep.subr.bf16.mxu0 %v4182_v0  ;;  %v792_v22 = vpack.c.bf16 %v791_v20, %v790_v19  ;;  %v3150_v23 = vld [vmem:[%s4916_s6] ss:$0 sm:$0xff]  ;;  %v3709_v45 = vld [vmem:[#allocation11 + $0x28] sm:$0xff]   ;;  %v3711_v47 = vld [vmem:[#allocation11 + $0x18] sm:$0xff]   ;;  %s5015_s19 = sld [smem:[#allocation28_spill]]  ;;  %s4091_s12 = scalar_lea.vmem %s4090_s9, 512 }
  0xf2   : > { %v3141_v27 = vld [vmem:[%s4914_s4] ss:$0 sm:$0xff]  ;;  %v3712_v48 = vld [vmem:[#allocation11 + $0x10] sm:$0xff]   ;;  %v3713_v49 = vld [vmem:[#allocation11 + $0x8] sm:$0xff]   ;;  %s5016_s16 = sld [smem:[#allocation43_spill]] }
  0xf3   : > { %v3710_v46 = vld [vmem:[#allocation11 + $0x20] sm:$0xff]   ;;  %v1021_v52 = vld [vmem:[%s696_s29 + $0x8] sm:$0xff] }
  0xf4   : > { %3409 = vmatpush3.bf16.msra.mxu1 %v3695_v5  ;;  %3389 = vmatpush3.bf16.msra.mxu0 %v3696_v6  ;;  %v3714_v50 = vld [vmem:[#allocation11] sm:$0xff]  }
  0xf5   : > { %3410 = vmatprep.subr.bf16.mxu1 %v4182_v0  ;;  %3390 = vmatprep.subr.bf16.mxu0 %v4182_v0  ;;  %v1020_v51 = vld [vmem:[%s696_s29] sm:$0xff] }
  0xf6   : > { %v1022_v53 = vpack.c.bf16 %v1021_v52, %v1020_v51 }
  0xf7   : > { %p5017_p1 = scmp.ne.s32.totalorder %s5015_s19, 0 }
  0xf8   : > { %3411 = vmatpush3.bf16.msra.mxu1 %v3697_v7  ;;  %3391 = vmatpush3.bf16.msra.mxu0 %v3698_v8  ;;  %s4866_s29 = scalar_lea.hbm %s5016_s16, %s3271_s7 }
  0xf9   : > { %3412 = vmatprep.subr.bf16.mxu1 %v4182_v0  ;;  %3392 = vmatprep.subr.bf16.mxu0 %v4182_v0 }
  0xfc   : > { %3413 = vmatpush3.bf16.msra.mxu1 %v3699_v9  ;;  %3393 = vmatpush3.bf16.msra.mxu0 %v3700_v10 }
  0xfd   : > { %3414 = vmatprep.subr.bf16.mxu1 %v4182_v0  ;;  %3394 = vmatprep.subr.bf16.mxu0 %v4182_v0 }
 0x100   : > { %3415 = vmatpush3.bf16.msra.mxu1 %v3701_v11  ;;  %3395 = vmatpush3.bf16.msra.mxu0 %v3702_v12  ;;  %v3159_v12 = vld [vmem:[%s4918_s8] ss:$0 sm:$0xff] }
 0x101   : > { %3416 = vmatprep.subr.bf16.mxu1 %v4182_v0  ;;  %3396 = vmatprep.subr.bf16.mxu0 %v4182_v0 }
 0x104   : > { %3417 = vmatpush3.bf16.msra.mxu1 %v3703_v13  ;;  %3397 = vmatpush3.bf16.msra.mxu0 %v3704_v14 }
 0x105   : > { %3418 = vmatprep.subr.bf16.mxu1 %v4182_v0  ;;  %3398 = vmatprep.subr.bf16.mxu0 %v4182_v0 }
 0x108   : > { %3419 = vmatpush3.bf16.msra.mxu1 %v3705_v15  ;;  %3399 = vmatpush3.bf16.msra.mxu0 %v3706_v18 }
 0x109   : > { %3444 = vmatprep.subr.bf16.mxu1 %v4182_v0  ;;  %3424 = vmatprep.subr.bf16.mxu0 %v4182_v0 }
 0x10b   : > { %3421 = vmatmul.mubr.bf16.vlgmr.msra.gmra.mxu1 %v907_v21  ;;  %3401 = vmatmul.mubr.bf16.vlgmr.msra.gmra.mxu0 %v792_v22 }
 0x10c   : > { %3446 = vmatprep.mubr.msk.bf16.mxu1 %vm4183_vm0, %v4182_v0  ;;  %3440 = vmatprep.mubr.msk.bf16.mxu0 %vm4183_vm0, %v4182_v0 }
 0x10d   : > { %3425 = vmatpush3.bf16.msra.mxu0 %v3707_v43 }
 0x10e   : > { %3426 = vmatprep.subr.bf16.mxu0 %v4182_v0 }
 0x111   : > { %3427 = vmatpush3.bf16.msra.mxu0 %v3708_v44 }
 0x112   : > { %3428 = vmatprep.subr.bf16.mxu0 %v4182_v0 }
 0x115   : > { %3429 = vmatpush3.bf16.msra.mxu0 %v3709_v45 }
 0x116   : > { %3430 = vmatprep.subr.bf16.mxu0 %v4182_v0 }
 0x119   : > { %3431 = vmatpush3.bf16.msra.mxu0 %v3710_v46 }
 0x11a   : > { %3432 = vmatprep.subr.bf16.mxu0 %v4182_v0 }
 0x11d   : > { %3433 = vmatpush3.bf16.msra.mxu0 %v3711_v47 }
 0x11e   : > { %3434 = vmatprep.subr.bf16.mxu0 %v4182_v0 }
 0x121   : > { %3435 = vmatpush3.bf16.msra.mxu0 %v3712_v48 }
 0x122   : > { %3436 = vmatprep.subr.bf16.mxu0 %v4182_v0 }
 0x125   : > { %3437 = vmatpush3.bf16.msra.mxu0 %v3713_v49 }
 0x126   : > { %3438 = vmatprep.subr.bf16.mxu0 %v4182_v0 }
 0x129   : > { %3439 = vmatpush3.bf16.msra.mxu0 %v3714_v50 }
 0x12a   : > { %3492 = vmatprep.subr.bf16.mxu0 %v4182_v0 }
 0x12c   : > { %3441 = vmatmul.mubr.bf16.vlgmr.msra.gmra.mxu0 %v1022_v53 }
 0x12d   : > { %3494 = vmatprep.mubr.msk.bf16.mxu0 %vm4183_vm0, %v4182_v0 }
 0x1cb   : > { %v1013_v24 = vpop.f32.mrf.mxu1  ;;  %v898_v26 = vpop.f32.mrf.mxu0 }
 0x1cc   : > { %v1014_v25 = vadd.f32 %v3150_v23, %v1013_v24  ;;  %v899_v32 = vadd.f32 %v3141_v27, %v898_v26 }
 0x1cd   : > { %v3422_v28 = vpop.f32.mrf.mxu1  ;;  %v3402_v30 = vpop.f32.mrf.mxu0 }
 0x1ce   : > { %v4625_v29 = vpack.c.bf16 %v1014_v25, %v1014_v25  ;;  %v4630_v38 = vpack.c.bf16 %v899_v32, %v899_v32 }
 0x1cf   : > { %v1016_v31 = vpop.f32.mrf.mxu1  ;;  %v901_v34 = vpop.f32.mrf.mxu0 }
 0x1d0   : > { %v1017_v33 = vadd.f32 %v3150_v23, %v1016_v31  ;;  %v1146_v35 = vsel %vm1141_vm1, %v4625_v29, 0  ;;  %v902_v41 = vadd.f32 %v3141_v27, %v901_v34 }
 0x1d1   : > { %v3423_v36 = vpop.f32.mrf.mxu1  ;;  %3445 = vmatpush3.bf16.xpose.msra.mxu1 %v1146_v35  ;;  %v3403_v37 = vpop.f32.mrf.mxu0 }
 0x1d2   : > { %3450 = vmatprep.subr.bf16.mxu1 %v4182_v0  ;;  %v4632_v39 = vpack.c.bf16 %v1017_v33, %v1017_v33  ;;  %v4641_v42 = vpack.c.bf16 %v902_v41, %v902_v41 }
 0x1d4   : > { %v1192_v40 = vsel %vm1141_vm1, %v4632_v39, 0 }
 0x1d8   : > { %3447 = vmatmul.mubr.msk.bf16.vlgmr.msra.gmra.mxu1 %vm1141_vm1, %v4630_v38 }
 0x1d9   : > { %3451 = vmatpush3.bf16.xpose.msra.mxu1 %v1192_v40  ;;  %3452 = vmatprep.mubr.msk.bf16.mxu1 %vm4183_vm0, %v4182_v0 }
 0x1da   : > { %3456 = vmatprep.subr.bf16.mxu1 %v4182_v0 }
 0x1e0   : > { %3453 = vmatmul.mubr.msk.bf16.vlgmr.msra.gmra.mxu1 %vm1141_vm1, %v4641_v42 }
 0x1e1   : > { %3458 = vmatprep.mubr.msk.bf16.mxu1 %vm4183_vm0, %v4182_v0 }
 0x1ec   : > { %v1128_v11 = vpop.f32.mrf.mxu0 }
 0x1ed   : > { %v1129_v14 = vadd.f32 %v3159_v12, %v1128_v11 }
 0x1ee   : > { %v3442_v13 = vpop.f32.mrf.mxu0 }
 0x1ef   : > { %v4670_v18 = vpack.c.bf16 %v1129_v14, %v1129_v14 }
 0x1f0   : > { %v1131_v15 = vpop.f32.mrf.mxu0 }
 0x1f1   : > { %v1132_v16 = vadd.f32 %v3159_v12, %v1131_v15  ;;  %v1264_v19 = vsel %vm1262_vm3, %v4670_v18, 0 }
 0x1f2   : > { %v3443_v17 = vpop.f32.mrf.mxu0  ;;  %3457 = vmatpush3.bf16.msra.mxu1 %v1264_v19 }
 0x1f3   : > { %3462 = vmatprep.subr.bf16.mxu1 %v4182_v0  ;;  %v4681_v23 = vpack.c.bf16 %v1132_v16, %v1132_v16 }
 0x1f5   : > { %v1310_v26 = vsel %vm1262_vm3, %v4681_v23, 0 }
 0x298   : > { %v1182_v54 = vpop.f32.mrf.mxu1 }
 0x299   : > { %v1235_v55 = vsel %vm1234_vm2, %v1182_v54, -inf }
 0x29a   : > { %1236 = vmax.xlane.f32.xlu0 %v1235_v55  ;;  %v3448_v56 = vpop.f32.mrf.mxu1 }
 0x29c   : > { %v1185_v57 = vpop.f32.mrf.mxu1 }
 0x29e   : > { %v3449_v58 = vpop.f32.mrf.mxu1 }
 0x2a0   : > { %v1228_v59 = vpop.f32.mrf.mxu1 }
 0x2a1   : > { %v1238_v60 = vsel %vm1234_vm2, %v1228_v59, -inf }
 0x2a2   : > { %1239 = vmax.xlane.f32.xlu0 %v1238_v60  ;;  %v3454_v61 = vpop.f32.mrf.mxu1 }
 0x2a4   : > { %v1231_v62 = vpop.f32.mrf.mxu1 }
 0x2a6   : > { %v3455_v63 = vpop.f32.mrf.mxu1 }
 0x2b8   : > { %1358 = vrot.lane.b32.xlu0 %v4625_v29, %s4184_s24 }
 0x323   : > { %v1237_v1 = vpop.xlane.xlu0 %1236 }
 0x324   : > { %v1241_v2 = vsub.f32 %v1182_v54, %v1237_v1 }
 0x326   : > { %v1243_v3 = vmul.f32 1.442695, %v1241_v2 }
 0x328   : > { %3803 = vpow2.f32 %v1243_v3 }
 0x32b   : > { %v1240_v4 = vpop.xlane.xlu0 %1239 }
 0x32c   : > { %v1242_v5 = vsub.f32 %v1228_v59, %v1240_v4 }
 0x32e   : > { %v1245_v6 = vmul.f32 1.442695, %v1242_v5 }
 0x32f   : > { %v1359_v30 = vpop.permute.xlu0 %1358 }
 0x330   : > { %3805 = vpow2.f32 %v1245_v6  ;;  %v1364_v33 = vsel %vm1141_vm1, %v1359_v30, 0 }
 0x335   : > { %v3804_v7 = vpop.eup %3803 }
 0x336   : > { %v1247_v8 = vsel %vm1234_vm2, %v3804_v7, 0.0 }
 0x337   : > { %1248 = vadd.xlane.f32.xlu1 %v1247_v8 }
 0x33d   : > { %v3806_v9 = vpop.eup %3805 }
 0x33e   : > { %v1250_v10 = vsel %vm1234_vm2, %v3806_v9, 0.0 }
 0x33f   : > { %1251 = vadd.xlane.f32.xlu1 %v1250_v10 }
 0x350   : > { %1355 = vrot.lane.b32.xlu1 %v4630_v38, %s4184_s24 }
 0x354   : > { %1410 = vrot.lane.b32.xlu1 %v4632_v39, %s4184_s24 }
 0x358   : > { %1407 = vrot.lane.b32.xlu1 %v4641_v42, %s4184_s24 }
 0x3c0   : > { %v1249_v20 = vpop.xlane.xlu1 %1248 }
 0x3c1   : > { %3807 = vrcp.f32 %v1249_v20 }
 0x3c8   : > { %v1252_v21 = vpop.xlane.xlu1 %1251 }
 0x3c9   : > { %3809 = vrcp.f32 %v1252_v21 }
 0x3cc   : > { %v1356_v32 = vpop.permute.xlu1 %1355 }
 0x3ce   : > { %v3808_v22 = vpop.eup %3807 }
 0x3cf   : > { %v1255_v24 = vmul.f32 %v3808_v22, %v3804_v7 }
 0x3d0   : > { %v1411_v34 = vpop.permute.xlu1 %1410 }
 0x3d1   : > { %v1257_v25 = vpack.c.bf16 %v1255_v24, %v1255_v24  ;;  %v1416_v35 = vsel %vm1141_vm1, %v1411_v34, 0 }
 0x3d3   : > { %3459 = vmatmul.mubr.msk.bf16.vlgmr.msra.gmra.mxu1 %vm1234_vm2, %v1257_v25 }
 0x3d4   : > { %3463 = vmatpush3.bf16.msra.mxu1 %v1310_v26  ;;  %3464 = vmatprep.mubr.msk.bf16.mxu1 %vm4183_vm0, %v4182_v0  ;;  %v1408_v36 = vpop.permute.xlu1 %1407 }
 0x3d5   : > { %3468 = vmatprep.subr.bf16.mxu1 %v4182_v0 }
 0x3d6   : > { %v3810_v27 = vpop.eup %3809 }
 0x3d7   : > { %v1256_v28 = vmul.f32 %v3810_v27, %v3806_v9 }
 0x3d9   : > { %v1258_v31 = vpack.c.bf16 %v1256_v28, %v1256_v28 }
 0x3db   : > { %3465 = vmatmul.mubr.msk.bf16.vlgmr.msra.gmra.mxu1 %vm1234_vm2, %v1258_v31 }
 0x3dc   : > { %3469 = vmatpush3.bf16.xpose.msra.mxu1 %v1364_v33  ;;  %3470 = vmatprep.mubr.msk.bf16.mxu1 %vm4183_vm0, %v4182_v0 }
 0x3dd   : > { %3474 = vmatprep.subr.bf16.mxu1 %v4182_v0 }
 0x3e3   : > { %3471 = vmatmul.mubr.msk.bf16.vlgmr.msra.gmra.mxu1 %vm1141_vm1, %v1356_v32 }
 0x3e4   : > { %3475 = vmatpush3.bf16.xpose.msra.mxu1 %v1416_v35  ;;  %3476 = vmatprep.mubr.msk.bf16.mxu1 %vm4183_vm0, %v4182_v0 }
 0x3e5   : > { %3480 = vmatprep.subr.bf16.mxu1 %v4182_v0 }
 0x3eb   : > { %3477 = vmatmul.mubr.msk.bf16.vlgmr.msra.gmra.mxu1 %vm1141_vm1, %v1408_v36 }
 0x3ec   : > { %3482 = vmatprep.mubr.msk.bf16.mxu1 %vm4183_vm0, %v4182_v0 }
 0x493   : > { %v4702_v37 = vpop.f32.mrf.mxu1 }
 0x495   : > { %v3460_v40 = vpop.f32.mrf.mxu1 }
 0x497   : > { %v1303_v41 = vpop.f32.mrf.mxu1 }
 0x499   : > { %v3461_v43 = vpop.f32.mrf.mxu1 }
 0x49b   : > { %v4704_v44 = vpop.f32.mrf.mxu1 }
 0x49d   : > { %v3466_v45 = vpop.f32.mrf.mxu1 }
 0x49f   : > { %v1349_v46 = vpop.f32.mrf.mxu1 }
 0x4a1   : > { %v3467_v47 = vpop.f32.mrf.mxu1 }
 0x4a3   : > { %v1400_v48 = vpop.f32.mrf.mxu1 }
 0x4a4   : > { %v1458_v49 = vsel %vm1234_vm2, %v1400_v48, -inf }
 0x4a5   : > { %1459 = vmax.xlane.f32.xlu0 %v1458_v49  ;;  %v3472_v50 = vpop.f32.mrf.mxu1 }
 0x4a7   : > { %v1403_v51 = vpop.f32.mrf.mxu1 }
 0x4a9   : > { %v3473_v52 = vpop.f32.mrf.mxu1 }
 0x4ab   : > { %v1452_v53 = vpop.f32.mrf.mxu1 }
 0x4ac   : > { %v1461_v54 = vsel %vm1234_vm2, %v1452_v53, -inf }
 0x4ad   : > { %1462 = vmax.xlane.f32.xlu1 %v1461_v54  ;;  %v3478_v55 = vpop.f32.mrf.mxu1 }
 0x4af   : > { %v1455_v56 = vpop.f32.mrf.mxu1 }
 0x4b1   : > { %v3479_v57 = vpop.f32.mrf.mxu1 }
 0x4be   : > { %1532 = vrot.lane.b32.xlu1 %v4681_v23, %s4184_s24 }
 0x4c2   : > { %1584 = vrot.lane.b32.xlu1 %v4625_v29, %s4185_s1 }
 0x4c6   : > { %1634 = vrot.lane.b32.xlu1 %v4632_v39, %s4185_s1 }
 0x4ca   : > { %1632 = vrot.lane.b32.xlu1 %v4641_v42, %s4185_s1 }
 0x52e   : > { %v1460_v58 = vpop.xlane.xlu0 %1459 }
 0x52f   : > { %v1464_v59 = vsub.f32 %v1400_v48, %v1460_v58 }
 0x531   : > { %v1466_v60 = vmul.f32 1.442695, %v1464_v59 }
 0x533   : > { %3811 = vpow2.f32 %v1466_v60 }
 0x536   : > { %v1463_v61 = vpop.xlane.xlu1 %1462 }
 0x537   : > { %v1465_v62 = vsub.f32 %v1452_v53, %v1463_v61 }
 0x539   : > { %v1468_v63 = vmul.f32 1.442695, %v1465_v62 }
 0x53a   : > { %v1533_v1 = vpop.permute.xlu1 %1532 }
 0x53b   : > { %3813 = vpow2.f32 %v1468_v63  ;;  %v1538_v16 = vsel %vm1262_vm3, %v1533_v1, 0 }
 0x53e   : > { %v1585_v2 = vpop.permute.xlu1 %1584 }
 0x53f   : > { %v1590_v3 = vsel %vm1141_vm1, %v1585_v2, 0 }
 0x540   : > { %v3812_v4 = vpop.eup %3811  ;;  %3493 = vmatpush3.bf16.xpose.msra.mxu0 %v1590_v3 }
 0x541   : > { %v1470_v5 = vsel %vm1234_vm2, %v3812_v4, 0.0  ;;  %3504 = vmatprep.subr.bf16.mxu0 %v4182_v0 }
 0x542   : > { %1471 = vadd.xlane.f32.xlu0 %v1470_v5  ;;  %v1635_v20 = vpop.permute.xlu1 %1634 }
 0x543   : > { %v1640_v22 = vsel %vm1141_vm1, %v1635_v20, 0 }
 0x546   : > { %v1633_v24 = vpop.permute.xlu1 %1632 }
 0x548   : > { %v3814_v6 = vpop.eup %3813 }
 0x549   : > { %v1473_v7 = vsel %vm1234_vm2, %v3814_v6, 0.0 }
 0x54a   : > { %1474 = vadd.xlane.f32.xlu0 %v1473_v7 }
 0x560   : > { %1483 = vrot.lane.b32.xlu0 %v4670_v18, %s4184_s24 }
 0x564   : > { %1582 = vrot.lane.b32.xlu0 %v4630_v38, %s4185_s1 }
 0x5cb   : > { %v1472_v8 = vpop.xlane.xlu0 %1471 }
 0x5cc   : > { %3815 = vrcp.f32 %v1472_v8 }
 0x5d3   : > { %v1475_v9 = vpop.xlane.xlu0 %1474 }
 0x5d4   : > { %3817 = vrcp.f32 %v1475_v9 }
 0x5d7   : > { %v1484_v10 = vpop.permute.xlu0 %1483 }
 0x5d8   : > { %v1489_v11 = vsel %vm1262_vm3, %v1484_v10, 0 }
 0x5d9   : > { %v3816_v12 = vpop.eup %3815  ;;  %3481 = vmatpush3.bf16.msra.mxu1 %v1489_v11 }
 0x5da   : > { %3486 = vmatprep.subr.bf16.mxu1 %v4182_v0  ;;  %v1478_v13 = vmul.f32 %v3816_v12, %v3812_v4 }
 0x5db   : > { %v1583_v14 = vpop.permute.xlu0 %1582 }
 0x5dc   : > { %3495 = vmatmul.mubr.msk.bf16.vlgmr.msra.gmra.mxu0 %vm1141_vm1, %v1583_v14  ;;  %v1480_v15 = vpack.c.bf16 %v1478_v13, %v1478_v13 }
 0x5dd   : > { %3506 = vmatprep.mubr.msk.bf16.mxu0 %vm4183_vm0, %v4182_v0 }
 0x5de   : > { %3483 = vmatmul.mubr.msk.bf16.vlgmr.msra.gmra.mxu1 %vm1234_vm2, %v1480_v15 }
 0x5df   : > { %3487 = vmatpush3.bf16.msra.mxu1 %v1538_v16  ;;  %3488 = vmatprep.mubr.msk.bf16.mxu1 %vm4183_vm0, %v4182_v0 }
 0x5e0   : > { %3498 = vmatprep.subr.bf16.mxu1 %v4182_v0 }
 0x5e1   : > { %v3818_v17 = vpop.eup %3817 }
 0x5e2   : > { %v1479_v19 = vmul.f32 %v3818_v17, %v3814_v6 }
 0x5e4   : > { %v1481_v21 = vpack.c.bf16 %v1479_v19, %v1479_v19 }
 0x5e6   : > { %3489 = vmatmul.mubr.msk.bf16.vlgmr.msra.gmra.mxu1 %vm1234_vm2, %v1481_v21 }
 0x5e7   : > { %3499 = vmatpush3.bf16.xpose.msra.mxu1 %v1640_v22  ;;  %3500 = vmatprep.mubr.msk.bf16.mxu1 %vm4183_vm0, %v4182_v0 }
 0x5e8   : > { %3510 = vmatprep.subr.bf16.mxu1 %v4182_v0 }
 0x5ee   : > { %3501 = vmatmul.mubr.msk.bf16.vlgmr.msra.gmra.mxu1 %vm1141_vm1, %v1633_v24 }
 0x5ef   : > { %3512 = vmatprep.mubr.msk.bf16.mxu1 %vm4183_vm0, %v4182_v0 }
 0x69c   : > { %v1626_v25 = vpop.f32.mrf.mxu0 }
 0x69d   : > { %v1682_v26 = vsel %vm1234_vm2, %v1626_v25, -inf }
 0x69e   : > { %v4743_v27 = vpop.f32.mrf.mxu1  ;;  %1683 = vmax.xlane.f32.xlu0 %v1682_v26  ;;  %v3496_v28 = vpop.f32.mrf.mxu0 }
 0x6a0   : > { %v3484_v30 = vpop.f32.mrf.mxu1  ;;  %v1629_v31 = vpop.f32.mrf.mxu0 }
 0x6a2   : > { %v1528_v32 = vpop.f32.mrf.mxu1  ;;  %v3497_v33 = vpop.f32.mrf.mxu0 }
 0x6a3   : > { %v1580_v32 = vpack.c.bf16 %v4743_v27, %v4743_v27 }
 0x6a4   : > { %v3485_v34 = vpop.f32.mrf.mxu1 }
 0x6a6   : > { %v4745_v35 = vpop.f32.mrf.mxu1 }
 0x6a7   : > { %v1581_v33 = vpack.c.bf16 %v4745_v35, %v4745_v35 }
 0x6a8   : > { %v3490_v36 = vpop.f32.mrf.mxu1 }
 0x6aa   : > { %v1577_v40 = vpop.f32.mrf.mxu1 }
 0x6ac   : > { %v3491_v41 = vpop.f32.mrf.mxu1 }
 0x6ae   : > { %v1676_v43 = vpop.f32.mrf.mxu1 }
 0x6af   : > { %v1685_v45 = vsel %vm1234_vm2, %v1676_v43, -inf }
 0x6b0   : > { %1686 = vmax.xlane.f32.xlu1 %v1685_v45  ;;  %v3502_v46 = vpop.f32.mrf.mxu1 }
 0x6b2   : > { %v1679_v47 = vpop.f32.mrf.mxu1 }
 0x6b4   : > { %v3503_v48 = vpop.f32.mrf.mxu1 }
 0x6c1   : > { %1754 = vrot.lane.b32.xlu1 %v4681_v23, %s4185_s1 }
 0x6c5   : > { %1806 = vrot.lane.b32.xlu1 %v4625_v29, %s4186_s25 }
 0x6c9   : > { %1856 = vrot.lane.b32.xlu1 %v4632_v39, %s4186_s25 }
 0x6cd   : > { %1854 = vrot.lane.b32.xlu1 %v4641_v42, %s4186_s25 }
 0x727   : > { %v1684_v49 = vpop.xlane.xlu0 %1683 }
 0x728   : > { %v1688_v50 = vsub.f32 %v1626_v25, %v1684_v49 }
 0x72a   : > { %v1690_v51 = vmul.f32 1.442695, %v1688_v50 }
 0x72c   : > { %3819 = vpow2.f32 %v1690_v51 }
 0x739   : > { %v3820_v52 = vpop.eup %3819  ;;  %v1687_v53 = vpop.xlane.xlu1 %1686 }
 0x73a   : > { %v1689_v54 = vsub.f32 %v1676_v43, %v1687_v53  ;;  %v1694_v55 = vsel %vm1234_vm2, %v3820_v52, 0.0 }
 0x73b   : > { %1695 = vadd.xlane.f32.xlu0 %v1694_v55 }
 0x73c   : > { %v1692_v56 = vmul.f32 1.442695, %v1689_v54 }
 0x73d   : > { %v1755_v57 = vpop.permute.xlu1 %1754 }
 0x73e   : > { %3821 = vpow2.f32 %v1692_v56  ;;  %v1760_v29 = vsel %vm1262_vm3, %v1755_v57, 0 }
 0x73f   : > { %3511 = vmatpush3.bf16.msra.mxu1 %v1760_v29 }
 0x740   : > { %3522 = vmatprep.subr.bf16.mxu1 %v4182_v0 }
 0x741   : > { %v1807_v1 = vpop.permute.xlu1 %1806 }
 0x742   : > { %v1812_v3 = vsel %vm1141_vm1, %v1807_v1, 0  ;;  %v3722_v1 = vld [vmem:[#allocation13] sm:$0xff]  }
 0x745   : > { %v1857_v5 = vpop.permute.xlu1 %1856 }
 0x746   : > { %v1862_v8 = vsel %vm1141_vm1, %v1857_v5, 0 }
 0x749   : > { %v1855_v9 = vpop.permute.xlu1 %1854 }
 0x74b   : > { %v3822_v39 = vpop.eup %3821 }
 0x74c   : > { %v1697_v42 = vsel %vm1234_vm2, %v3822_v39, 0.0 }
 0x74d   : > { %1698 = vadd.xlane.f32.xlu0 %v1697_v42  ;;  %v3715_v42 = vld [vmem:[#allocation13 + $0x38] sm:$0xff]  }
 0x763   : > { %1706 = vrot.lane.b32.xlu0 %v4670_v18, %s4185_s1 }
 0x767   : > { %1804 = vrot.lane.b32.xlu0 %v4630_v38, %s4186_s25 }
 0x7c4   : > { %v1696_v58 = vpop.xlane.xlu0 %1695 }
 0x7c5   : > { %3823 = vrcp.f32 %v1696_v58  ;;  %v3716_v58 = vld [vmem:[#allocation13 + $0x30] sm:$0xff]  }
 0x7d2   : > { %v3824_v59 = vpop.eup %3823 }
 0x7d3   : > { %v1702_v61 = vmul.f32 %v3824_v59, %v3820_v52  ;;  %v3717_v59 = vld [vmem:[#allocation13 + $0x28] sm:$0xff]  }
 0x7d5   : > { %v1704_v2 = vpack.c.bf16 %v1702_v61, %v1702_v61  ;;  %v3719_v61 = vld [vmem:[#allocation13 + $0x18] sm:$0xff]  }
 0x7d6   : > { %v1699_v60 = vpop.xlane.xlu0 %1698 }
 0x7d7   : > { %3825 = vrcp.f32 %v1699_v60  ;;  %v3718_v60 = vld [vmem:[#allocation13 + $0x20] sm:$0xff]  }
 0x7da   : > { %v1707_v62 = vpop.permute.xlu0 %1706 }
 0x7db   : > { %v1712_v63 = vsel %vm1262_vm3, %v1707_v62, 0  ;;  %v3720_v62 = vld [vmem:[#allocation13 + $0x10] sm:$0xff]  }
 0x7dc   : > { %3505 = vmatpush3.bf16.msra.mxu0 %v1712_v63  ;;  %v3721_v63 = vld [vmem:[#allocation13 + $0x8] sm:$0xff]  }
 0x7dd   : > { %3516 = vmatprep.subr.bf16.mxu0 %v4182_v0 }
 0x7de   : > { %v1805_v6 = vpop.permute.xlu0 %1804 }
 0x7df   : > { %3507 = vmatmul.mubr.msk.bf16.vlgmr.msra.gmra.mxu0 %vm1234_vm2, %v1704_v2 }
 0x7e0   : > { %3517 = vmatpush3.bf16.xpose.msra.mxu0 %v1812_v3  ;;  %3518 = vmatprep.mubr.msk.bf16.mxu0 %vm4183_vm0, %v4182_v0 }
 0x7e1   : > { %3528 = vmatprep.subr.bf16.mxu0 %v4182_v0 }
 0x7e4   : > { %v3826_v38 = vpop.eup %3825 }
 0x7e5   : > { %v1703_v4 = vmul.f32 %v3826_v38, %v3822_v39 }
 0x7e7   : > { %3519 = vmatmul.mubr.msk.bf16.vlgmr.msra.gmra.mxu0 %vm1141_vm1, %v1805_v6  ;;  %v1705_v7 = vpack.c.bf16 %v1703_v4, %v1703_v4 }
 0x7e8   : > { %3530 = vmatprep.mubr.msk.bf16.mxu0 %vm4183_vm0, %v4182_v0 }
 0x7e9   : > { %3513 = vmatmul.mubr.msk.bf16.vlgmr.msra.gmra.mxu1 %vm1234_vm2, %v1705_v7 }
 0x7ea   : > { %3523 = vmatpush3.bf16.xpose.msra.mxu1 %v1862_v8  ;;  %3524 = vmatprep.mubr.msk.bf16.mxu1 %vm4183_vm0, %v4182_v0 }
 0x7eb   : > { %3534 = vmatprep.subr.bf16.mxu1 %v4182_v0 }
 0x7f1   : > { %3525 = vmatmul.mubr.msk.bf16.vlgmr.msra.gmra.mxu1 %vm1141_vm1, %v1855_v9 }
 0x7f2   : > { %3536 = vmatprep.mubr.msk.bf16.mxu1 %vm4183_vm0, %v4182_v0 }
 0x89f   : > { %v1748_v10 = vpop.f32.mrf.mxu0 }
 0x8a0   : > { %v1802_v50 = vpack.c.bf16 %v1748_v10, %v1748_v10 }
 0x8a1   : > { %v3508_v11 = vpop.f32.mrf.mxu0 }
 0x8a3   : > { %v1751_v12 = vpop.f32.mrf.mxu0 }
 0x8a5   : > { %v3509_v13 = vpop.f32.mrf.mxu0 }
 0x8a7   : > { %v1848_v14 = vpop.f32.mrf.mxu0 }
 0x8a8   : > { %v1904_v15 = vsel %vm1234_vm2, %v1848_v14, -inf }
 0x8a9   : > { %v1796_v16 = vpop.f32.mrf.mxu1  ;;  %1905 = vmax.xlane.f32.xlu0 %v1904_v15  ;;  %v3520_v17 = vpop.f32.mrf.mxu0  ;;  %v1353_v15 = vpack.c.bf16 %v4704_v44, %v4704_v44  ;;  %v3193_v44 = vld [vmem:[%s4920_s10] ss:$0 sm:$0xff] }
 0x8aa   : > { %v1803_v34 = vpack.c.bf16 %v1796_v16, %v1796_v16 }
 0x8ab   : > { %v3514_v19 = vpop.f32.mrf.mxu1  ;;  %v1851_v20 = vpop.f32.mrf.mxu0 }
 0x8ad   : > { %v1799_v21 = vpop.f32.mrf.mxu1  ;;  %v3521_v22 = vpop.f32.mrf.mxu0 }
 0x8af   : > { %v3515_v24 = vpop.f32.mrf.mxu1 }
 0x8b1   : > { %v1898_v25 = vpop.f32.mrf.mxu1 }
 0x8b2   : > { %v1907_v26 = vsel %vm1234_vm2, %v1898_v25, -inf }
 0x8b3   : > { %1908 = vmax.xlane.f32.xlu1 %v1907_v26  ;;  %v3526_v28 = vpop.f32.mrf.mxu1 }
 0x8b4   : > { %v3843_v28 = vld [vmem:[%s4562_s18] sm:$0xff] }
 0x8b5   : > { %v1901_v30 = vpop.f32.mrf.mxu1 }
 0x8b7   : > { %v3527_v31 = vpop.f32.mrf.mxu1 }
 0x8c4   : > { %1976 = vrot.lane.b32.xlu1 %v4681_v23, %s4186_s25 }
 0x8c8   : > { %2028 = vrot.lane.b32.xlu1 %v1580_v32, %s4186_s25 }
 0x8cc   : > { %2030 = vrot.lane.b32.xlu1 %v1581_v33, %s4186_s25 }
 0x8d0   : > { %2036 = vrot.lane.b32.xlu1 %v1803_v34, %s4185_s1  ;;  %v3844_v34 = vld [vmem:[%s4562_s18 + $0x8] sm:$0xff]  ;;  %s2939_s18 = sshll.u32 %s784_s14, 4  ;;  %s4868_s18 = int_to_ptr.vmem [resolvable:$true] %s2939_s18 }
 0x8d1   : > { %s4085_s22 = scalar_lea.vmem %s4868_s18, 256  ;;  %p4092_p6 = scmp.lt.s32.totalorder %s4868_s18, %s4090_s9 }
 0x8d2   : > { %p4086_p11 = scmp.ne.s32.totalorder %s4868_s18, %s4085_s22  ;;  %p4093_p4 = scmp.lt.s32.totalorder %s4091_s12, %s4085_s22 }
 0x8d4   : > { %p4087_p3 = pnand %p4086_p11, %p5017_p1  ;;  %p4094_p10 = por %p4093_p4, %p4092_p6 }
 0x8d6   : > { %p4088_p5 = pneg %p4087_p3 }
 0x8d8   : > { %p4095_p0 = pnand %p4094_p10, %p4088_p5 }
 0x932   : > { %v1906_v36 = vpop.xlane.xlu0 %1905 }
 0x933   : > { %v1910_v40 = vsub.f32 %v1848_v14, %v1906_v36  ;;  %v1352_v14 = vpack.c.bf16 %v4702_v37, %v4702_v37 }
 0x935   : > { %v1912_v41 = vmul.f32 1.442695, %v1910_v40 }
 0x937   : > { %3827 = vpow2.f32 %v1912_v41 }
 0x93c   : > { %v1909_v43 = vpop.xlane.xlu1 %1908 }
 0x93d   : > { %v1911_v45 = vsub.f32 %v1898_v25, %v1909_v43  ;;  %v3723_v43 = vld [vmem:[#allocation14 + $0xe0] ss:$16 sps:$4 sm:$0xff]  }
 0x93f   : > { %v1914_v23 = vmul.f32 1.442695, %v1911_v45  ;;  %v3725_v45 = vld [vmem:[#allocation14 + $0xe4] ss:$16 sps:$4 sm:$0xff]  }
 0x940   : > { %v1977_v46 = vpop.permute.xlu1 %1976 }
 0x941   : > { %3829 = vpow2.f32 %v1914_v23  ;;  %v1982_v27 = vsel %vm1262_vm3, %v1977_v46, 0  ;;  %v3726_v23 = vld [vmem:[#allocation14 + $0xe8] ss:$16 sps:$4 sm:$0xff]   ;;  %v3728_v46 = vld [vmem:[#allocation14 + $0xec] ss:$16 sps:$4 sm:$0xff]  }
 0x942   : > { %3535 = vmatpush3.bf16.msra.mxu1 %v1982_v27 }
 0x943   : > { %2438 = vmatprep.subr.bf16.mxu1 %v3725_v45  ;;  %v3778_v45 = vld [vmem:[#allocation16 + $0xb0] sm:$0xff]  }
 0x944   : > { %v3828_v47 = vpop.eup %3827  ;;  %v2029_v11 = vpop.permute.xlu1 %2028 }
 0x945   : > { %v1916_v35 = vsel %vm1234_vm2, %v3828_v47, 0.0  ;;  %v2046_v17 = vsel %vm1141_vm1, %v1352_v14, %v2029_v11  ;;  %v3770_v11 = vld [vmem:[#allocation14 + $0xc] ss:$16 sps:$4 sm:$0xff]  }
 0x946   : > { %1917 = vadd.xlane.f32.xlu0 %v1916_v35  ;;  %v3772_v14 = vld [vmem:[#allocation16 + $0xf8] sm:$0xff]  }
 0x948   : > { %v2031_v12 = vpop.permute.xlu1 %2030 }
 0x949   : > { %v2049_v19 = vsel %vm1141_vm1, %v1353_v15, %v2031_v12  ;;  %v3765_v12 = vld [vmem:[#allocation14] ss:$16 sps:$4 sm:$0xff]  }
 0x94e   : > { %v3830_v48 = vpop.eup %3829 }
 0x94f   : > { %v1919_v49 = vsel %vm1234_vm2, %v3830_v48, 0.0 }
 0x950   : > { %1920 = vadd.xlane.f32.xlu0 %v1919_v49 }
 0x966   : > { %1928 = vrot.lane.b32.xlu0 %v4670_v18, %s4186_s25 }
 0x96a   : > { %2034 = vrot.lane.b32.xlu0 %v1802_v50, %s4185_s1 }
 0x9cf   : > { %v1918_v51 = vpop.xlane.xlu0 %1917 }
 0x9d0   : > { %3831 = vrcp.f32 %v1918_v51 }
 0x9d9   : > { %v1921_v52 = vpop.xlane.xlu0 %1920 }
 0x9da   : > { %3833 = vrcp.f32 %v1921_v52 }
 0x9dd   : > { %v3832_v53 = vpop.eup %3831  ;;  %v1929_v54 = vpop.permute.xlu0 %1928 }
 0x9de   : > { %v1934_v55 = vsel %vm1262_vm3, %v1929_v54, 0  ;;  %v1924_v56 = vmul.f32 %v3832_v53, %v3828_v47  ;;  %v3731_v53 = vld [vmem:[#allocation14 + $0xc4] ss:$16 sps:$4 sm:$0xff]   ;;  %v3734_v54 = vld [vmem:[#allocation14 + $0xcc] ss:$16 sps:$4 sm:$0xff]  }
 0x9df   : > { %3529 = vmatpush3.bf16.msra.mxu0 %v1934_v55  ;;  %v3729_v55 = vld [vmem:[#allocation14 + $0xc0] ss:$16 sps:$4 sm:$0xff]  }
 0x9e0   : > { %v1926_v57 = vpack.c.bf16 %v1924_v56, %v1924_v56  ;;  %3540 = vmatprep.subr.bf16.mxu0 %v4182_v0  ;;  %v3732_v56 = vld [vmem:[#allocation14 + $0xc8] ss:$16 sps:$4 sm:$0xff]  }
 0x9e1   : > { %v2035_v13 = vpop.permute.xlu0 %2034 }
 0x9e2   : > { %3531 = vmatmul.mubr.msk.bf16.vlgmr.msra.gmra.mxu0 %vm1234_vm2, %v1926_v57  ;;  %v2052_v21 = vsel %vm2050_vm4, %v2046_v17, %v2035_v13  ;;  %v3737_v57 = vld [vmem:[#allocation14 + $0xa4] ss:$16 sps:$4 sm:$0xff]   ;;  %v3768_v13 = vld [vmem:[#allocation14 + $0x8] ss:$16 sps:$4 sm:$0xff]  }
 0x9e3   : > { %3556 = vmatprep.mubr.msk.bf16.mxu0 %vm4183_vm0, %v4182_v0  ;;  %3541 = vmatpush3.bf16.msra.mxu0 %v3715_v42  ;;  %v3741_v42 = vld [vmem:[#allocation14 + $0x80] ss:$16 sps:$4 sm:$0xff]  }
 0x9e4   : > { %3542 = vmatprep.subr.bf16.mxu0 %v4182_v0 }
 0x9e7   : > { %v3834_v18 = vpop.eup %3833  ;;  %3543 = vmatpush3.bf16.msra.mxu0 %v3716_v58  ;;  %v3743_v58 = vld [vmem:[#allocation14 + $0x84] ss:$16 sps:$4 sm:$0xff]  }
 0x9e8   : > { %v1925_v29 = vmul.f32 %v3834_v18, %v3830_v48  ;;  %3544 = vmatprep.subr.bf16.mxu0 %v4182_v0  ;;  %v3740_v18 = vld [vmem:[#allocation14 + $0xac] ss:$16 sps:$4 sm:$0xff]  }
 0x9ea   : > { %v1927_v39 = vpack.c.bf16 %v1925_v29, %v1925_v29  ;;  %v3735_v29 = vld [vmem:[#allocation14 + $0xa0] ss:$16 sps:$4 sm:$0xff]  }
 0x9eb   : > { %3545 = vmatpush3.bf16.msra.mxu0 %v3717_v59  ;;  %v3744_v59 = vld [vmem:[#allocation14 + $0x88] ss:$16 sps:$4 sm:$0xff]  }
 0x9ec   : > { %3537 = vmatmul.mubr.msk.bf16.vlgmr.msra.gmra.mxu1 %vm1234_vm2, %v1927_v39  ;;  %3546 = vmatprep.subr.bf16.mxu0 %v4182_v0  ;;  %v3738_v39 = vld [vmem:[#allocation14 + $0xa8] ss:$16 sps:$4 sm:$0xff]  }
 0x9ed   : > { %2439 = vmatpush1.bf16.msra.mxu1 %v3723_v43  ;;  %v3777_v43 = vld [vmem:[#allocation16 + $0x30] sm:$0xff]  }
 0x9ee   : > { %2440 = vmatprep.subr.bf16.mxu1 %v3731_v53  ;;  %v3789_v53 = vld [vmem:[#allocation16 + $0x18] sm:$0xff]  }
 0x9ef   : > { %3547 = vmatpush3.bf16.msra.mxu0 %v3718_v60  ;;  %v3746_v60 = vld [vmem:[#allocation14 + $0x8c] ss:$16 sps:$4 sm:$0xff]  }
 0x9f0   : > { %3548 = vmatprep.subr.bf16.mxu0 %v4182_v0 }
 0x9f1   : > { %2441 = vmatpush1.bf16.msra.mxu1 %v3729_v55  ;;  %v3791_v55 = vld [vmem:[#allocation16 + $0x50] sm:$0xff]  }
 0x9f2   : > { %2442 = vmatprep.subr.bf16.mxu1 %v3737_v57  ;;  %v3793_v57 = vld [vmem:[#allocation16 + $0x10] sm:$0xff]  }
 0x9f3   : > { %3549 = vmatpush3.bf16.msra.mxu0 %v3719_v61  ;;  %v3749_v61 = vld [vmem:[#allocation14 + $0x64] ss:$16 sps:$4 sm:$0xff]  }
 0x9f4   : > { %3550 = vmatprep.subr.bf16.mxu0 %v4182_v0 }
 0x9f5   : > { %2443 = vmatpush1.bf16.msra.mxu1 %v3735_v29  ;;  %v3795_v29 = vld [vmem:[#allocation16 + $0x48] sm:$0xff]  }
 0x9f6   : > { %2444 = vmatprep.subr.bf16.mxu1 %v3743_v58  ;;  %v3798_v58 = vld [vmem:[#allocation16 + $0x88] sm:$0xff]  }
 0x9f7   : > { %3551 = vmatpush3.bf16.msra.mxu0 %v3720_v62  ;;  %v3752_v62 = vld [vmem:[#allocation14 + $0x6c] ss:$16 sps:$4 sm:$0xff]  }
 0x9f8   : > { %3552 = vmatprep.subr.bf16.mxu0 %v4182_v0 }
 0x9f9   : > { %2445 = vmatpush1.bf16.msra.mxu1 %v3741_v42  ;;  %v3797_v42 = vld [vmem:[#allocation16 + $0x8] sm:$0xff]  }
 0x9fa   : > { %2446 = vmatprep.subr.bf16.mxu1 %v3749_v61  ;;  %v3801_v61 = vld [vmem:[#allocation16] sm:$0xff]  }
 0x9fb   : > { %3553 = vmatpush3.bf16.msra.mxu0 %v3721_v63  ;;  %v3747_v63 = vld [vmem:[#allocation14 + $0x60] ss:$16 sps:$4 sm:$0xff]  }
 0x9fc   : > { %3554 = vmatprep.subr.bf16.mxu0 %v4182_v0  ;;  %v2037_v0 = vpop.permute.xlu1 %2036 }
 0x9fd   : > { %v2054_v20 = vsel %vm2050_vm4, %v2049_v19, %v2037_v0  ;;  %2447 = vmatpush1.bf16.msra.mxu1 %v3747_v63  ;;  %v3771_v0 = vld [vmem:[#allocation16 + $0x78] sm:$0xff]   ;;  %v2258_v63 = vlaneseq }
 0x9ff   : > { %3555 = vmatpush3.bf16.msra.mxu0 %v3722_v1  ;;  %v3750_v1 = vld [vmem:[#allocation14 + $0x68] ss:$16 sps:$4 sm:$0xff]  }
 0xa00   : > { %2481 = vmatprep.subr.bf16.mxu0 %v3728_v46  ;;  %v3780_v46 = vld [vmem:[#allocation16 + $0xe8] sm:$0xff]  }
 0xaa2   : > { %v1970_v2 = vpop.f32.mrf.mxu0 }
 0xaa3   : > { %v2024_v3 = vpack.c.bf16 %v1970_v2, %v1970_v2  ;;  %v3755_v2 = vld [vmem:[#allocation14 + $0x44] ss:$16 sps:$4 sm:$0xff]  }
 0xaa4   : > { %v3532_v38 = vpop.f32.mrf.mxu0  ;;  %2448 = vmatprep.subr.bf16.mxu1 %v3755_v2 }
 0xaa5   : > { %2040 = vrot.lane.b32.xlu0 %v2024_v3, %s4184_s24  ;;  %v3758_v3 = vld [vmem:[#allocation14 + $0x4c] ss:$16 sps:$4 sm:$0xff]   ;;  %v4187_v38 = vmov 0  }
 0xaa6   : > { %v1973_v4 = vpop.f32.mrf.mxu0  ;;  %2470 = vmatprep.mubr.bf16.mxu1 %v4187_v38 }
 0xaa7   : > { %v3753_v4 = vld [vmem:[#allocation14 + $0x40] ss:$16 sps:$4 sm:$0xff]  }
 0xaa8   : > { %v3533_v5 = vpop.f32.mrf.mxu0  ;;  %2449 = vmatpush1.bf16.msra.mxu1 %v3753_v4 }
 0xaa9   : > { %v3756_v5 = vld [vmem:[#allocation14 + $0x48] ss:$16 sps:$4 sm:$0xff]  }
 0xaac   : > { %v2018_v6 = vpop.f32.mrf.mxu1 }
 0xaad   : > { %v2025_v7 = vpack.c.bf16 %v2018_v6, %v2018_v6  ;;  %v3761_v6 = vld [vmem:[#allocation14 + $0x24] ss:$16 sps:$4 sm:$0xff]  }
 0xaae   : > { %v3538_v8 = vpop.f32.mrf.mxu1  ;;  %2450 = vmatprep.subr.bf16.mxu1 %v3761_v6 }
 0xaaf   : > { %2042 = vrot.lane.b32.xlu1 %v2025_v7, %s4184_s24  ;;  %v3764_v7 = vld [vmem:[#allocation14 + $0x2c] ss:$16 sps:$4 sm:$0xff]   ;;  %v3759_v8 = vld [vmem:[#allocation14 + $0x20] ss:$16 sps:$4 sm:$0xff]  }
 0xab0   : > { %v2021_v9 = vpop.f32.mrf.mxu1  ;;  %2451 = vmatpush1.bf16.msra.mxu1 %v3759_v8 }
 0xab1   : > { %v3762_v9 = vld [vmem:[#allocation14 + $0x28] ss:$16 sps:$4 sm:$0xff]  }
 0xab2   : > { %v3539_v10 = vpop.f32.mrf.mxu1 }
 0xab3   : > { %v3767_v10 = vld [vmem:[#allocation14 + $0x4] ss:$16 sps:$4 sm:$0xff]  }
 0xab4   : > { %2452 = vmatprep.subr.bf16.mxu1 %v3767_v10 }
 0xab5   : > { %2453 = vmatpush1.bf16.msra.mxu1 %v3765_v12 }
 0xab6   : > { %3340 = vmatprep.subr.bf16.mxu1 %v3771_v0 }
 0xb17   : > { %v2041_v16 = vpop.permute.xlu0 %2040 }
 0xb18   : > { %v2057_v24 = vsel %vm2055_vm5, %v2052_v21, %v2041_v16 }
 0xb21   : > { %v2043_v22 = vpop.permute.xlu1 %2042 }
 0xb22   : > { %v2059_v25 = vsel %vm2055_vm5, %v2054_v20, %v2043_v22 }
 0xb23   : > { %v3184_v26 = vcombine.low %v2057_v24, %v2059_v25  ;;  %v3194_v25 = vld [vmem:[%s4925_s15] ss:$0 sm:$0xff] }
 0xb25   : > { %3557 = vmatmul.mubr.bf16.vlgmr.msra.gmra.mxu0 %v3184_v26 }
 0xb26   : > { %2482 = vmatpush1.bf16.msra.mxu0 %v3726_v23  ;;  %2513 = vmatprep.mubr.bf16.mxu0 %v4187_v38  ;;  %v3779_v23 = vld [vmem:[#allocation16 + $0x68] sm:$0xff]  }
 0xb27   : > { %2483 = vmatprep.subr.bf16.mxu0 %v3734_v54  ;;  %v3790_v54 = vld [vmem:[#allocation16 + $0x98] sm:$0xff]  }
 0xb2a   : > { %2484 = vmatpush1.bf16.msra.mxu0 %v3732_v56  ;;  %v3792_v56 = vld [vmem:[#allocation16 + $0xd0] sm:$0xff]  }
 0xb2b   : > { %2485 = vmatprep.subr.bf16.mxu0 %v3740_v18  ;;  %v3794_v18 = vld [vmem:[#allocation16 + $0x90] sm:$0xff]  }
 0xb2e   : > { %2486 = vmatpush1.bf16.msra.mxu0 %v3738_v39  ;;  %v3796_v39 = vld [vmem:[#allocation16 + $0xc8] sm:$0xff]  }
 0xb2f   : > { %2487 = vmatprep.subr.bf16.mxu0 %v3746_v60  ;;  %v3800_v60 = vld [vmem:[#allocation16 + $0xc0] sm:$0xff]  }
 0xb32   : > { %2488 = vmatpush1.bf16.msra.mxu0 %v3744_v59  ;;  %v3799_v59 = vld [vmem:[#allocation16 + $0x40] sm:$0xff]  }
 0xb33   : > { %2489 = vmatprep.subr.bf16.mxu0 %v3752_v62  ;;  %v3802_v62 = vld [vmem:[#allocation16 + $0x80] sm:$0xff]  }
 0xb36   : > { %2490 = vmatpush1.bf16.msra.mxu0 %v3750_v1  ;;  %v2259_v1 = vshrl.u32 %v2258_v63, 7 }
 0xb37   : > { %2491 = vmatprep.subr.bf16.mxu0 %v3758_v3 }
 0xb38   : > { %v2264_v2 = vsub.s32 1, %v2259_v1  ;;  %v2272_v3 = vsub.s32 3, %v2259_v1  ;;  %v2260_v38 = vsub.s32 0, %v2259_v1  ;;  %v2268_v4 = vsub.s32 2, %v2259_v1 }
 0xb3a   : > { %2492 = vmatpush1.bf16.msra.mxu0 %v3756_v5  ;;  %v2256_v5 = vld [vmem:[%s5011_s27] sm:$0xf]  ;;  %s2926_s27 = scalar_lea.sflag [#allocation4], %s4555_s5 }
 0xb3b   : > { %2493 = vmatprep.subr.bf16.mxu0 %v3764_v7  ;;  %v2265_v8 = vrot.slane %v2256_v5, %v2264_v2  ;;  %v2261_v10 = vrot.slane %v2256_v5, %v2260_v38 }
 0xb3e   : > { %2494 = vmatpush1.bf16.msra.mxu0 %v3762_v9  ;;  %v2273_v9 = vrot.slane %v2256_v5, %v2272_v3 }
 0xb3f   : > { %2495 = vmatprep.subr.bf16.mxu0 %v3770_v11  ;;  %v2269_v11 = vrot.slane %v2256_v5, %v2268_v4 }
 0xb42   : > { %2496 = vmatpush1.bf16.msra.mxu0 %v3768_v13 }
 0xb43   : > { %3362 = vmatprep.subr.bf16.mxu0 %v3772_v14 }
 0xbe5   : > { %v2164_v37 = vpop.f32.mrf.mxu0 }
 0xbe6   : > { %v2171_v30 = vadd.f32 %v3843_v28, %v2164_v37  ;;  %v3195_v28 = vld [vmem:[%s5010_s23] ss:$0 sm:$0xff] }
 0xbe7   : > { %v3558_v31 = vpop.f32.mrf.mxu0 }
 0xbe8   : > { %v2180_v32 = vadd.f32 %v3193_v44, %v2171_v30 }
 0xbe9   : > { %v2167_v33 = vpop.f32.mrf.mxu0 }
 0xbea   : > { %v2172_v36 = vadd.f32 %v3844_v34, %v2167_v33  ;;  %2182 = vadd.xlane.f32.xlu0 %v2180_v32  ;;  %v3773_v33 = vld [vmem:[#allocation16 + $0x38] sm:$0xff]  }
 0xbeb   : > { %v3559_v40 = vpop.f32.mrf.mxu0  ;;  %v3774_v34 = vld [vmem:[#allocation16 + $0xb8] sm:$0xff]  }
 0xbec   : > { %v2181_v41 = vadd.f32 %v3193_v44, %v2172_v36  ;;  %v3775_v40 = vld [vmem:[#allocation16 + $0x70] sm:$0xff]  }
 0xbee   : > { %2184 = vadd.xlane.f32.xlu1 %v2181_v41 }
 0xc73   : > { %v2183_v27 = vpop.xlane.xlu0 %2182 }
 0xc74   : > { %v2187_v47 = vmul.f32 0.0078125, %v2183_v27  ;;  %v3781_v27 = vld [vmem:[#allocation16 + $0x28] sm:$0xff]  }
 0xc76   : > { %v4825_v35 = vsub.f32 %v2180_v32, %v2187_v47  ;;  %v3782_v47 = vld [vmem:[#allocation16 + $0xa8] sm:$0xff]  }
 0xc77   : > { %v2185_v48 = vpop.xlane.xlu1 %2184 }
 0xc78   : > { %v2188_v49 = vmul.f32 0.0078125, %v2185_v48  ;;  %v2191_v50 = vmul.f32 %v4825_v35, %v4825_v35  ;;  %v3784_v48 = vld [vmem:[#allocation16 + $0xe0] sm:$0xff]  }
 0xc7a   : > { %v4829_v51 = vsub.f32 %v2181_v41, %v2188_v49  ;;  %2193 = vadd.xlane.f32.xlu0 %v2191_v50  ;;  %v3776_v41 = vld [vmem:[#allocation16 + $0xf0] sm:$0xff]   ;;  %v3785_v49 = vld [vmem:[#allocation16 + $0x20] sm:$0xff]  }
 0xc7b   : > { %v3786_v50 = vld [vmem:[#allocation16 + $0xa0] sm:$0xff]  }
 0xc7c   : > { %v2192_v52 = vmul.f32 %v4829_v51, %v4829_v51 }
 0xc7e   : > { %2195 = vadd.xlane.f32.xlu0 %v2192_v52  ;;  %v3788_v52 = vld [vmem:[#allocation16 + $0xd8] sm:$0xff]  }
 0xd03   : > { %v2194_v15 = vpop.xlane.xlu0 %2193 }
 0xd04   : > { %v2197_v16 = vmul.f32 0.0078125, %v2194_v15 }
 0xd06   : > { %v2199_v17 = vadd.f32 1e-05, %v2197_v16 }
 0xd07   : > { %v2196_v19 = vpop.xlane.xlu0 %2195 }
 0xd08   : > { %3835 = vrsqrt.f32 %v2199_v17  ;;  %v2198_v20 = vmul.f32 0.0078125, %v2196_v19 }
 0xd0a   : > { %v2200_v21 = vadd.f32 1e-05, %v2198_v20 }
 0xd0c   : > { %3837 = vrsqrt.f32 %v2200_v21 }
 0xd15   : > { %v3836_v22 = vpop.eup %3835 }
 0xd16   : > { %v2203_v24 = vmul.f32 %v3836_v22, %v4825_v35  ;;  %v3783_v35 = vld [vmem:[#allocation16 + $0x60] sm:$0xff]  }
 0xd18   : > { %v2212_v44 = vmul.f32 %v3194_v25, %v2203_v24 }
 0xd19   : > { %v3838_v26 = vpop.eup %3837 }
 0xd1a   : > { %v2204_v37 = vmul.f32 %v3838_v26, %v4829_v51  ;;  %v4841_v31 = vadd.f32 %v3195_v28, %v2212_v44  ;;  %v3787_v51 = vld [vmem:[#allocation16 + $0x58] sm:$0xff]  }
 0xd1c   : > { %v2213_v30 = vmul.f32 %v3194_v25, %v2204_v37 }
 0xd1e   : > { %v4843_v32 = vadd.f32 %v3195_v28, %v2213_v30 }
 0xd20   : > { %v2223_v36 = vpack.c.bf16 %v4843_v32, %v4841_v31 }
 0xd22   : > { %2471 = vmatmul.mubr.bf16.vlgmr.msra.gmra.mxu1 %v2223_v36  ;;  %2514 = vmatmul.mubr.bf16.vlgmr.msra.gmra.mxu0 %v2223_v36 }
 0xd23   : > { %3341 = vmatpush3.bf16.msra.mxu1 %v3773_v33  ;;  %3363 = vmatpush3.bf16.msra.mxu0 %v3774_v34 }
 0xd24   : > { %3342 = vmatprep.subr.bf16.mxu1 %v3775_v40  ;;  %3364 = vmatprep.subr.bf16.mxu0 %v3776_v41 }
 0xd27   : > { %3343 = vmatpush3.bf16.msra.mxu1 %v3777_v43  ;;  %3365 = vmatpush3.bf16.msra.mxu0 %v3778_v45 }
 0xd28   : > { %3344 = vmatprep.subr.bf16.mxu1 %v3779_v23  ;;  %3366 = vmatprep.subr.bf16.mxu0 %v3780_v46 }
 0xd2b   : > { %3345 = vmatpush3.bf16.msra.mxu1 %v3781_v27  ;;  %3367 = vmatpush3.bf16.msra.mxu0 %v3782_v47  ;;  %v3228_v47 = vld [vmem:[%s5012_s3] ss:$0 sm:$0xff] }
 0xd2c   : > { %3346 = vmatprep.subr.bf16.mxu1 %v3783_v35  ;;  %3368 = vmatprep.subr.bf16.mxu0 %v3784_v48 }
 0xd2f   : > { %3347 = vmatpush3.bf16.msra.mxu1 %v3785_v49  ;;  %3369 = vmatpush3.bf16.msra.mxu0 %v3786_v50 }
 0xd30   : > { %3348 = vmatprep.subr.bf16.mxu1 %v3787_v51  ;;  %3370 = vmatprep.subr.bf16.mxu0 %v3788_v52 }
 0xd33   : > { %3349 = vmatpush3.bf16.msra.mxu1 %v3789_v53  ;;  %3371 = vmatpush3.bf16.msra.mxu0 %v3790_v54 }
 0xd34   : > { %3350 = vmatprep.subr.bf16.mxu1 %v3791_v55  ;;  %3372 = vmatprep.subr.bf16.mxu0 %v3792_v56 }
 0xd37   : > { %3351 = vmatpush3.bf16.msra.mxu1 %v3793_v57  ;;  %3373 = vmatpush3.bf16.msra.mxu0 %v3794_v18 }
 0xd38   : > { %3352 = vmatprep.subr.bf16.mxu1 %v3795_v29  ;;  %3374 = vmatprep.subr.bf16.mxu0 %v3796_v39 }
 0xd3b   : > { %3353 = vmatpush3.bf16.msra.mxu1 %v3797_v42  ;;  %3375 = vmatpush3.bf16.msra.mxu0 %v3798_v58 }
 0xd3c   : > { %3354 = vmatprep.subr.bf16.mxu1 %v3799_v59  ;;  %3376 = vmatprep.subr.bf16.mxu0 %v3800_v60 }
 0xd3f   : > { %3355 = vmatpush3.bf16.msra.mxu1 %v3801_v61  ;;  %3377 = vmatpush3.bf16.msra.mxu0 %v3802_v62 }
 0xde2   : > { %v2472_v6 = vpop.f32.mrf.mxu1  ;;  %v2515_v7 = vpop.f32.mrf.mxu0 }
 0xde3   : > { %v2473_v20 = vadd.f32 %v2472_v6, %v2261_v10  ;;  %v2516_v21 = vadd.f32 %v2515_v7, %v2269_v11 }
 0xde4   : > { %v2474_v12 = vpop.f32.mrf.mxu1  ;;  %v2517_v13 = vpop.f32.mrf.mxu0 }
 0xde5   : > { %v2475_v15 = vadd.f32 %v2474_v12, %v2265_v8  ;;  %v2518_v16 = vadd.f32 %v2517_v13, %v2273_v9  ;;  %v2524_v36 = vmax.f32 %v2473_v20, 0.0  ;;  %v2526_v40 = vmax.f32 %v2516_v21, 0.0 }
 0xde6   : > { %v2476_v0 = vpop.f32.mrf.mxu1  ;;  %v2519_v14 = vpop.f32.mrf.mxu0 }
 0xde7   : > { %v2477_v17 = vadd.f32 %v2476_v0, %v2261_v10  ;;  %v2520_v19 = vadd.f32 %v2519_v14, %v2269_v11  ;;  %v2525_v28 = vmax.f32 %v2475_v15, 0.0  ;;  %v2527_v30 = vmax.f32 %v2518_v16, 0.0  ;;  %v3262_v10 = vld [vmem:[%s5014_s26] ss:$0 sm:$0xff] }
 0xde8   : > { %v2478_v22 = vpop.f32.mrf.mxu1  ;;  %v2521_v24 = vpop.f32.mrf.mxu0 }
 0xde9   : > { %v2479_v25 = vadd.f32 %v2478_v22, %v2265_v8  ;;  %v2522_v26 = vadd.f32 %v2521_v24, %v2273_v9  ;;  %v2528_v37 = vmax.f32 %v2477_v17, 0.0  ;;  %v2530_v44 = vmax.f32 %v2520_v19, 0.0  ;;  %v3261_v8 = vld [vmem:[%s5013_s17] ss:$0 sm:$0xff] }
 0xdeb   : > { %v2529_v33 = vmax.f32 %v2479_v25, 0.0  ;;  %v2531_v34 = vmax.f32 %v2522_v26, 0.0  ;;  %v2532_v45 = vpack.c.bf16 %v2528_v37, %v2524_v36  ;;  %v2534_v23 = vpack.c.bf16 %v2530_v44, %v2526_v40 }
 0xded   : > { %v2533_v41 = vpack.c.bf16 %v2529_v33, %v2525_v28  ;;  %v2535_v43 = vpack.c.bf16 %v2531_v34, %v2527_v30 }
 0xdef   : > { %2831 = vmatprep.mubr.bf16.mxu1 %v2533_v41  ;;  %2872 = vmatprep.mubr.bf16.mxu0 %v2535_v43 }
 0xdf0   : > { %2832 = vmatmul.mubr.bf16.vlgmr.msra.gmra.mxu1 %v2532_v45  ;;  %2873 = vmatmul.mubr.bf16.vlgmr.msra.gmra.mxu0 %v2534_v23 }
 0xeb0   : > { %v3356_v46 = vpop.f32.mrf.mxu1  ;;  %v3378_v27 = vpop.f32.mrf.mxu0 }
 0xeb2   : > { %v3357_v35 = vpop.f32.mrf.mxu1  ;;  %v3379_v48 = vpop.f32.mrf.mxu0 }
 0xeb3   : > { %v3358_v49 = vadd.f32 %v3357_v35, %v3356_v46  ;;  %v3380_v53 = vadd.f32 %v3379_v48, %v3378_v27 }
 0xeb4   : > { %v3359_v50 = vpop.f32.mrf.mxu1  ;;  %v3381_v51 = vpop.f32.mrf.mxu0 }
 0xeb5   : > { %v2834_v52 = vadd.f32 %v3358_v49, %v3228_v47 }
 0xeb6   : > { %v3360_v54 = vpop.f32.mrf.mxu1  ;;  %v3382_v55 = vpop.f32.mrf.mxu0 }
 0xeb7   : > { %v2875_v56 = vadd.f32 %v3380_v53, %v2834_v52  ;;  %v3361_v57 = vadd.f32 %v3360_v54, %v3359_v50  ;;  %v3383_v29 = vadd.f32 %v3382_v55, %v3381_v51 }
 0xeb9   : > { %v2837_v18 = vadd.f32 %v3361_v57, %v3228_v47  ;;  %v2881_v39 = vadd.f32 %v2875_v56, %v4841_v31 }
 0xebb   : > { %v2878_v42 = vadd.f32 %v3383_v29, %v2837_v18  ;;  %2883 = vadd.xlane.f32.xlu0 %v2881_v39 }
 0xebd   : > { %v2882_v58 = vadd.f32 %v2878_v42, %v4843_v32 }
 0xebf   : > { %2885 = vadd.xlane.f32.xlu1 %v2882_v58 }
 0xf44   : > { %v2884_v59 = vpop.xlane.xlu0 %2883 }
 0xf45   : > { %v2887_v60 = vmul.f32 0.0078125, %v2884_v59 }
 0xf47   : > { %v2889_v61 = vsub.f32 %v2881_v39, %v2887_v60 }
 0xf48   : > { %v2886_v62 = vpop.xlane.xlu1 %2885 }
 0xf49   : > { %v2888_v63 = vmul.f32 0.0078125, %v2886_v62  ;;  %v2891_v1 = vmul.f32 %v2889_v61, %v2889_v61 }
 0xf4b   : > { %v2890_v2 = vsub.f32 %v2882_v58, %v2888_v63  ;;  %2893 = vadd.xlane.f32.xlu0 %v2891_v1 }
 0xf4d   : > { %v2892_v3 = vmul.f32 %v2890_v2, %v2890_v2 }
 0xf4f   : > { %2895 = vadd.xlane.f32.xlu1 %v2892_v3 }
 0xfd4   : > { %v2894_v38 = vpop.xlane.xlu0 %2893 }
 0xfd5   : > { %v2897_v4 = vmul.f32 0.0078125, %v2894_v38 }
 0xfd7   : > { %v2899_v31 = vadd.f32 1e-05, %v2897_v4 }
 0xfd8   : > { %v2896_v5 = vpop.xlane.xlu1 %2895 }
 0xfd9   : > { %3839 = vrsqrt.f32 %v2899_v31  ;;  %v2898_v6 = vmul.f32 0.0078125, %v2896_v5 }
 0xfdb   : > { %v2900_v32 = vadd.f32 1e-05, %v2898_v6 }
 0xfdd   : > { %3841 = vrsqrt.f32 %v2900_v32 }
 0xfe6   : > { %v3840_v7 = vpop.eup %3839 }
 0xfe7   : > { %v2903_v9 = vmul.f32 %v3840_v7, %v2889_v61 }
 0xfe9   : > { %v2912_v11 = vmul.f32 %v3261_v8, %v2903_v9 }
 0xfea   : > { %v3842_v12 = vpop.eup %3841 }
 0xfeb   : > { %v2921_v13 = vadd.f32 %v3262_v10, %v2912_v11  ;;  %v2904_v0 = vmul.f32 %v3842_v12, %v2890_v2 }
 0xfed   : > { %v2913_v14 = vmul.f32 %v3261_v8, %v2904_v0  ;;  %2923 = vst [vmem:[%s784_s14] sm:$0xff] %v2921_v13 }
 0xfef   : > { %v2922_v15 = vadd.f32 %v3262_v10, %v2913_v14 }
 0xff1   : > { %2924 = vst [vmem:[%s784_s14 + $0x8] sm:$0xff] %v2922_v15 }
 0xff2   : > { %4098 = shalt.err (!%p4095_p0)
}
 0xff3   : > { %s4099_s3 = scalar_lea.hbm %s4866_s29, 256  ;;  %s4103_s17 = scalar_lea.hbm %s5016_s16, 1024 }
 0xff4   : > { %p4100_p9 = scmp.ne.s32.totalorder %s4866_s29, %s4099_s3  ;;  %p4104_p13 = scmp.lt.s32.totalorder %s4866_s29, %s5016_s16 }
 0xff5   : > { %p4105_p7 = scmp.lt.s32.totalorder %s4103_s17, %s4099_s3 }
 0xff6   : > { %p4101_p2 = pnand %p4100_p9, %p5017_p1 }
 0xff7   : > { %p4106_p8 = por %p4105_p7, %p4104_p13 }
 0xff8   : > { %p4102_p12 = pneg %p4101_p2 }
 0xffa   : > { %p4107_p11 = pnand %p4106_p8, %p4102_p12 }
 0xffc   : > { %4110 = shalt.err (!%p4107_p11)
}
 0xffd   : > { %s4189_s26 = smov 128   ;;  %s4190_s7 = smov 8  }
 0xffe   : > { %3590 = dma.vmem_to_hbm [thread:$0]  (%p5017_p1), %s4868_s18, 256, %s4866_s29, %s2926_s27, %s4189_s26, %s4189_s26, %s4190_s7  }
 0xfff PF: > { %s5018_s14 = sld [smem:[#allocation25_spill]] }
0x1000   : > { %s5019_s0 = sld [smem:[#allocation24_spill]] }
0x1001   : > { %s5020_s23 = sld [smem:[#allocation29_spill]] }
0x1005   : > { %p3638_p3 = scmp.ge.s32.totalorder %s5018_s14, 2 }
0x1006   : > { %s2954_s22 = sand.u32 1, %s5019_s0  }
0x1007   : > { %p5021_p5 = scmp.ne.s32.totalorder %s5020_s23, 0  ;;  %s2955_s2 = scalar_lea.sflag [#allocation4], %s2954_s22 }
0x1009   : > { %p3622_p6 = pnand %p3638_p3, %p5021_p5 }
0x100b   : > { %p3623_p4 = pneg %p3622_p6 }
0x100d   : > { %4148 = dma.done.wait (%p3623_p4), %s2955_s2, 256  }
0x100e   : > { %4150 = vsyncadd (%p3623_p4), %s2955_s2, 4294967040  ;;  %s5022_s21 = sld [smem:[#allocation26_spill]]  ;;  %s5024_s0 = smov %s4157_s30 }
0x100f   : > { %s5023_s9 = sld [smem:[#allocation27_spill]]  ;;  %s5025_s30 = smov %s4161_s20 }
0x1014   : > { %p38_p10 = scmp.ge.s32.totalorder %s5022_s21, 6  }
0x1015   : > { %s5026_s20 = smov %s5023_s9 }
0x1016   :  { %40 = sbr.rel (!%p38_p10) target bundleno = 25 (0x19), region = 189 }
0x101b   :  { %2960 = vsyncpa [#allocation3], 1 }
0x101c   :  { %2962 = vsyncpa [#allocation3 + $0x1], 1 }
0x101d   :  { %2963 = vsyncpa [#allocation6], 1 }
0x101e   :  { %2965 = vsyncpa [#allocation6 + $0x1], 1 }
0x101f   :  { %2966 = vsyncpa [#allocation9], 1 }
0x1020   :  { %2967 = vsyncpa [#allocation12], 1 }
0x1021   :  { %2968 = vsyncpa [#allocation15], 1 }
0x1022   :  { %2969 = vsyncpa [#allocation4], 1 }
0x1023   :  { %2971 = vsyncpa [#allocation4 + $0x1], 1 }

</bundles_post_ra>
